<compile_context>
chip_gen: v6e
topology: v6e:2x2x1
jax: 0.10.0
libtpu: 0.0.40
codegen_flags: <defaults>
</compile_context>

<pallas_src>
import functools

import jax
import jax.numpy as jnp
from jax import lax
from jax.experimental import pallas as pl
from jax.experimental.pallas import tpu as pltpu

EPS = 1e-5


def _conv1x3_bn(x, left_pad, right_pad, w_ref, b_ref, *, C, W):
    """(1,3) conv along W (pad 1) + folded-BN shift on a (C, THW) f32 block.

    x:         (C, THW) f32, rows of length W flattened into the last dim.
    left_pad:  (C, THW) bool, True where the w-1 neighbour is padding.
    right_pad: (C, THW) bool, True where the w+1 neighbour is padding.
    w_ref:     SMEM (C*C*3,) f32, BN-scale-folded weights, index (co*C+ci)*3+k.
    b_ref:     SMEM (C,) f32, folded per-channel shift (BN shift + conv bias).
    """
    thw = x.shape[1]
    # Shifted copies via XLU roll; zero positions whose neighbour is padding.
    x_m1 = jnp.where(left_pad, 0.0, pltpu.roll(x, 1, axis=1))         # x[w-1]
    x_p1 = jnp.where(right_pad, 0.0, pltpu.roll(x, thw - 1, axis=1))  # x[w+1]
    taps = (x_m1, x, x_p1)
    # (ci, k) -> (1, THW) plane; hoisted so each slice is built only once.
    planes = [[taps[k][ci:ci + 1, :] for k in range(3)] for ci in range(C)]

    rows = []
    for co in range(C):
        acc = None
        for ci in range(C):
            for k in range(3):
                term = planes[ci][k] * w_ref[(co * C + ci) * 3 + k]
                acc = term if acc is None else acc + term
        rows.append(acc + b_ref[co])
    return jnp.concatenate(rows, axis=0)                              # (C, THW)


def _resnet_block_kernel(x_ref, w1_ref, w2_ref, b1_ref, b2_ref, o_ref,
                         *, C, W, tN):
    """Fused relu(bn1(conv1(x))) -> bn2(conv2(.)) -> +x -> relu on tN images."""
    thw = x_ref.shape[-1]
    # Padding masks depend only on the column index; build once, share across
    # both convs and all tN images in this block.
    col = lax.broadcasted_iota(jnp.int32, (C, thw), 1) % W
    left_pad = col == 0
    right_pad = col == (W - 1)

    for n in range(tN):                                               # static unroll
        x = x_ref[n].astype(jnp.float32)                              # (C, THW)
        h1 = _conv1x3_bn(x, left_pad, right_pad, w1_ref, b1_ref, C=C, W=W)
        h1 = jnp.maximum(h1, 0.0)                                     # ReLU
        h2 = _conv1x3_bn(h1, left_pad, right_pad, w2_ref, b2_ref, C=C, W=W)
        o_ref[n] = jnp.maximum(h2 + x, 0.0).astype(o_ref.dtype)       # +res, ReLU


def _pick_tiles(N, C, H, W, budget_bytes=2 * 1024 * 1024):
    """Choose (tN, tH): pack tN images per block if an image fits the budget,
    otherwise tile H (keeping tH*W a multiple of 128 so the block's last dim
    stays lane-dense and the BlockSpec stays legal).  Budget is conservative so
    the live block-sized buffers + double buffering fit every generation's
    scoped-VMEM default (16/32 MiB on v5e/v6e/v7x).  tN is capped to bound the
    static unroll inside the kernel."""
    img_bytes = C * H * W * 4
    if img_bytes <= budget_bytes:
        max_tn = max(1, min(N, 8, budget_bytes // img_bytes))
        for cand in range(max_tn, 0, -1):
            if N % cand == 0:
                return cand, H
        return 1, H
    for th in range(H - 1, 0, -1):
        if H % th == 0 and (th * W) % 128 == 0 and C * th * W * 4 <= budget_bytes:
            return 1, th
    return 1, H


def resnet_block(x_nchw, p):
    """x_nchw: (N, C, H, W) f32 -> (N, C, H, W) f32 (eval-mode ResNetBlock)."""
    N, C, H, W = x_nchw.shape
    HW = H * W
    x_flat = x_nchw.reshape(N, C, HW).astype(jnp.float32)   # free; no transpose

    # Fold eval-mode BN scale into the conv weights; keep only a shift.
    def fold(w, bias, gamma, beta, mean, var):
        scale = gamma / jnp.sqrt(var + EPS)                            # (C,)
        w_f = (w[:, :, 0, :] * scale[:, None, None]).reshape(-1)       # (C*C*3,)
        b_f = beta + (bias - mean) * scale                             # (C,)
        return w_f.astype(jnp.float32), b_f.astype(jnp.float32)

    w1f, b1f = fold(p["w1"], p["b1"], p["g1"], p["beta1"], p["m1"], p["v1"])
    w2f, b2f = fold(p["w2"], p["b2"], p["g2"], p["beta2"], p["m2"], p["v2"])

    tN, tH = _pick_tiles(N, C, H, W)
    blk = (tN, C, tH * W)
    grid = (N // tN, H // tH)
    kernel = functools.partial(_resnet_block_kernel, C=C, W=W, tN=tN)

    out_flat = pl.pallas_call(
        kernel,
        out_shape=jax.ShapeDtypeStruct((N, C, HW), jnp.float32),
        grid=grid,
        in_specs=[
            pl.BlockSpec(blk, lambda i, t: (i, 0, t)),                 # x (+res)
            pl.BlockSpec(memory_space=pltpu.MemorySpace.SMEM),         # w1 folded
            pl.BlockSpec(memory_space=pltpu.MemorySpace.SMEM),         # w2 folded
            pl.BlockSpec(memory_space=pltpu.MemorySpace.SMEM),         # shift 1
            pl.BlockSpec(memory_space=pltpu.MemorySpace.SMEM),         # shift 2
        ],
        out_specs=pl.BlockSpec(blk, lambda i, t: (i, 0, t)),
        compiler_params=pltpu.CompilerParams(
            dimension_semantics=("parallel", "parallel")),
    )(x_flat, w1f, w2f, b1f, b2f)

    return out_flat.reshape(N, C, H, W)


def reference(x, p):
    """Pure-JAX NCHW reference matching PyTorch eval-mode semantics."""
    def conv(x, w, b):
        y = lax.conv_general_dilated(
            x, w, window_strides=(1, 1), padding=((0, 0), (1, 1)),
            dimension_numbers=("NCHW", "OIHW", "NCHW"))
        return y + b[None, :, None, None]

    def bn(x, g, bt, m, v):
        return ((x - m[None, :, None, None])
                / jnp.sqrt(v[None, :, None, None] + EPS)
                * g[None, :, None, None] + bt[None, :, None, None])

    out = jax.nn.relu(bn(conv(x, p["w1"], p["b1"]), p["g1"], p["beta1"], p["m1"], p["v1"]))
    out = bn(conv(out, p["w2"], p["b2"]), p["g2"], p["beta2"], p["m2"], p["v2"])
    return jax.nn.relu(out + x)


if __name__ == "__main__":
    key = jax.random.PRNGKey(0)
    N, C, H, W = 2, 4, 16, 16         # in_channels = out_channels = 4, kernel (1,3)

    keys = jax.random.split(key, 12)
    x = jax.random.normal(keys[0], (N, C, H, W), jnp.float32)

    params = {
        "w1": 0.2 * jax.random.normal(keys[1], (C, C, 1, 3), jnp.float32),
        "b1": 0.1 * jax.random.normal(keys[2], (C,), jnp.float32),
        "w2": 0.2 * jax.random.normal(keys[3], (C, C, 1, 3), jnp.float32),
        "b2": 0.1 * jax.random.normal(keys[4], (C,), jnp.float32),
        # BN1 params / running stats
        "g1": 1.0 + 0.1 * jax.random.normal(keys[5], (C,), jnp.float32),
        "beta1": 0.1 * jax.random.normal(keys[6], (C,), jnp.float32),
        "m1": 0.1 * jax.random.normal(keys[7], (C,), jnp.float32),
        "v1": 1.0 + 0.1 * jax.random.uniform(keys[8], (C,), jnp.float32),
        # BN2 params / running stats
        "g2": 1.0 + 0.1 * jax.random.normal(keys[9], (C,), jnp.float32),
        "beta2": 0.1 * jax.random.normal(keys[10], (C,), jnp.float32),
        "m2": 0.1 * jax.random.normal(keys[11], (C,), jnp.float32),
        "v2": jnp.ones((C,), jnp.float32),
    }

    out = jax.block_until_ready(resnet_block(x, params))
    ref = jax.block_until_ready(reference(x, params))

    assert out.shape == (N, C, H, W), out.shape
    assert jnp.allclose(out, ref, atol=1e-4, rtol=1e-4), float(jnp.max(jnp.abs(out - ref)))
    print("KERNEL_OK")
</pallas_src>

<mosaic_0001>
module attributes {stable_mosaic.version = 11 : i64} {
  func.func @_resnet_block_kernel(%arg0: i32, %arg1: i32, %arg2: memref<2x4x256xf32, #tpu.memory_space<vmem>>, %arg3: memref<48xf32, #tpu.memory_space<smem>>, %arg4: memref<48xf32, #tpu.memory_space<smem>>, %arg5: memref<4xf32, #tpu.memory_space<smem>>, %arg6: memref<4xf32, #tpu.memory_space<smem>>, %arg7: memref<2x4x256xf32, #tpu.memory_space<vmem>>) attributes {dimension_semantics = [#tpu.dimension_semantics<parallel>, #tpu.dimension_semantics<parallel>], iteration_bounds = array<i64: 1, 1>, scalar_prefetch = 0 : i64, scratch_operands = 0 : i64, tpu.core_type = #tpu.core_type<tc>, window_params = [{transform_indices = @transform_0, window_bounds = array<i64: 2, 4, 256>}, {transform_indices = @transform_1, window_bounds = array<i64: 48>}, {transform_indices = @transform_2, window_bounds = array<i64: 48>}, {transform_indices = @transform_3, window_bounds = array<i64: 4>}, {transform_indices = @transform_4, window_bounds = array<i64: 4>}, {transform_indices = @transform_5, window_bounds = array<i64: 2, 4, 256>}]} {
    %0 = tpu.iota {dimensions = array<i32: 1>} : vector<4x256xi32>
    %c16_i32 = arith.constant 16 : i32
    %c0_i32 = arith.constant 0 : i32
    %1 = arith.cmpi eq, %c16_i32, %c0_i32 : i32
    %c1_i32 = arith.constant 1 : i32
    %2 = arith.select %1, %c1_i32, %c16_i32 : i32
    %3 = vector.broadcast %2 : i32 to vector<4x256xi32>
    %4 = arith.remsi %0, %3 : vector<4x256xi32>
    %c0_i32_0 = arith.constant 0 : i32
    %5 = vector.broadcast %c0_i32_0 : i32 to vector<4x256xi32>
    %6 = arith.cmpi ne, %4, %5 : vector<4x256xi32>
    %c0_i32_1 = arith.constant 0 : i32
    %7 = vector.broadcast %c0_i32_1 : i32 to vector<4x256xi32>
    %8 = arith.cmpi slt, %4, %7 : vector<4x256xi32>
    %c0_i32_2 = arith.constant 0 : i32
    %9 = arith.cmpi slt, %2, %c0_i32_2 : i32
    %10 = vector.broadcast %9 : i1 to vector<4x256xi1>
    %11 = vector.broadcast %10 : vector<4x256xi1> to vector<4x256xi1>
    %12 = arith.xori %8, %11 : vector<4x256xi1>
    %13 = arith.andi %12, %6 : vector<4x256xi1>
    %14 = vector.broadcast %2 : i32 to vector<4x256xi32>
    %15 = arith.addi %4, %14 : vector<4x256xi32>
    %16 = arith.select %13, %15, %4 : vector<4x256xi1>, vector<4x256xi32>
    %c0_i32_3 = arith.constant 0 : i32
    %17 = vector.broadcast %c0_i32_3 : i32 to vector<4x256xi32>
    %18 = arith.cmpi eq, %16, %17 : vector<4x256xi32>
    %c15_i32 = arith.constant 15 : i32
    %19 = vector.broadcast %c15_i32 : i32 to vector<4x256xi32>
    %20 = arith.cmpi eq, %16, %19 : vector<4x256xi32>
    %c0 = arith.constant 0 : index
    %c0_4 = arith.constant 0 : index
    %c0_5 = arith.constant 0 : index
    %21 = vector.load %arg2[%c0, %c0_4, %c0_5] : memref<2x4x256xf32, #tpu.memory_space<vmem>>, vector<1x4x256xf32>
    %22 = vector.shape_cast %21 : vector<1x4x256xf32> to vector<4x256xf32>
    %c1_i32_6 = arith.constant 1 : i32
    %23 = tpu.dynamic_rotate %22 by %c1_i32_6 dim 1 : vector<4x256xf32>, i32 -> vector<4x256xf32>
    %cst = arith.constant 0.000000e+00 : f32
    %24 = vector.broadcast %cst : f32 to vector<4x256xf32>
    %25 = arith.select %18, %24, %23 : vector<4x256xi1>, vector<4x256xf32>
    %c255_i32 = arith.constant 255 : i32
    %26 = tpu.dynamic_rotate %22 by %c255_i32 dim 1 : vector<4x256xf32>, i32 -> vector<4x256xf32>
    %cst_7 = arith.constant 0.000000e+00 : f32
    %27 = vector.broadcast %cst_7 : f32 to vector<4x256xf32>
    %28 = arith.select %20, %27, %26 : vector<4x256xi1>, vector<4x256xf32>
    %29 = vector.extract_strided_slice %25 {offsets = [0, 0], sizes = [1, 256], strides = [1, 1]} : vector<4x256xf32> to vector<1x256xf32>
    %30 = vector.extract_strided_slice %22 {offsets = [0, 0], sizes = [1, 256], strides = [1, 1]} : vector<4x256xf32> to vector<1x256xf32>
    %31 = vector.extract_strided_slice %28 {offsets = [0, 0], sizes = [1, 256], strides = [1, 1]} : vector<4x256xf32> to vector<1x256xf32>
    %32 = vector.extract_strided_slice %25 {offsets = [1, 0], sizes = [1, 256], strides = [1, 1]} : vector<4x256xf32> to vector<1x256xf32>
    %33 = vector.extract_strided_slice %22 {offsets = [1, 0], sizes = [1, 256], strides = [1, 1]} : vector<4x256xf32> to vector<1x256xf32>
    %34 = vector.extract_strided_slice %28 {offsets = [1, 0], sizes = [1, 256], strides = [1, 1]} : vector<4x256xf32> to vector<1x256xf32>
    %35 = vector.extract_strided_slice %25 {offsets = [2, 0], sizes = [1, 256], strides = [1, 1]} : vector<4x256xf32> to vector<1x256xf32>
    %36 = vector.extract_strided_slice %22 {offsets = [2, 0], sizes = [1, 256], strides = [1, 1]} : vector<4x256xf32> to vector<1x256xf32>
    %37 = vector.extract_strided_slice %28 {offsets = [2, 0], sizes = [1, 256], strides = [1, 1]} : vector<4x256xf32> to vector<1x256xf32>
    %38 = vector.extract_strided_slice %25 {offsets = [3, 0], sizes = [1, 256], strides = [1, 1]} : vector<4x256xf32> to vector<1x256xf32>
    %39 = vector.extract_strided_slice %22 {offsets = [3, 0], sizes = [1, 256], strides = [1, 1]} : vector<4x256xf32> to vector<1x256xf32>
    %40 = vector.extract_strided_slice %28 {offsets = [3, 0], sizes = [1, 256], strides = [1, 1]} : vector<4x256xf32> to vector<1x256xf32>
    %c0_8 = arith.constant 0 : index
    %41 = memref.load %arg3[%c0_8] : memref<48xf32, #tpu.memory_space<smem>>
    %42 = vector.broadcast %41 : f32 to vector<1x256xf32>
    %43 = arith.mulf %29, %42 : vector<1x256xf32>
    %c1 = arith.constant 1 : index
    %44 = memref.load %arg3[%c1] : memref<48xf32, #tpu.memory_space<smem>>
    %45 = vector.broadcast %44 : f32 to vector<1x256xf32>
    %46 = arith.mulf %30, %45 : vector<1x256xf32>
    %47 = arith.addf %43, %46 : vector<1x256xf32>
    %c2 = arith.constant 2 : index
    %48 = memref.load %arg3[%c2] : memref<48xf32, #tpu.memory_space<smem>>
    %49 = vector.broadcast %48 : f32 to vector<1x256xf32>
    %50 = arith.mulf %31, %49 : vector<1x256xf32>
    %51 = arith.addf %47, %50 : vector<1x256xf32>
    %c3 = arith.constant 3 : index
    %52 = memref.load %arg3[%c3] : memref<48xf32, #tpu.memory_space<smem>>
    %53 = vector.broadcast %52 : f32 to vector<1x256xf32>
    %54 = arith.mulf %32, %53 : vector<1x256xf32>
    %55 = arith.addf %51, %54 : vector<1x256xf32>
    %c4 = arith.constant 4 : index
    %56 = memref.load %arg3[%c4] : memref<48xf32, #tpu.memory_space<smem>>
    %57 = vector.broadcast %56 : f32 to vector<1x256xf32>
    %58 = arith.mulf %33, %57 : vector<1x256xf32>
    %59 = arith.addf %55, %58 : vector<1x256xf32>
    %c5 = arith.constant 5 : index
    %60 = memref.load %arg3[%c5] : memref<48xf32, #tpu.memory_space<smem>>
    %61 = vector.broadcast %60 : f32 to vector<1x256xf32>
    %62 = arith.mulf %34, %61 : vector<1x256xf32>
    %63 = arith.addf %59, %62 : vector<1x256xf32>
    %c6 = arith.constant 6 : index
    %64 = memref.load %arg3[%c6] : memref<48xf32, #tpu.memory_space<smem>>
    %65 = vector.broadcast %64 : f32 to vector<1x256xf32>
    %66 = arith.mulf %35, %65 : vector<1x256xf32>
    %67 = arith.addf %63, %66 : vector<1x256xf32>
    %c7 = arith.constant 7 : index
    %68 = memref.load %arg3[%c7] : memref<48xf32, #tpu.memory_space<smem>>
    %69 = vector.broadcast %68 : f32 to vector<1x256xf32>
    %70 = arith.mulf %36, %69 : vector<1x256xf32>
    %71 = arith.addf %67, %70 : vector<1x256xf32>
    %c8 = arith.constant 8 : index
    %72 = memref.load %arg3[%c8] : memref<48xf32, #tpu.memory_space<smem>>
    %73 = vector.broadcast %72 : f32 to vector<1x256xf32>
    %74 = arith.mulf %37, %73 : vector<1x256xf32>
    %75 = arith.addf %71, %74 : vector<1x256xf32>
    %c9 = arith.constant 9 : index
    %76 = memref.load %arg3[%c9] : memref<48xf32, #tpu.memory_space<smem>>
    %77 = vector.broadcast %76 : f32 to vector<1x256xf32>
    %78 = arith.mulf %38, %77 : vector<1x256xf32>
    %79 = arith.addf %75, %78 : vector<1x256xf32>
    %c10 = arith.constant 10 : index
    %80 = memref.load %arg3[%c10] : memref<48xf32, #tpu.memory_space<smem>>
    %81 = vector.broadcast %80 : f32 to vector<1x256xf32>
    %82 = arith.mulf %39, %81 : vector<1x256xf32>
    %83 = arith.addf %79, %82 : vector<1x256xf32>
    %c11 = arith.constant 11 : index
    %84 = memref.load %arg3[%c11] : memref<48xf32, #tpu.memory_space<smem>>
    %85 = vector.broadcast %84 : f32 to vector<1x256xf32>
    %86 = arith.mulf %40, %85 : vector<1x256xf32>
    %87 = arith.addf %83, %86 : vector<1x256xf32>
    %c0_9 = arith.constant 0 : index
    %88 = memref.load %arg5[%c0_9] : memref<4xf32, #tpu.memory_space<smem>>
    %89 = vector.broadcast %88 : f32 to vector<1x256xf32>
    %90 = arith.addf %87, %89 : vector<1x256xf32>
    %c12 = arith.constant 12 : index
    %91 = memref.load %arg3[%c12] : memref<48xf32, #tpu.memory_space<smem>>
    %92 = vector.broadcast %91 : f32 to vector<1x256xf32>
    %93 = arith.mulf %29, %92 : vector<1x256xf32>
    %c13 = arith.constant 13 : index
    %94 = memref.load %arg3[%c13] : memref<48xf32, #tpu.memory_space<smem>>
    %95 = vector.broadcast %94 : f32 to vector<1x256xf32>
    %96 = arith.mulf %30, %95 : vector<1x256xf32>
    %97 = arith.addf %93, %96 : vector<1x256xf32>
    %c14 = arith.constant 14 : index
    %98 = memref.load %arg3[%c14] : memref<48xf32, #tpu.memory_space<smem>>
    %99 = vector.broadcast %98 : f32 to vector<1x256xf32>
    %100 = arith.mulf %31, %99 : vector<1x256xf32>
    %101 = arith.addf %97, %100 : vector<1x256xf32>
    %c15 = arith.constant 15 : index
    %102 = memref.load %arg3[%c15] : memref<48xf32, #tpu.memory_space<smem>>
    %103 = vector.broadcast %102 : f32 to vector<1x256xf32>
    %104 = arith.mulf %32, %103 : vector<1x256xf32>
    %105 = arith.addf %101, %104 : vector<1x256xf32>
    %c16 = arith.constant 16 : index
    %106 = memref.load %arg3[%c16] : memref<48xf32, #tpu.memory_space<smem>>
    %107 = vector.broadcast %106 : f32 to vector<1x256xf32>
    %108 = arith.mulf %33, %107 : vector<1x256xf32>
    %109 = arith.addf %105, %108 : vector<1x256xf32>
    %c17 = arith.constant 17 : index
    %110 = memref.load %arg3[%c17] : memref<48xf32, #tpu.memory_space<smem>>
    %111 = vector.broadcast %110 : f32 to vector<1x256xf32>
    %112 = arith.mulf %34, %111 : vector<1x256xf32>
    %113 = arith.addf %109, %112 : vector<1x256xf32>
    %c18 = arith.constant 18 : index
    %114 = memref.load %arg3[%c18] : memref<48xf32, #tpu.memory_space<smem>>
    %115 = vector.broadcast %114 : f32 to vector<1x256xf32>
    %116 = arith.mulf %35, %115 : vector<1x256xf32>
    %117 = arith.addf %113, %116 : vector<1x256xf32>
    %c19 = arith.constant 19 : index
    %118 = memref.load %arg3[%c19] : memref<48xf32, #tpu.memory_space<smem>>
    %119 = vector.broadcast %118 : f32 to vector<1x256xf32>
    %120 = arith.mulf %36, %119 : vector<1x256xf32>
    %121 = arith.addf %117, %120 : vector<1x256xf32>
    %c20 = arith.constant 20 : index
    %122 = memref.load %arg3[%c20] : memref<48xf32, #tpu.memory_space<smem>>
    %123 = vector.broadcast %122 : f32 to vector<1x256xf32>
    %124 = arith.mulf %37, %123 : vector<1x256xf32>
    %125 = arith.addf %121, %124 : vector<1x256xf32>
    %c21 = arith.constant 21 : index
    %126 = memref.load %arg3[%c21] : memref<48xf32, #tpu.memory_space<smem>>
    %127 = vector.broadcast %126 : f32 to vector<1x256xf32>
    %128 = arith.mulf %38, %127 : vector<1x256xf32>
    %129 = arith.addf %125, %128 : vector<1x256xf32>
    %c22 = arith.constant 22 : index
    %130 = memref.load %arg3[%c22] : memref<48xf32, #tpu.memory_space<smem>>
    %131 = vector.broadcast %130 : f32 to vector<1x256xf32>
    %132 = arith.mulf %39, %131 : vector<1x256xf32>
    %133 = arith.addf %129, %132 : vector<1x256xf32>
    %c23 = arith.constant 23 : index
    %134 = memref.load %arg3[%c23] : memref<48xf32, #tpu.memory_space<smem>>
    %135 = vector.broadcast %134 : f32 to vector<1x256xf32>
    %136 = arith.mulf %40, %135 : vector<1x256xf32>
    %137 = arith.addf %133, %136 : vector<1x256xf32>
    %c1_10 = arith.constant 1 : index
    %138 = memref.load %arg5[%c1_10] : memref<4xf32, #tpu.memory_space<smem>>
    %139 = vector.broadcast %138 : f32 to vector<1x256xf32>
    %140 = arith.addf %137, %139 : vector<1x256xf32>
    %c24 = arith.constant 24 : index
    %141 = memref.load %arg3[%c24] : memref<48xf32, #tpu.memory_space<smem>>
    %142 = vector.broadcast %141 : f32 to vector<1x256xf32>
    %143 = arith.mulf %29, %142 : vector<1x256xf32>
    %c25 = arith.constant 25 : index
    %144 = memref.load %arg3[%c25] : memref<48xf32, #tpu.memory_space<smem>>
    %145 = vector.broadcast %144 : f32 to vector<1x256xf32>
    %146 = arith.mulf %30, %145 : vector<1x256xf32>
    %147 = arith.addf %143, %146 : vector<1x256xf32>
    %c26 = arith.constant 26 : index
    %148 = memref.load %arg3[%c26] : memref<48xf32, #tpu.memory_space<smem>>
    %149 = vector.broadcast %148 : f32 to vector<1x256xf32>
    %150 = arith.mulf %31, %149 : vector<1x256xf32>
    %151 = arith.addf %147, %150 : vector<1x256xf32>
    %c27 = arith.constant 27 : index
    %152 = memref.load %arg3[%c27] : memref<48xf32, #tpu.memory_space<smem>>
    %153 = vector.broadcast %152 : f32 to vector<1x256xf32>
    %154 = arith.mulf %32, %153 : vector<1x256xf32>
    %155 = arith.addf %151, %154 : vector<1x256xf32>
    %c28 = arith.constant 28 : index
    %156 = memref.load %arg3[%c28] : memref<48xf32, #tpu.memory_space<smem>>
    %157 = vector.broadcast %156 : f32 to vector<1x256xf32>
    %158 = arith.mulf %33, %157 : vector<1x256xf32>
    %159 = arith.addf %155, %158 : vector<1x256xf32>
    %c29 = arith.constant 29 : index
    %160 = memref.load %arg3[%c29] : memref<48xf32, #tpu.memory_space<smem>>
    %161 = vector.broadcast %160 : f32 to vector<1x256xf32>
    %162 = arith.mulf %34, %161 : vector<1x256xf32>
    %163 = arith.addf %159, %162 : vector<1x256xf32>
    %c30 = arith.constant 30 : index
    %164 = memref.load %arg3[%c30] : memref<48xf32, #tpu.memory_space<smem>>
    %165 = vector.broadcast %164 : f32 to vector<1x256xf32>
    %166 = arith.mulf %35, %165 : vector<1x256xf32>
    %167 = arith.addf %163, %166 : vector<1x256xf32>
    %c31 = arith.constant 31 : index
    %168 = memref.load %arg3[%c31] : memref<48xf32, #tpu.memory_space<smem>>
    %169 = vector.broadcast %168 : f32 to vector<1x256xf32>
    %170 = arith.mulf %36, %169 : vector<1x256xf32>
    %171 = arith.addf %167, %170 : vector<1x256xf32>
    %c32 = arith.constant 32 : index
    %172 = memref.load %arg3[%c32] : memref<48xf32, #tpu.memory_space<smem>>
    %173 = vector.broadcast %172 : f32 to vector<1x256xf32>
    %174 = arith.mulf %37, %173 : vector<1x256xf32>
    %175 = arith.addf %171, %174 : vector<1x256xf32>
    %c33 = arith.constant 33 : index
    %176 = memref.load %arg3[%c33] : memref<48xf32, #tpu.memory_space<smem>>
    %177 = vector.broadcast %176 : f32 to vector<1x256xf32>
    %178 = arith.mulf %38, %177 : vector<1x256xf32>
    %179 = arith.addf %175, %178 : vector<1x256xf32>
    %c34 = arith.constant 34 : index
    %180 = memref.load %arg3[%c34] : memref<48xf32, #tpu.memory_space<smem>>
    %181 = vector.broadcast %180 : f32 to vector<1x256xf32>
    %182 = arith.mulf %39, %181 : vector<1x256xf32>
    %183 = arith.addf %179, %182 : vector<1x256xf32>
    %c35 = arith.constant 35 : index
    %184 = memref.load %arg3[%c35] : memref<48xf32, #tpu.memory_space<smem>>
    %185 = vector.broadcast %184 : f32 to vector<1x256xf32>
    %186 = arith.mulf %40, %185 : vector<1x256xf32>
    %187 = arith.addf %183, %186 : vector<1x256xf32>
    %c2_11 = arith.constant 2 : index
    %188 = memref.load %arg5[%c2_11] : memref<4xf32, #tpu.memory_space<smem>>
    %189 = vector.broadcast %188 : f32 to vector<1x256xf32>
    %190 = arith.addf %187, %189 : vector<1x256xf32>
    %c36 = arith.constant 36 : index
    %191 = memref.load %arg3[%c36] : memref<48xf32, #tpu.memory_space<smem>>
    %192 = vector.broadcast %191 : f32 to vector<1x256xf32>
    %193 = arith.mulf %29, %192 : vector<1x256xf32>
    %c37 = arith.constant 37 : index
    %194 = memref.load %arg3[%c37] : memref<48xf32, #tpu.memory_space<smem>>
    %195 = vector.broadcast %194 : f32 to vector<1x256xf32>
    %196 = arith.mulf %30, %195 : vector<1x256xf32>
    %197 = arith.addf %193, %196 : vector<1x256xf32>
    %c38 = arith.constant 38 : index
    %198 = memref.load %arg3[%c38] : memref<48xf32, #tpu.memory_space<smem>>
    %199 = vector.broadcast %198 : f32 to vector<1x256xf32>
    %200 = arith.mulf %31, %199 : vector<1x256xf32>
    %201 = arith.addf %197, %200 : vector<1x256xf32>
    %c39 = arith.constant 39 : index
    %202 = memref.load %arg3[%c39] : memref<48xf32, #tpu.memory_space<smem>>
    %203 = vector.broadcast %202 : f32 to vector<1x256xf32>
    %204 = arith.mulf %32, %203 : vector<1x256xf32>
    %205 = arith.addf %201, %204 : vector<1x256xf32>
    %c40 = arith.constant 40 : index
    %206 = memref.load %arg3[%c40] : memref<48xf32, #tpu.memory_space<smem>>
    %207 = vector.broadcast %206 : f32 to vector<1x256xf32>
    %208 = arith.mulf %33, %207 : vector<1x256xf32>
    %209 = arith.addf %205, %208 : vector<1x256xf32>
    %c41 = arith.constant 41 : index
    %210 = memref.load %arg3[%c41] : memref<48xf32, #tpu.memory_space<smem>>
    %211 = vector.broadcast %210 : f32 to vector<1x256xf32>
    %212 = arith.mulf %34, %211 : vector<1x256xf32>
    %213 = arith.addf %209, %212 : vector<1x256xf32>
    %c42 = arith.constant 42 : index
    %214 = memref.load %arg3[%c42] : memref<48xf32, #tpu.memory_space<smem>>
    %215 = vector.broadcast %214 : f32 to vector<1x256xf32>
    %216 = arith.mulf %35, %215 : vector<1x256xf32>
    %217 = arith.addf %213, %216 : vector<1x256xf32>
    %c43 = arith.constant 43 : index
    %218 = memref.load %arg3[%c43] : memref<48xf32, #tpu.memory_space<smem>>
    %219 = vector.broadcast %218 : f32 to vector<1x256xf32>
    %220 = arith.mulf %36, %219 : vector<1x256xf32>
    %221 = arith.addf %217, %220 : vector<1x256xf32>
    %c44 = arith.constant 44 : index
    %222 = memref.load %arg3[%c44] : memref<48xf32, #tpu.memory_space<smem>>
    %223 = vector.broadcast %222 : f32 to vector<1x256xf32>
    %224 = arith.mulf %37, %223 : vector<1x256xf32>
    %225 = arith.addf %221, %224 : vector<1x256xf32>
    %c45 = arith.constant 45 : index
    %226 = memref.load %arg3[%c45] : memref<48xf32, #tpu.memory_space<smem>>
    %227 = vector.broadcast %226 : f32 to vector<1x256xf32>
    %228 = arith.mulf %38, %227 : vector<1x256xf32>
    %229 = arith.addf %225, %228 : vector<1x256xf32>
    %c46 = arith.constant 46 : index
    %230 = memref.load %arg3[%c46] : memref<48xf32, #tpu.memory_space<smem>>
    %231 = vector.broadcast %230 : f32 to vector<1x256xf32>
    %232 = arith.mulf %39, %231 : vector<1x256xf32>
    %233 = arith.addf %229, %232 : vector<1x256xf32>
    %c47 = arith.constant 47 : index
    %234 = memref.load %arg3[%c47] : memref<48xf32, #tpu.memory_space<smem>>
    %235 = vector.broadcast %234 : f32 to vector<1x256xf32>
    %236 = arith.mulf %40, %235 : vector<1x256xf32>
    %237 = arith.addf %233, %236 : vector<1x256xf32>
    %c3_12 = arith.constant 3 : index
    %238 = memref.load %arg5[%c3_12] : memref<4xf32, #tpu.memory_space<smem>>
    %239 = vector.broadcast %238 : f32 to vector<1x256xf32>
    %240 = arith.addf %237, %239 : vector<1x256xf32>
    %241 = tpu.concatenate %90, %140, %190, %240 in 0 : vector<1x256xf32>, vector<1x256xf32>, vector<1x256xf32>, vector<1x256xf32> -> vector<4x256xf32>
    %cst_13 = arith.constant 0.000000e+00 : f32
    %242 = vector.broadcast %cst_13 : f32 to vector<4x256xf32>
    %243 = arith.maximumf %241, %242 : vector<4x256xf32>
    %c1_i32_14 = arith.constant 1 : i32
    %244 = tpu.dynamic_rotate %243 by %c1_i32_14 dim 1 : vector<4x256xf32>, i32 -> vector<4x256xf32>
    %cst_15 = arith.constant 0.000000e+00 : f32
    %245 = vector.broadcast %cst_15 : f32 to vector<4x256xf32>
    %246 = arith.select %18, %245, %244 : vector<4x256xi1>, vector<4x256xf32>
    %c255_i32_16 = arith.constant 255 : i32
    %247 = tpu.dynamic_rotate %243 by %c255_i32_16 dim 1 : vector<4x256xf32>, i32 -> vector<4x256xf32>
    %cst_17 = arith.constant 0.000000e+00 : f32
    %248 = vector.broadcast %cst_17 : f32 to vector<4x256xf32>
    %249 = arith.select %20, %248, %247 : vector<4x256xi1>, vector<4x256xf32>
    %250 = vector.extract_strided_slice %246 {offsets = [0, 0], sizes = [1, 256], strides = [1, 1]} : vector<4x256xf32> to vector<1x256xf32>
    %251 = vector.extract_strided_slice %243 {offsets = [0, 0], sizes = [1, 256], strides = [1, 1]} : vector<4x256xf32> to vector<1x256xf32>
    %252 = vector.extract_strided_slice %249 {offsets = [0, 0], sizes = [1, 256], strides = [1, 1]} : vector<4x256xf32> to vector<1x256xf32>
    %253 = vector.extract_strided_slice %246 {offsets = [1, 0], sizes = [1, 256], strides = [1, 1]} : vector<4x256xf32> to vector<1x256xf32>
    %254 = vector.extract_strided_slice %243 {offsets = [1, 0], sizes = [1, 256], strides = [1, 1]} : vector<4x256xf32> to vector<1x256xf32>
    %255 = vector.extract_strided_slice %249 {offsets = [1, 0], sizes = [1, 256], strides = [1, 1]} : vector<4x256xf32> to vector<1x256xf32>
    %256 = vector.extract_strided_slice %246 {offsets = [2, 0], sizes = [1, 256], strides = [1, 1]} : vector<4x256xf32> to vector<1x256xf32>
    %257 = vector.extract_strided_slice %243 {offsets = [2, 0], sizes = [1, 256], strides = [1, 1]} : vector<4x256xf32> to vector<1x256xf32>
    %258 = vector.extract_strided_slice %249 {offsets = [2, 0], sizes = [1, 256], strides = [1, 1]} : vector<4x256xf32> to vector<1x256xf32>
    %259 = vector.extract_strided_slice %246 {offsets = [3, 0], sizes = [1, 256], strides = [1, 1]} : vector<4x256xf32> to vector<1x256xf32>
    %260 = vector.extract_strided_slice %243 {offsets = [3, 0], sizes = [1, 256], strides = [1, 1]} : vector<4x256xf32> to vector<1x256xf32>
    %261 = vector.extract_strided_slice %249 {offsets = [3, 0], sizes = [1, 256], strides = [1, 1]} : vector<4x256xf32> to vector<1x256xf32>
    %c0_18 = arith.constant 0 : index
    %262 = memref.load %arg4[%c0_18] : memref<48xf32, #tpu.memory_space<smem>>
    %263 = vector.broadcast %262 : f32 to vector<1x256xf32>
    %264 = arith.mulf %250, %263 : vector<1x256xf32>
    %c1_19 = arith.constant 1 : index
    %265 = memref.load %arg4[%c1_19] : memref<48xf32, #tpu.memory_space<smem>>
    %266 = vector.broadcast %265 : f32 to vector<1x256xf32>
    %267 = arith.mulf %251, %266 : vector<1x256xf32>
    %268 = arith.addf %264, %267 : vector<1x256xf32>
    %c2_20 = arith.constant 2 : index
    %269 = memref.load %arg4[%c2_20] : memref<48xf32, #tpu.memory_space<smem>>
    %270 = vector.broadcast %269 : f32 to vector<1x256xf32>
    %271 = arith.mulf %252, %270 : vector<1x256xf32>
    %272 = arith.addf %268, %271 : vector<1x256xf32>
    %c3_21 = arith.constant 3 : index
    %273 = memref.load %arg4[%c3_21] : memref<48xf32, #tpu.memory_space<smem>>
    %274 = vector.broadcast %273 : f32 to vector<1x256xf32>
    %275 = arith.mulf %253, %274 : vector<1x256xf32>
    %276 = arith.addf %272, %275 : vector<1x256xf32>
    %c4_22 = arith.constant 4 : index
    %277 = memref.load %arg4[%c4_22] : memref<48xf32, #tpu.memory_space<smem>>
    %278 = vector.broadcast %277 : f32 to vector<1x256xf32>
    %279 = arith.mulf %254, %278 : vector<1x256xf32>
    %280 = arith.addf %276, %279 : vector<1x256xf32>
    %c5_23 = arith.constant 5 : index
    %281 = memref.load %arg4[%c5_23] : memref<48xf32, #tpu.memory_space<smem>>
    %282 = vector.broadcast %281 : f32 to vector<1x256xf32>
    %283 = arith.mulf %255, %282 : vector<1x256xf32>
    %284 = arith.addf %280, %283 : vector<1x256xf32>
    %c6_24 = arith.constant 6 : index
    %285 = memref.load %arg4[%c6_24] : memref<48xf32, #tpu.memory_space<smem>>
    %286 = vector.broadcast %285 : f32 to vector<1x256xf32>
    %287 = arith.mulf %256, %286 : vector<1x256xf32>
    %288 = arith.addf %284, %287 : vector<1x256xf32>
    %c7_25 = arith.constant 7 : index
    %289 = memref.load %arg4[%c7_25] : memref<48xf32, #tpu.memory_space<smem>>
    %290 = vector.broadcast %289 : f32 to vector<1x256xf32>
    %291 = arith.mulf %257, %290 : vector<1x256xf32>
    %292 = arith.addf %288, %291 : vector<1x256xf32>
    %c8_26 = arith.constant 8 : index
    %293 = memref.load %arg4[%c8_26] : memref<48xf32, #tpu.memory_space<smem>>
    %294 = vector.broadcast %293 : f32 to vector<1x256xf32>
    %295 = arith.mulf %258, %294 : vector<1x256xf32>
    %296 = arith.addf %292, %295 : vector<1x256xf32>
    %c9_27 = arith.constant 9 : index
    %297 = memref.load %arg4[%c9_27] : memref<48xf32, #tpu.memory_space<smem>>
    %298 = vector.broadcast %297 : f32 to vector<1x256xf32>
    %299 = arith.mulf %259, %298 : vector<1x256xf32>
    %300 = arith.addf %296, %299 : vector<1x256xf32>
    %c10_28 = arith.constant 10 : index
    %301 = memref.load %arg4[%c10_28] : memref<48xf32, #tpu.memory_space<smem>>
    %302 = vector.broadcast %301 : f32 to vector<1x256xf32>
    %303 = arith.mulf %260, %302 : vector<1x256xf32>
    %304 = arith.addf %300, %303 : vector<1x256xf32>
    %c11_29 = arith.constant 11 : index
    %305 = memref.load %arg4[%c11_29] : memref<48xf32, #tpu.memory_space<smem>>
    %306 = vector.broadcast %305 : f32 to vector<1x256xf32>
    %307 = arith.mulf %261, %306 : vector<1x256xf32>
    %308 = arith.addf %304, %307 : vector<1x256xf32>
    %c0_30 = arith.constant 0 : index
    %309 = memref.load %arg6[%c0_30] : memref<4xf32, #tpu.memory_space<smem>>
    %310 = vector.broadcast %309 : f32 to vector<1x256xf32>
    %311 = arith.addf %308, %310 : vector<1x256xf32>
    %c12_31 = arith.constant 12 : index
    %312 = memref.load %arg4[%c12_31] : memref<48xf32, #tpu.memory_space<smem>>
    %313 = vector.broadcast %312 : f32 to vector<1x256xf32>
    %314 = arith.mulf %250, %313 : vector<1x256xf32>
    %c13_32 = arith.constant 13 : index
    %315 = memref.load %arg4[%c13_32] : memref<48xf32, #tpu.memory_space<smem>>
    %316 = vector.broadcast %315 : f32 to vector<1x256xf32>
    %317 = arith.mulf %251, %316 : vector<1x256xf32>
    %318 = arith.addf %314, %317 : vector<1x256xf32>
    %c14_33 = arith.constant 14 : index
    %319 = memref.load %arg4[%c14_33] : memref<48xf32, #tpu.memory_space<smem>>
    %320 = vector.broadcast %319 : f32 to vector<1x256xf32>
    %321 = arith.mulf %252, %320 : vector<1x256xf32>
    %322 = arith.addf %318, %321 : vector<1x256xf32>
    %c15_34 = arith.constant 15 : index
    %323 = memref.load %arg4[%c15_34] : memref<48xf32, #tpu.memory_space<smem>>
    %324 = vector.broadcast %323 : f32 to vector<1x256xf32>
    %325 = arith.mulf %253, %324 : vector<1x256xf32>
    %326 = arith.addf %322, %325 : vector<1x256xf32>
    %c16_35 = arith.constant 16 : index
    %327 = memref.load %arg4[%c16_35] : memref<48xf32, #tpu.memory_space<smem>>
    %328 = vector.broadcast %327 : f32 to vector<1x256xf32>
    %329 = arith.mulf %254, %328 : vector<1x256xf32>
    %330 = arith.addf %326, %329 : vector<1x256xf32>
    %c17_36 = arith.constant 17 : index
    %331 = memref.load %arg4[%c17_36] : memref<48xf32, #tpu.memory_space<smem>>
    %332 = vector.broadcast %331 : f32 to vector<1x256xf32>
    %333 = arith.mulf %255, %332 : vector<1x256xf32>
    %334 = arith.addf %330, %333 : vector<1x256xf32>
    %c18_37 = arith.constant 18 : index
    %335 = memref.load %arg4[%c18_37] : memref<48xf32, #tpu.memory_space<smem>>
    %336 = vector.broadcast %335 : f32 to vector<1x256xf32>
    %337 = arith.mulf %256, %336 : vector<1x256xf32>
    %338 = arith.addf %334, %337 : vector<1x256xf32>
    %c19_38 = arith.constant 19 : index
    %339 = memref.load %arg4[%c19_38] : memref<48xf32, #tpu.memory_space<smem>>
    %340 = vector.broadcast %339 : f32 to vector<1x256xf32>
    %341 = arith.mulf %257, %340 : vector<1x256xf32>
    %342 = arith.addf %338, %341 : vector<1x256xf32>
    %c20_39 = arith.constant 20 : index
    %343 = memref.load %arg4[%c20_39] : memref<48xf32, #tpu.memory_space<smem>>
    %344 = vector.broadcast %343 : f32 to vector<1x256xf32>
    %345 = arith.mulf %258, %344 : vector<1x256xf32>
    %346 = arith.addf %342, %345 : vector<1x256xf32>
    %c21_40 = arith.constant 21 : index
    %347 = memref.load %arg4[%c21_40] : memref<48xf32, #tpu.memory_space<smem>>
    %348 = vector.broadcast %347 : f32 to vector<1x256xf32>
    %349 = arith.mulf %259, %348 : vector<1x256xf32>
    %350 = arith.addf %346, %349 : vector<1x256xf32>
    %c22_41 = arith.constant 22 : index
    %351 = memref.load %arg4[%c22_41] : memref<48xf32, #tpu.memory_space<smem>>
    %352 = vector.broadcast %351 : f32 to vector<1x256xf32>
    %353 = arith.mulf %260, %352 : vector<1x256xf32>
    %354 = arith.addf %350, %353 : vector<1x256xf32>
    %c23_42 = arith.constant 23 : index
    %355 = memref.load %arg4[%c23_42] : memref<48xf32, #tpu.memory_space<smem>>
    %356 = vector.broadcast %355 : f32 to vector<1x256xf32>
    %357 = arith.mulf %261, %356 : vector<1x256xf32>
    %358 = arith.addf %354, %357 : vector<1x256xf32>
    %c1_43 = arith.constant 1 : index
    %359 = memref.load %arg6[%c1_43] : memref<4xf32, #tpu.memory_space<smem>>
    %360 = vector.broadcast %359 : f32 to vector<1x256xf32>
    %361 = arith.addf %358, %360 : vector<1x256xf32>
    %c24_44 = arith.constant 24 : index
    %362 = memref.load %arg4[%c24_44] : memref<48xf32, #tpu.memory_space<smem>>
    %363 = vector.broadcast %362 : f32 to vector<1x256xf32>
    %364 = arith.mulf %250, %363 : vector<1x256xf32>
    %c25_45 = arith.constant 25 : index
    %365 = memref.load %arg4[%c25_45] : memref<48xf32, #tpu.memory_space<smem>>
    %366 = vector.broadcast %365 : f32 to vector<1x256xf32>
    %367 = arith.mulf %251, %366 : vector<1x256xf32>
    %368 = arith.addf %364, %367 : vector<1x256xf32>
    %c26_46 = arith.constant 26 : index
    %369 = memref.load %arg4[%c26_46] : memref<48xf32, #tpu.memory_space<smem>>
    %370 = vector.broadcast %369 : f32 to vector<1x256xf32>
    %371 = arith.mulf %252, %370 : vector<1x256xf32>
    %372 = arith.addf %368, %371 : vector<1x256xf32>
    %c27_47 = arith.constant 27 : index
    %373 = memref.load %arg4[%c27_47] : memref<48xf32, #tpu.memory_space<smem>>
    %374 = vector.broadcast %373 : f32 to vector<1x256xf32>
    %375 = arith.mulf %253, %374 : vector<1x256xf32>
    %376 = arith.addf %372, %375 : vector<1x256xf32>
    %c28_48 = arith.constant 28 : index
    %377 = memref.load %arg4[%c28_48] : memref<48xf32, #tpu.memory_space<smem>>
    %378 = vector.broadcast %377 : f32 to vector<1x256xf32>
    %379 = arith.mulf %254, %378 : vector<1x256xf32>
    %380 = arith.addf %376, %379 : vector<1x256xf32>
    %c29_49 = arith.constant 29 : index
    %381 = memref.load %arg4[%c29_49] : memref<48xf32, #tpu.memory_space<smem>>
    %382 = vector.broadcast %381 : f32 to vector<1x256xf32>
    %383 = arith.mulf %255, %382 : vector<1x256xf32>
    %384 = arith.addf %380, %383 : vector<1x256xf32>
    %c30_50 = arith.constant 30 : index
    %385 = memref.load %arg4[%c30_50] : memref<48xf32, #tpu.memory_space<smem>>
    %386 = vector.broadcast %385 : f32 to vector<1x256xf32>
    %387 = arith.mulf %256, %386 : vector<1x256xf32>
    %388 = arith.addf %384, %387 : vector<1x256xf32>
    %c31_51 = arith.constant 31 : index
    %389 = memref.load %arg4[%c31_51] : memref<48xf32, #tpu.memory_space<smem>>
    %390 = vector.broadcast %389 : f32 to vector<1x256xf32>
    %391 = arith.mulf %257, %390 : vector<1x256xf32>
    %392 = arith.addf %388, %391 : vector<1x256xf32>
    %c32_52 = arith.constant 32 : index
    %393 = memref.load %arg4[%c32_52] : memref<48xf32, #tpu.memory_space<smem>>
    %394 = vector.broadcast %393 : f32 to vector<1x256xf32>
    %395 = arith.mulf %258, %394 : vector<1x256xf32>
    %396 = arith.addf %392, %395 : vector<1x256xf32>
    %c33_53 = arith.constant 33 : index
    %397 = memref.load %arg4[%c33_53] : memref<48xf32, #tpu.memory_space<smem>>
    %398 = vector.broadcast %397 : f32 to vector<1x256xf32>
    %399 = arith.mulf %259, %398 : vector<1x256xf32>
    %400 = arith.addf %396, %399 : vector<1x256xf32>
    %c34_54 = arith.constant 34 : index
    %401 = memref.load %arg4[%c34_54] : memref<48xf32, #tpu.memory_space<smem>>
    %402 = vector.broadcast %401 : f32 to vector<1x256xf32>
    %403 = arith.mulf %260, %402 : vector<1x256xf32>
    %404 = arith.addf %400, %403 : vector<1x256xf32>
    %c35_55 = arith.constant 35 : index
    %405 = memref.load %arg4[%c35_55] : memref<48xf32, #tpu.memory_space<smem>>
    %406 = vector.broadcast %405 : f32 to vector<1x256xf32>
    %407 = arith.mulf %261, %406 : vector<1x256xf32>
    %408 = arith.addf %404, %407 : vector<1x256xf32>
    %c2_56 = arith.constant 2 : index
    %409 = memref.load %arg6[%c2_56] : memref<4xf32, #tpu.memory_space<smem>>
    %410 = vector.broadcast %409 : f32 to vector<1x256xf32>
    %411 = arith.addf %408, %410 : vector<1x256xf32>
    %c36_57 = arith.constant 36 : index
    %412 = memref.load %arg4[%c36_57] : memref<48xf32, #tpu.memory_space<smem>>
    %413 = vector.broadcast %412 : f32 to vector<1x256xf32>
    %414 = arith.mulf %250, %413 : vector<1x256xf32>
    %c37_58 = arith.constant 37 : index
    %415 = memref.load %arg4[%c37_58] : memref<48xf32, #tpu.memory_space<smem>>
    %416 = vector.broadcast %415 : f32 to vector<1x256xf32>
    %417 = arith.mulf %251, %416 : vector<1x256xf32>
    %418 = arith.addf %414, %417 : vector<1x256xf32>
    %c38_59 = arith.constant 38 : index
    %419 = memref.load %arg4[%c38_59] : memref<48xf32, #tpu.memory_space<smem>>
    %420 = vector.broadcast %419 : f32 to vector<1x256xf32>
    %421 = arith.mulf %252, %420 : vector<1x256xf32>
    %422 = arith.addf %418, %421 : vector<1x256xf32>
    %c39_60 = arith.constant 39 : index
    %423 = memref.load %arg4[%c39_60] : memref<48xf32, #tpu.memory_space<smem>>
    %424 = vector.broadcast %423 : f32 to vector<1x256xf32>
    %425 = arith.mulf %253, %424 : vector<1x256xf32>
    %426 = arith.addf %422, %425 : vector<1x256xf32>
    %c40_61 = arith.constant 40 : index
    %427 = memref.load %arg4[%c40_61] : memref<48xf32, #tpu.memory_space<smem>>
    %428 = vector.broadcast %427 : f32 to vector<1x256xf32>
    %429 = arith.mulf %254, %428 : vector<1x256xf32>
    %430 = arith.addf %426, %429 : vector<1x256xf32>
    %c41_62 = arith.constant 41 : index
    %431 = memref.load %arg4[%c41_62] : memref<48xf32, #tpu.memory_space<smem>>
    %432 = vector.broadcast %431 : f32 to vector<1x256xf32>
    %433 = arith.mulf %255, %432 : vector<1x256xf32>
    %434 = arith.addf %430, %433 : vector<1x256xf32>
    %c42_63 = arith.constant 42 : index
    %435 = memref.load %arg4[%c42_63] : memref<48xf32, #tpu.memory_space<smem>>
    %436 = vector.broadcast %435 : f32 to vector<1x256xf32>
    %437 = arith.mulf %256, %436 : vector<1x256xf32>
    %438 = arith.addf %434, %437 : vector<1x256xf32>
    %c43_64 = arith.constant 43 : index
    %439 = memref.load %arg4[%c43_64] : memref<48xf32, #tpu.memory_space<smem>>
    %440 = vector.broadcast %439 : f32 to vector<1x256xf32>
    %441 = arith.mulf %257, %440 : vector<1x256xf32>
    %442 = arith.addf %438, %441 : vector<1x256xf32>
    %c44_65 = arith.constant 44 : index
    %443 = memref.load %arg4[%c44_65] : memref<48xf32, #tpu.memory_space<smem>>
    %444 = vector.broadcast %443 : f32 to vector<1x256xf32>
    %445 = arith.mulf %258, %444 : vector<1x256xf32>
    %446 = arith.addf %442, %445 : vector<1x256xf32>
    %c45_66 = arith.constant 45 : index
    %447 = memref.load %arg4[%c45_66] : memref<48xf32, #tpu.memory_space<smem>>
    %448 = vector.broadcast %447 : f32 to vector<1x256xf32>
    %449 = arith.mulf %259, %448 : vector<1x256xf32>
    %450 = arith.addf %446, %449 : vector<1x256xf32>
    %c46_67 = arith.constant 46 : index
    %451 = memref.load %arg4[%c46_67] : memref<48xf32, #tpu.memory_space<smem>>
    %452 = vector.broadcast %451 : f32 to vector<1x256xf32>
    %453 = arith.mulf %260, %452 : vector<1x256xf32>
    %454 = arith.addf %450, %453 : vector<1x256xf32>
    %c47_68 = arith.constant 47 : index
    %455 = memref.load %arg4[%c47_68] : memref<48xf32, #tpu.memory_space<smem>>
    %456 = vector.broadcast %455 : f32 to vector<1x256xf32>
    %457 = arith.mulf %261, %456 : vector<1x256xf32>
    %458 = arith.addf %454, %457 : vector<1x256xf32>
    %c3_69 = arith.constant 3 : index
    %459 = memref.load %arg6[%c3_69] : memref<4xf32, #tpu.memory_space<smem>>
    %460 = vector.broadcast %459 : f32 to vector<1x256xf32>
    %461 = arith.addf %458, %460 : vector<1x256xf32>
    %462 = tpu.concatenate %311, %361, %411, %461 in 0 : vector<1x256xf32>, vector<1x256xf32>, vector<1x256xf32>, vector<1x256xf32> -> vector<4x256xf32>
    %463 = arith.addf %462, %22 : vector<4x256xf32>
    %cst_70 = arith.constant 0.000000e+00 : f32
    %464 = vector.broadcast %cst_70 : f32 to vector<4x256xf32>
    %465 = arith.maximumf %463, %464 : vector<4x256xf32>
    %c0_71 = arith.constant 0 : index
    %c0_72 = arith.constant 0 : index
    %c0_73 = arith.constant 0 : index
    %466 = vector.load %arg7[%c0_71, %c0_72, %c0_73] : memref<2x4x256xf32, #tpu.memory_space<vmem>>, vector<1x4x256xf32>
    %467 = vector.shape_cast %466 : vector<1x4x256xf32> to vector<4x256xf32>
    %468 = vector.shape_cast %465 : vector<4x256xf32> to vector<1x4x256xf32>
    tpu.vector_store %arg7[%c0_71, %c0_72, %c0_73], %468 {strides = array<i32>} : memref<2x4x256xf32, #tpu.memory_space<vmem>>, vector<1x4x256xf32>,
    %c1_74 = arith.constant 1 : index
    %c0_75 = arith.constant 0 : index
    %c0_76 = arith.constant 0 : index
    %469 = vector.load %arg2[%c1_74, %c0_75, %c0_76] : memref<2x4x256xf32, #tpu.memory_space<vmem>>, vector<1x4x256xf32>
    %470 = vector.shape_cast %469 : vector<1x4x256xf32> to vector<4x256xf32>
    %c1_i32_77 = arith.constant 1 : i32
    %471 = tpu.dynamic_rotate %470 by %c1_i32_77 dim 1 : vector<4x256xf32>, i32 -> vector<4x256xf32>
    %cst_78 = arith.constant 0.000000e+00 : f32
    %472 = vector.broadcast %cst_78 : f32 to vector<4x256xf32>
    %473 = arith.select %18, %472, %471 : vector<4x256xi1>, vector<4x256xf32>
    %c255_i32_79 = arith.constant 255 : i32
    %474 = tpu.dynamic_rotate %470 by %c255_i32_79 dim 1 : vector<4x256xf32>, i32 -> vector<4x256xf32>
    %cst_80 = arith.constant 0.000000e+00 : f32
    %475 = vector.broadcast %cst_80 : f32 to vector<4x256xf32>
    %476 = arith.select %20, %475, %474 : vector<4x256xi1>, vector<4x256xf32>
    %477 = vector.extract_strided_slice %473 {offsets = [0, 0], sizes = [1, 256], strides = [1, 1]} : vector<4x256xf32> to vector<1x256xf32>
    %478 = vector.extract_strided_slice %470 {offsets = [0, 0], sizes = [1, 256], strides = [1, 1]} : vector<4x256xf32> to vector<1x256xf32>
    %479 = vector.extract_strided_slice %476 {offsets = [0, 0], sizes = [1, 256], strides = [1, 1]} : vector<4x256xf32> to vector<1x256xf32>
    %480 = vector.extract_strided_slice %473 {offsets = [1, 0], sizes = [1, 256], strides = [1, 1]} : vector<4x256xf32> to vector<1x256xf32>
    %481 = vector.extract_strided_slice %470 {offsets = [1, 0], sizes = [1, 256], strides = [1, 1]} : vector<4x256xf32> to vector<1x256xf32>
    %482 = vector.extract_strided_slice %476 {offsets = [1, 0], sizes = [1, 256], strides = [1, 1]} : vector<4x256xf32> to vector<1x256xf32>
    %483 = vector.extract_strided_slice %473 {offsets = [2, 0], sizes = [1, 256], strides = [1, 1]} : vector<4x256xf32> to vector<1x256xf32>
    %484 = vector.extract_strided_slice %470 {offsets = [2, 0], sizes = [1, 256], strides = [1, 1]} : vector<4x256xf32> to vector<1x256xf32>
    %485 = vector.extract_strided_slice %476 {offsets = [2, 0], sizes = [1, 256], strides = [1, 1]} : vector<4x256xf32> to vector<1x256xf32>
    %486 = vector.extract_strided_slice %473 {offsets = [3, 0], sizes = [1, 256], strides = [1, 1]} : vector<4x256xf32> to vector<1x256xf32>
    %487 = vector.extract_strided_slice %470 {offsets = [3, 0], sizes = [1, 256], strides = [1, 1]} : vector<4x256xf32> to vector<1x256xf32>
    %488 = vector.extract_strided_slice %476 {offsets = [3, 0], sizes = [1, 256], strides = [1, 1]} : vector<4x256xf32> to vector<1x256xf32>
    %c0_81 = arith.constant 0 : index
    %489 = memref.load %arg3[%c0_81] : memref<48xf32, #tpu.memory_space<smem>>
    %490 = vector.broadcast %489 : f32 to vector<1x256xf32>
    %491 = arith.mulf %477, %490 : vector<1x256xf32>
    %c1_82 = arith.constant 1 : index
    %492 = memref.load %arg3[%c1_82] : memref<48xf32, #tpu.memory_space<smem>>
    %493 = vector.broadcast %492 : f32 to vector<1x256xf32>
    %494 = arith.mulf %478, %493 : vector<1x256xf32>
    %495 = arith.addf %491, %494 : vector<1x256xf32>
    %c2_83 = arith.constant 2 : index
    %496 = memref.load %arg3[%c2_83] : memref<48xf32, #tpu.memory_space<smem>>
    %497 = vector.broadcast %496 : f32 to vector<1x256xf32>
    %498 = arith.mulf %479, %497 : vector<1x256xf32>
    %499 = arith.addf %495, %498 : vector<1x256xf32>
    %c3_84 = arith.constant 3 : index
    %500 = memref.load %arg3[%c3_84] : memref<48xf32, #tpu.memory_space<smem>>
    %501 = vector.broadcast %500 : f32 to vector<1x256xf32>
    %502 = arith.mulf %480, %501 : vector<1x256xf32>
    %503 = arith.addf %499, %502 : vector<1x256xf32>
    %c4_85 = arith.constant 4 : index
    %504 = memref.load %arg3[%c4_85] : memref<48xf32, #tpu.memory_space<smem>>
    %505 = vector.broadcast %504 : f32 to vector<1x256xf32>
    %506 = arith.mulf %481, %505 : vector<1x256xf32>
    %507 = arith.addf %503, %506 : vector<1x256xf32>
    %c5_86 = arith.constant 5 : index
    %508 = memref.load %arg3[%c5_86] : memref<48xf32, #tpu.memory_space<smem>>
    %509 = vector.broadcast %508 : f32 to vector<1x256xf32>
    %510 = arith.mulf %482, %509 : vector<1x256xf32>
    %511 = arith.addf %507, %510 : vector<1x256xf32>
    %c6_87 = arith.constant 6 : index
    %512 = memref.load %arg3[%c6_87] : memref<48xf32, #tpu.memory_space<smem>>
    %513 = vector.broadcast %512 : f32 to vector<1x256xf32>
    %514 = arith.mulf %483, %513 : vector<1x256xf32>
    %515 = arith.addf %511, %514 : vector<1x256xf32>
    %c7_88 = arith.constant 7 : index
    %516 = memref.load %arg3[%c7_88] : memref<48xf32, #tpu.memory_space<smem>>
    %517 = vector.broadcast %516 : f32 to vector<1x256xf32>
    %518 = arith.mulf %484, %517 : vector<1x256xf32>
    %519 = arith.addf %515, %518 : vector<1x256xf32>
    %c8_89 = arith.constant 8 : index
    %520 = memref.load %arg3[%c8_89] : memref<48xf32, #tpu.memory_space<smem>>
    %521 = vector.broadcast %520 : f32 to vector<1x256xf32>
    %522 = arith.mulf %485, %521 : vector<1x256xf32>
    %523 = arith.addf %519, %522 : vector<1x256xf32>
    %c9_90 = arith.constant 9 : index
    %524 = memref.load %arg3[%c9_90] : memref<48xf32, #tpu.memory_space<smem>>
    %525 = vector.broadcast %524 : f32 to vector<1x256xf32>
    %526 = arith.mulf %486, %525 : vector<1x256xf32>
    %527 = arith.addf %523, %526 : vector<1x256xf32>
    %c10_91 = arith.constant 10 : index
    %528 = memref.load %arg3[%c10_91] : memref<48xf32, #tpu.memory_space<smem>>
    %529 = vector.broadcast %528 : f32 to vector<1x256xf32>
    %530 = arith.mulf %487, %529 : vector<1x256xf32>
    %531 = arith.addf %527, %530 : vector<1x256xf32>
    %c11_92 = arith.constant 11 : index
    %532 = memref.load %arg3[%c11_92] : memref<48xf32, #tpu.memory_space<smem>>
    %533 = vector.broadcast %532 : f32 to vector<1x256xf32>
    %534 = arith.mulf %488, %533 : vector<1x256xf32>
    %535 = arith.addf %531, %534 : vector<1x256xf32>
    %c0_93 = arith.constant 0 : index
    %536 = memref.load %arg5[%c0_93] : memref<4xf32, #tpu.memory_space<smem>>
    %537 = vector.broadcast %536 : f32 to vector<1x256xf32>
    %538 = arith.addf %535, %537 : vector<1x256xf32>
    %c12_94 = arith.constant 12 : index
    %539 = memref.load %arg3[%c12_94] : memref<48xf32, #tpu.memory_space<smem>>
    %540 = vector.broadcast %539 : f32 to vector<1x256xf32>
    %541 = arith.mulf %477, %540 : vector<1x256xf32>
    %c13_95 = arith.constant 13 : index
    %542 = memref.load %arg3[%c13_95] : memref<48xf32, #tpu.memory_space<smem>>
    %543 = vector.broadcast %542 : f32 to vector<1x256xf32>
    %544 = arith.mulf %478, %543 : vector<1x256xf32>
    %545 = arith.addf %541, %544 : vector<1x256xf32>
    %c14_96 = arith.constant 14 : index
    %546 = memref.load %arg3[%c14_96] : memref<48xf32, #tpu.memory_space<smem>>
    %547 = vector.broadcast %546 : f32 to vector<1x256xf32>
    %548 = arith.mulf %479, %547 : vector<1x256xf32>
    %549 = arith.addf %545, %548 : vector<1x256xf32>
    %c15_97 = arith.constant 15 : index
    %550 = memref.load %arg3[%c15_97] : memref<48xf32, #tpu.memory_space<smem>>
    %551 = vector.broadcast %550 : f32 to vector<1x256xf32>
    %552 = arith.mulf %480, %551 : vector<1x256xf32>
    %553 = arith.addf %549, %552 : vector<1x256xf32>
    %c16_98 = arith.constant 16 : index
    %554 = memref.load %arg3[%c16_98] : memref<48xf32, #tpu.memory_space<smem>>
    %555 = vector.broadcast %554 : f32 to vector<1x256xf32>
    %556 = arith.mulf %481, %555 : vector<1x256xf32>
    %557 = arith.addf %553, %556 : vector<1x256xf32>
    %c17_99 = arith.constant 17 : index
    %558 = memref.load %arg3[%c17_99] : memref<48xf32, #tpu.memory_space<smem>>
    %559 = vector.broadcast %558 : f32 to vector<1x256xf32>
    %560 = arith.mulf %482, %559 : vector<1x256xf32>
    %561 = arith.addf %557, %560 : vector<1x256xf32>
    %c18_100 = arith.constant 18 : index
    %562 = memref.load %arg3[%c18_100] : memref<48xf32, #tpu.memory_space<smem>>
    %563 = vector.broadcast %562 : f32 to vector<1x256xf32>
    %564 = arith.mulf %483, %563 : vector<1x256xf32>
    %565 = arith.addf %561, %564 : vector<1x256xf32>
    %c19_101 = arith.constant 19 : index
    %566 = memref.load %arg3[%c19_101] : memref<48xf32, #tpu.memory_space<smem>>
    %567 = vector.broadcast %566 : f32 to vector<1x256xf32>
    %568 = arith.mulf %484, %567 : vector<1x256xf32>
    %569 = arith.addf %565, %568 : vector<1x256xf32>
    %c20_102 = arith.constant 20 : index
    %570 = memref.load %arg3[%c20_102] : memref<48xf32, #tpu.memory_space<smem>>
    %571 = vector.broadcast %570 : f32 to vector<1x256xf32>
    %572 = arith.mulf %485, %571 : vector<1x256xf32>
    %573 = arith.addf %569, %572 : vector<1x256xf32>
    %c21_103 = arith.constant 21 : index
    %574 = memref.load %arg3[%c21_103] : memref<48xf32, #tpu.memory_space<smem>>
    %575 = vector.broadcast %574 : f32 to vector<1x256xf32>
    %576 = arith.mulf %486, %575 : vector<1x256xf32>
    %577 = arith.addf %573, %576 : vector<1x256xf32>
    %c22_104 = arith.constant 22 : index
    %578 = memref.load %arg3[%c22_104] : memref<48xf32, #tpu.memory_space<smem>>
    %579 = vector.broadcast %578 : f32 to vector<1x256xf32>
    %580 = arith.mulf %487, %579 : vector<1x256xf32>
    %581 = arith.addf %577, %580 : vector<1x256xf32>
    %c23_105 = arith.constant 23 : index
    %582 = memref.load %arg3[%c23_105] : memref<48xf32, #tpu.memory_space<smem>>
    %583 = vector.broadcast %582 : f32 to vector<1x256xf32>
    %584 = arith.mulf %488, %583 : vector<1x256xf32>
    %585 = arith.addf %581, %584 : vector<1x256xf32>
    %c1_106 = arith.constant 1 : index
    %586 = memref.load %arg5[%c1_106] : memref<4xf32, #tpu.memory_space<smem>>
    %587 = vector.broadcast %586 : f32 to vector<1x256xf32>
    %588 = arith.addf %585, %587 : vector<1x256xf32>
    %c24_107 = arith.constant 24 : index
    %589 = memref.load %arg3[%c24_107] : memref<48xf32, #tpu.memory_space<smem>>
    %590 = vector.broadcast %589 : f32 to vector<1x256xf32>
    %591 = arith.mulf %477, %590 : vector<1x256xf32>
    %c25_108 = arith.constant 25 : index
    %592 = memref.load %arg3[%c25_108] : memref<48xf32, #tpu.memory_space<smem>>
    %593 = vector.broadcast %592 : f32 to vector<1x256xf32>
    %594 = arith.mulf %478, %593 : vector<1x256xf32>
    %595 = arith.addf %591, %594 : vector<1x256xf32>
    %c26_109 = arith.constant 26 : index
    %596 = memref.load %arg3[%c26_109] : memref<48xf32, #tpu.memory_space<smem>>
    %597 = vector.broadcast %596 : f32 to vector<1x256xf32>
    %598 = arith.mulf %479, %597 : vector<1x256xf32>
    %599 = arith.addf %595, %598 : vector<1x256xf32>
    %c27_110 = arith.constant 27 : index
    %600 = memref.load %arg3[%c27_110] : memref<48xf32, #tpu.memory_space<smem>>
    %601 = vector.broadcast %600 : f32 to vector<1x256xf32>
    %602 = arith.mulf %480, %601 : vector<1x256xf32>
    %603 = arith.addf %599, %602 : vector<1x256xf32>
    %c28_111 = arith.constant 28 : index
    %604 = memref.load %arg3[%c28_111] : memref<48xf32, #tpu.memory_space<smem>>
    %605 = vector.broadcast %604 : f32 to vector<1x256xf32>
    %606 = arith.mulf %481, %605 : vector<1x256xf32>
    %607 = arith.addf %603, %606 : vector<1x256xf32>
    %c29_112 = arith.constant 29 : index
    %608 = memref.load %arg3[%c29_112] : memref<48xf32, #tpu.memory_space<smem>>
    %609 = vector.broadcast %608 : f32 to vector<1x256xf32>
    %610 = arith.mulf %482, %609 : vector<1x256xf32>
    %611 = arith.addf %607, %610 : vector<1x256xf32>
    %c30_113 = arith.constant 30 : index
    %612 = memref.load %arg3[%c30_113] : memref<48xf32, #tpu.memory_space<smem>>
    %613 = vector.broadcast %612 : f32 to vector<1x256xf32>
    %614 = arith.mulf %483, %613 : vector<1x256xf32>
    %615 = arith.addf %611, %614 : vector<1x256xf32>
    %c31_114 = arith.constant 31 : index
    %616 = memref.load %arg3[%c31_114] : memref<48xf32, #tpu.memory_space<smem>>
    %617 = vector.broadcast %616 : f32 to vector<1x256xf32>
    %618 = arith.mulf %484, %617 : vector<1x256xf32>
    %619 = arith.addf %615, %618 : vector<1x256xf32>
    %c32_115 = arith.constant 32 : index
    %620 = memref.load %arg3[%c32_115] : memref<48xf32, #tpu.memory_space<smem>>
    %621 = vector.broadcast %620 : f32 to vector<1x256xf32>
    %622 = arith.mulf %485, %621 : vector<1x256xf32>
    %623 = arith.addf %619, %622 : vector<1x256xf32>
    %c33_116 = arith.constant 33 : index
    %624 = memref.load %arg3[%c33_116] : memref<48xf32, #tpu.memory_space<smem>>
    %625 = vector.broadcast %624 : f32 to vector<1x256xf32>
    %626 = arith.mulf %486, %625 : vector<1x256xf32>
    %627 = arith.addf %623, %626 : vector<1x256xf32>
    %c34_117 = arith.constant 34 : index
    %628 = memref.load %arg3[%c34_117] : memref<48xf32, #tpu.memory_space<smem>>
    %629 = vector.broadcast %628 : f32 to vector<1x256xf32>
    %630 = arith.mulf %487, %629 : vector<1x256xf32>
    %631 = arith.addf %627, %630 : vector<1x256xf32>
    %c35_118 = arith.constant 35 : index
    %632 = memref.load %arg3[%c35_118] : memref<48xf32, #tpu.memory_space<smem>>
    %633 = vector.broadcast %632 : f32 to vector<1x256xf32>
    %634 = arith.mulf %488, %633 : vector<1x256xf32>
    %635 = arith.addf %631, %634 : vector<1x256xf32>
    %c2_119 = arith.constant 2 : index
    %636 = memref.load %arg5[%c2_119] : memref<4xf32, #tpu.memory_space<smem>>
    %637 = vector.broadcast %636 : f32 to vector<1x256xf32>
    %638 = arith.addf %635, %637 : vector<1x256xf32>
    %c36_120 = arith.constant 36 : index
    %639 = memref.load %arg3[%c36_120] : memref<48xf32, #tpu.memory_space<smem>>
    %640 = vector.broadcast %639 : f32 to vector<1x256xf32>
    %641 = arith.mulf %477, %640 : vector<1x256xf32>
    %c37_121 = arith.constant 37 : index
    %642 = memref.load %arg3[%c37_121] : memref<48xf32, #tpu.memory_space<smem>>
    %643 = vector.broadcast %642 : f32 to vector<1x256xf32>
    %644 = arith.mulf %478, %643 : vector<1x256xf32>
    %645 = arith.addf %641, %644 : vector<1x256xf32>
    %c38_122 = arith.constant 38 : index
    %646 = memref.load %arg3[%c38_122] : memref<48xf32, #tpu.memory_space<smem>>
    %647 = vector.broadcast %646 : f32 to vector<1x256xf32>
    %648 = arith.mulf %479, %647 : vector<1x256xf32>
    %649 = arith.addf %645, %648 : vector<1x256xf32>
    %c39_123 = arith.constant 39 : index
    %650 = memref.load %arg3[%c39_123] : memref<48xf32, #tpu.memory_space<smem>>
    %651 = vector.broadcast %650 : f32 to vector<1x256xf32>
    %652 = arith.mulf %480, %651 : vector<1x256xf32>
    %653 = arith.addf %649, %652 : vector<1x256xf32>
    %c40_124 = arith.constant 40 : index
    %654 = memref.load %arg3[%c40_124] : memref<48xf32, #tpu.memory_space<smem>>
    %655 = vector.broadcast %654 : f32 to vector<1x256xf32>
    %656 = arith.mulf %481, %655 : vector<1x256xf32>
    %657 = arith.addf %653, %656 : vector<1x256xf32>
    %c41_125 = arith.constant 41 : index
    %658 = memref.load %arg3[%c41_125] : memref<48xf32, #tpu.memory_space<smem>>
    %659 = vector.broadcast %658 : f32 to vector<1x256xf32>
    %660 = arith.mulf %482, %659 : vector<1x256xf32>
    %661 = arith.addf %657, %660 : vector<1x256xf32>
    %c42_126 = arith.constant 42 : index
    %662 = memref.load %arg3[%c42_126] : memref<48xf32, #tpu.memory_space<smem>>
    %663 = vector.broadcast %662 : f32 to vector<1x256xf32>
    %664 = arith.mulf %483, %663 : vector<1x256xf32>
    %665 = arith.addf %661, %664 : vector<1x256xf32>
    %c43_127 = arith.constant 43 : index
    %666 = memref.load %arg3[%c43_127] : memref<48xf32, #tpu.memory_space<smem>>
    %667 = vector.broadcast %666 : f32 to vector<1x256xf32>
    %668 = arith.mulf %484, %667 : vector<1x256xf32>
    %669 = arith.addf %665, %668 : vector<1x256xf32>
    %c44_128 = arith.constant 44 : index
    %670 = memref.load %arg3[%c44_128] : memref<48xf32, #tpu.memory_space<smem>>
    %671 = vector.broadcast %670 : f32 to vector<1x256xf32>
    %672 = arith.mulf %485, %671 : vector<1x256xf32>
    %673 = arith.addf %669, %672 : vector<1x256xf32>
    %c45_129 = arith.constant 45 : index
    %674 = memref.load %arg3[%c45_129] : memref<48xf32, #tpu.memory_space<smem>>
    %675 = vector.broadcast %674 : f32 to vector<1x256xf32>
    %676 = arith.mulf %486, %675 : vector<1x256xf32>
    %677 = arith.addf %673, %676 : vector<1x256xf32>
    %c46_130 = arith.constant 46 : index
    %678 = memref.load %arg3[%c46_130] : memref<48xf32, #tpu.memory_space<smem>>
    %679 = vector.broadcast %678 : f32 to vector<1x256xf32>
    %680 = arith.mulf %487, %679 : vector<1x256xf32>
    %681 = arith.addf %677, %680 : vector<1x256xf32>
    %c47_131 = arith.constant 47 : index
    %682 = memref.load %arg3[%c47_131] : memref<48xf32, #tpu.memory_space<smem>>
    %683 = vector.broadcast %682 : f32 to vector<1x256xf32>
    %684 = arith.mulf %488, %683 : vector<1x256xf32>
    %685 = arith.addf %681, %684 : vector<1x256xf32>
    %c3_132 = arith.constant 3 : index
    %686 = memref.load %arg5[%c3_132] : memref<4xf32, #tpu.memory_space<smem>>
    %687 = vector.broadcast %686 : f32 to vector<1x256xf32>
    %688 = arith.addf %685, %687 : vector<1x256xf32>
    %689 = tpu.concatenate %538, %588, %638, %688 in 0 : vector<1x256xf32>, vector<1x256xf32>, vector<1x256xf32>, vector<1x256xf32> -> vector<4x256xf32>
    %cst_133 = arith.constant 0.000000e+00 : f32
    %690 = vector.broadcast %cst_133 : f32 to vector<4x256xf32>
    %691 = arith.maximumf %689, %690 : vector<4x256xf32>
    %c1_i32_134 = arith.constant 1 : i32
    %692 = tpu.dynamic_rotate %691 by %c1_i32_134 dim 1 : vector<4x256xf32>, i32 -> vector<4x256xf32>
    %cst_135 = arith.constant 0.000000e+00 : f32
    %693 = vector.broadcast %cst_135 : f32 to vector<4x256xf32>
    %694 = arith.select %18, %693, %692 : vector<4x256xi1>, vector<4x256xf32>
    %c255_i32_136 = arith.constant 255 : i32
    %695 = tpu.dynamic_rotate %691 by %c255_i32_136 dim 1 : vector<4x256xf32>, i32 -> vector<4x256xf32>
    %cst_137 = arith.constant 0.000000e+00 : f32
    %696 = vector.broadcast %cst_137 : f32 to vector<4x256xf32>
    %697 = arith.select %20, %696, %695 : vector<4x256xi1>, vector<4x256xf32>
    %698 = vector.extract_strided_slice %694 {offsets = [0, 0], sizes = [1, 256], strides = [1, 1]} : vector<4x256xf32> to vector<1x256xf32>
    %699 = vector.extract_strided_slice %691 {offsets = [0, 0], sizes = [1, 256], strides = [1, 1]} : vector<4x256xf32> to vector<1x256xf32>
    %700 = vector.extract_strided_slice %697 {offsets = [0, 0], sizes = [1, 256], strides = [1, 1]} : vector<4x256xf32> to vector<1x256xf32>
    %701 = vector.extract_strided_slice %694 {offsets = [1, 0], sizes = [1, 256], strides = [1, 1]} : vector<4x256xf32> to vector<1x256xf32>
    %702 = vector.extract_strided_slice %691 {offsets = [1, 0], sizes = [1, 256], strides = [1, 1]} : vector<4x256xf32> to vector<1x256xf32>
    %703 = vector.extract_strided_slice %697 {offsets = [1, 0], sizes = [1, 256], strides = [1, 1]} : vector<4x256xf32> to vector<1x256xf32>
    %704 = vector.extract_strided_slice %694 {offsets = [2, 0], sizes = [1, 256], strides = [1, 1]} : vector<4x256xf32> to vector<1x256xf32>
    %705 = vector.extract_strided_slice %691 {offsets = [2, 0], sizes = [1, 256], strides = [1, 1]} : vector<4x256xf32> to vector<1x256xf32>
    %706 = vector.extract_strided_slice %697 {offsets = [2, 0], sizes = [1, 256], strides = [1, 1]} : vector<4x256xf32> to vector<1x256xf32>
    %707 = vector.extract_strided_slice %694 {offsets = [3, 0], sizes = [1, 256], strides = [1, 1]} : vector<4x256xf32> to vector<1x256xf32>
    %708 = vector.extract_strided_slice %691 {offsets = [3, 0], sizes = [1, 256], strides = [1, 1]} : vector<4x256xf32> to vector<1x256xf32>
    %709 = vector.extract_strided_slice %697 {offsets = [3, 0], sizes = [1, 256], strides = [1, 1]} : vector<4x256xf32> to vector<1x256xf32>
    %c0_138 = arith.constant 0 : index
    %710 = memref.load %arg4[%c0_138] : memref<48xf32, #tpu.memory_space<smem>>
    %711 = vector.broadcast %710 : f32 to vector<1x256xf32>
    %712 = arith.mulf %698, %711 : vector<1x256xf32>
    %c1_139 = arith.constant 1 : index
    %713 = memref.load %arg4[%c1_139] : memref<48xf32, #tpu.memory_space<smem>>
    %714 = vector.broadcast %713 : f32 to vector<1x256xf32>
    %715 = arith.mulf %699, %714 : vector<1x256xf32>
    %716 = arith.addf %712, %715 : vector<1x256xf32>
    %c2_140 = arith.constant 2 : index
    %717 = memref.load %arg4[%c2_140] : memref<48xf32, #tpu.memory_space<smem>>
    %718 = vector.broadcast %717 : f32 to vector<1x256xf32>
    %719 = arith.mulf %700, %718 : vector<1x256xf32>
    %720 = arith.addf %716, %719 : vector<1x256xf32>
    %c3_141 = arith.constant 3 : index
    %721 = memref.load %arg4[%c3_141] : memref<48xf32, #tpu.memory_space<smem>>
    %722 = vector.broadcast %721 : f32 to vector<1x256xf32>
    %723 = arith.mulf %701, %722 : vector<1x256xf32>
    %724 = arith.addf %720, %723 : vector<1x256xf32>
    %c4_142 = arith.constant 4 : index
    %725 = memref.load %arg4[%c4_142] : memref<48xf32, #tpu.memory_space<smem>>
    %726 = vector.broadcast %725 : f32 to vector<1x256xf32>
    %727 = arith.mulf %702, %726 : vector<1x256xf32>
    %728 = arith.addf %724, %727 : vector<1x256xf32>
    %c5_143 = arith.constant 5 : index
    %729 = memref.load %arg4[%c5_143] : memref<48xf32, #tpu.memory_space<smem>>
    %730 = vector.broadcast %729 : f32 to vector<1x256xf32>
    %731 = arith.mulf %703, %730 : vector<1x256xf32>
    %732 = arith.addf %728, %731 : vector<1x256xf32>
    %c6_144 = arith.constant 6 : index
    %733 = memref.load %arg4[%c6_144] : memref<48xf32, #tpu.memory_space<smem>>
    %734 = vector.broadcast %733 : f32 to vector<1x256xf32>
    %735 = arith.mulf %704, %734 : vector<1x256xf32>
    %736 = arith.addf %732, %735 : vector<1x256xf32>
    %c7_145 = arith.constant 7 : index
    %737 = memref.load %arg4[%c7_145] : memref<48xf32, #tpu.memory_space<smem>>
    %738 = vector.broadcast %737 : f32 to vector<1x256xf32>
    %739 = arith.mulf %705, %738 : vector<1x256xf32>
    %740 = arith.addf %736, %739 : vector<1x256xf32>
    %c8_146 = arith.constant 8 : index
    %741 = memref.load %arg4[%c8_146] : memref<48xf32, #tpu.memory_space<smem>>
    %742 = vector.broadcast %741 : f32 to vector<1x256xf32>
    %743 = arith.mulf %706, %742 : vector<1x256xf32>
    %744 = arith.addf %740, %743 : vector<1x256xf32>
    %c9_147 = arith.constant 9 : index
    %745 = memref.load %arg4[%c9_147] : memref<48xf32, #tpu.memory_space<smem>>
    %746 = vector.broadcast %745 : f32 to vector<1x256xf32>
    %747 = arith.mulf %707, %746 : vector<1x256xf32>
    %748 = arith.addf %744, %747 : vector<1x256xf32>
    %c10_148 = arith.constant 10 : index
    %749 = memref.load %arg4[%c10_148] : memref<48xf32, #tpu.memory_space<smem>>
    %750 = vector.broadcast %749 : f32 to vector<1x256xf32>
    %751 = arith.mulf %708, %750 : vector<1x256xf32>
    %752 = arith.addf %748, %751 : vector<1x256xf32>
    %c11_149 = arith.constant 11 : index
    %753 = memref.load %arg4[%c11_149] : memref<48xf32, #tpu.memory_space<smem>>
    %754 = vector.broadcast %753 : f32 to vector<1x256xf32>
    %755 = arith.mulf %709, %754 : vector<1x256xf32>
    %756 = arith.addf %752, %755 : vector<1x256xf32>
    %c0_150 = arith.constant 0 : index
    %757 = memref.load %arg6[%c0_150] : memref<4xf32, #tpu.memory_space<smem>>
    %758 = vector.broadcast %757 : f32 to vector<1x256xf32>
    %759 = arith.addf %756, %758 : vector<1x256xf32>
    %c12_151 = arith.constant 12 : index
    %760 = memref.load %arg4[%c12_151] : memref<48xf32, #tpu.memory_space<smem>>
    %761 = vector.broadcast %760 : f32 to vector<1x256xf32>
    %762 = arith.mulf %698, %761 : vector<1x256xf32>
    %c13_152 = arith.constant 13 : index
    %763 = memref.load %arg4[%c13_152] : memref<48xf32, #tpu.memory_space<smem>>
    %764 = vector.broadcast %763 : f32 to vector<1x256xf32>
    %765 = arith.mulf %699, %764 : vector<1x256xf32>
    %766 = arith.addf %762, %765 : vector<1x256xf32>
    %c14_153 = arith.constant 14 : index
    %767 = memref.load %arg4[%c14_153] : memref<48xf32, #tpu.memory_space<smem>>
    %768 = vector.broadcast %767 : f32 to vector<1x256xf32>
    %769 = arith.mulf %700, %768 : vector<1x256xf32>
    %770 = arith.addf %766, %769 : vector<1x256xf32>
    %c15_154 = arith.constant 15 : index
    %771 = memref.load %arg4[%c15_154] : memref<48xf32, #tpu.memory_space<smem>>
    %772 = vector.broadcast %771 : f32 to vector<1x256xf32>
    %773 = arith.mulf %701, %772 : vector<1x256xf32>
    %774 = arith.addf %770, %773 : vector<1x256xf32>
    %c16_155 = arith.constant 16 : index
    %775 = memref.load %arg4[%c16_155] : memref<48xf32, #tpu.memory_space<smem>>
    %776 = vector.broadcast %775 : f32 to vector<1x256xf32>
    %777 = arith.mulf %702, %776 : vector<1x256xf32>
    %778 = arith.addf %774, %777 : vector<1x256xf32>
    %c17_156 = arith.constant 17 : index
    %779 = memref.load %arg4[%c17_156] : memref<48xf32, #tpu.memory_space<smem>>
    %780 = vector.broadcast %779 : f32 to vector<1x256xf32>
    %781 = arith.mulf %703, %780 : vector<1x256xf32>
    %782 = arith.addf %778, %781 : vector<1x256xf32>
    %c18_157 = arith.constant 18 : index
    %783 = memref.load %arg4[%c18_157] : memref<48xf32, #tpu.memory_space<smem>>
    %784 = vector.broadcast %783 : f32 to vector<1x256xf32>
    %785 = arith.mulf %704, %784 : vector<1x256xf32>
    %786 = arith.addf %782, %785 : vector<1x256xf32>
    %c19_158 = arith.constant 19 : index
    %787 = memref.load %arg4[%c19_158] : memref<48xf32, #tpu.memory_space<smem>>
    %788 = vector.broadcast %787 : f32 to vector<1x256xf32>
    %789 = arith.mulf %705, %788 : vector<1x256xf32>
    %790 = arith.addf %786, %789 : vector<1x256xf32>
    %c20_159 = arith.constant 20 : index
    %791 = memref.load %arg4[%c20_159] : memref<48xf32, #tpu.memory_space<smem>>
    %792 = vector.broadcast %791 : f32 to vector<1x256xf32>
    %793 = arith.mulf %706, %792 : vector<1x256xf32>
    %794 = arith.addf %790, %793 : vector<1x256xf32>
    %c21_160 = arith.constant 21 : index
    %795 = memref.load %arg4[%c21_160] : memref<48xf32, #tpu.memory_space<smem>>
    %796 = vector.broadcast %795 : f32 to vector<1x256xf32>
    %797 = arith.mulf %707, %796 : vector<1x256xf32>
    %798 = arith.addf %794, %797 : vector<1x256xf32>
    %c22_161 = arith.constant 22 : index
    %799 = memref.load %arg4[%c22_161] : memref<48xf32, #tpu.memory_space<smem>>
    %800 = vector.broadcast %799 : f32 to vector<1x256xf32>
    %801 = arith.mulf %708, %800 : vector<1x256xf32>
    %802 = arith.addf %798, %801 : vector<1x256xf32>
    %c23_162 = arith.constant 23 : index
    %803 = memref.load %arg4[%c23_162] : memref<48xf32, #tpu.memory_space<smem>>
    %804 = vector.broadcast %803 : f32 to vector<1x256xf32>
    %805 = arith.mulf %709, %804 : vector<1x256xf32>
    %806 = arith.addf %802, %805 : vector<1x256xf32>
    %c1_163 = arith.constant 1 : index
    %807 = memref.load %arg6[%c1_163] : memref<4xf32, #tpu.memory_space<smem>>
    %808 = vector.broadcast %807 : f32 to vector<1x256xf32>
    %809 = arith.addf %806, %808 : vector<1x256xf32>
    %c24_164 = arith.constant 24 : index
    %810 = memref.load %arg4[%c24_164] : memref<48xf32, #tpu.memory_space<smem>>
    %811 = vector.broadcast %810 : f32 to vector<1x256xf32>
    %812 = arith.mulf %698, %811 : vector<1x256xf32>
    %c25_165 = arith.constant 25 : index
    %813 = memref.load %arg4[%c25_165] : memref<48xf32, #tpu.memory_space<smem>>
    %814 = vector.broadcast %813 : f32 to vector<1x256xf32>
    %815 = arith.mulf %699, %814 : vector<1x256xf32>
    %816 = arith.addf %812, %815 : vector<1x256xf32>
    %c26_166 = arith.constant 26 : index
    %817 = memref.load %arg4[%c26_166] : memref<48xf32, #tpu.memory_space<smem>>
    %818 = vector.broadcast %817 : f32 to vector<1x256xf32>
    %819 = arith.mulf %700, %818 : vector<1x256xf32>
    %820 = arith.addf %816, %819 : vector<1x256xf32>
    %c27_167 = arith.constant 27 : index
    %821 = memref.load %arg4[%c27_167] : memref<48xf32, #tpu.memory_space<smem>>
    %822 = vector.broadcast %821 : f32 to vector<1x256xf32>
    %823 = arith.mulf %701, %822 : vector<1x256xf32>
    %824 = arith.addf %820, %823 : vector<1x256xf32>
    %c28_168 = arith.constant 28 : index
    %825 = memref.load %arg4[%c28_168] : memref<48xf32, #tpu.memory_space<smem>>
    %826 = vector.broadcast %825 : f32 to vector<1x256xf32>
    %827 = arith.mulf %702, %826 : vector<1x256xf32>
    %828 = arith.addf %824, %827 : vector<1x256xf32>
    %c29_169 = arith.constant 29 : index
    %829 = memref.load %arg4[%c29_169] : memref<48xf32, #tpu.memory_space<smem>>
    %830 = vector.broadcast %829 : f32 to vector<1x256xf32>
    %831 = arith.mulf %703, %830 : vector<1x256xf32>
    %832 = arith.addf %828, %831 : vector<1x256xf32>
    %c30_170 = arith.constant 30 : index
    %833 = memref.load %arg4[%c30_170] : memref<48xf32, #tpu.memory_space<smem>>
    %834 = vector.broadcast %833 : f32 to vector<1x256xf32>
    %835 = arith.mulf %704, %834 : vector<1x256xf32>
    %836 = arith.addf %832, %835 : vector<1x256xf32>
    %c31_171 = arith.constant 31 : index
    %837 = memref.load %arg4[%c31_171] : memref<48xf32, #tpu.memory_space<smem>>
    %838 = vector.broadcast %837 : f32 to vector<1x256xf32>
    %839 = arith.mulf %705, %838 : vector<1x256xf32>
    %840 = arith.addf %836, %839 : vector<1x256xf32>
    %c32_172 = arith.constant 32 : index
    %841 = memref.load %arg4[%c32_172] : memref<48xf32, #tpu.memory_space<smem>>
    %842 = vector.broadcast %841 : f32 to vector<1x256xf32>
    %843 = arith.mulf %706, %842 : vector<1x256xf32>
    %844 = arith.addf %840, %843 : vector<1x256xf32>
    %c33_173 = arith.constant 33 : index
    %845 = memref.load %arg4[%c33_173] : memref<48xf32, #tpu.memory_space<smem>>
    %846 = vector.broadcast %845 : f32 to vector<1x256xf32>
    %847 = arith.mulf %707, %846 : vector<1x256xf32>
    %848 = arith.addf %844, %847 : vector<1x256xf32>
    %c34_174 = arith.constant 34 : index
    %849 = memref.load %arg4[%c34_174] : memref<48xf32, #tpu.memory_space<smem>>
    %850 = vector.broadcast %849 : f32 to vector<1x256xf32>
    %851 = arith.mulf %708, %850 : vector<1x256xf32>
    %852 = arith.addf %848, %851 : vector<1x256xf32>
    %c35_175 = arith.constant 35 : index
    %853 = memref.load %arg4[%c35_175] : memref<48xf32, #tpu.memory_space<smem>>
    %854 = vector.broadcast %853 : f32 to vector<1x256xf32>
    %855 = arith.mulf %709, %854 : vector<1x256xf32>
    %856 = arith.addf %852, %855 : vector<1x256xf32>
    %c2_176 = arith.constant 2 : index
    %857 = memref.load %arg6[%c2_176] : memref<4xf32, #tpu.memory_space<smem>>
    %858 = vector.broadcast %857 : f32 to vector<1x256xf32>
    %859 = arith.addf %856, %858 : vector<1x256xf32>
    %c36_177 = arith.constant 36 : index
    %860 = memref.load %arg4[%c36_177] : memref<48xf32, #tpu.memory_space<smem>>
    %861 = vector.broadcast %860 : f32 to vector<1x256xf32>
    %862 = arith.mulf %698, %861 : vector<1x256xf32>
    %c37_178 = arith.constant 37 : index
    %863 = memref.load %arg4[%c37_178] : memref<48xf32, #tpu.memory_space<smem>>
    %864 = vector.broadcast %863 : f32 to vector<1x256xf32>
    %865 = arith.mulf %699, %864 : vector<1x256xf32>
    %866 = arith.addf %862, %865 : vector<1x256xf32>
    %c38_179 = arith.constant 38 : index
    %867 = memref.load %arg4[%c38_179] : memref<48xf32, #tpu.memory_space<smem>>
    %868 = vector.broadcast %867 : f32 to vector<1x256xf32>
    %869 = arith.mulf %700, %868 : vector<1x256xf32>
    %870 = arith.addf %866, %869 : vector<1x256xf32>
    %c39_180 = arith.constant 39 : index
    %871 = memref.load %arg4[%c39_180] : memref<48xf32, #tpu.memory_space<smem>>
    %872 = vector.broadcast %871 : f32 to vector<1x256xf32>
    %873 = arith.mulf %701, %872 : vector<1x256xf32>
    %874 = arith.addf %870, %873 : vector<1x256xf32>
    %c40_181 = arith.constant 40 : index
    %875 = memref.load %arg4[%c40_181] : memref<48xf32, #tpu.memory_space<smem>>
    %876 = vector.broadcast %875 : f32 to vector<1x256xf32>
    %877 = arith.mulf %702, %876 : vector<1x256xf32>
    %878 = arith.addf %874, %877 : vector<1x256xf32>
    %c41_182 = arith.constant 41 : index
    %879 = memref.load %arg4[%c41_182] : memref<48xf32, #tpu.memory_space<smem>>
    %880 = vector.broadcast %879 : f32 to vector<1x256xf32>
    %881 = arith.mulf %703, %880 : vector<1x256xf32>
    %882 = arith.addf %878, %881 : vector<1x256xf32>
    %c42_183 = arith.constant 42 : index
    %883 = memref.load %arg4[%c42_183] : memref<48xf32, #tpu.memory_space<smem>>
    %884 = vector.broadcast %883 : f32 to vector<1x256xf32>
    %885 = arith.mulf %704, %884 : vector<1x256xf32>
    %886 = arith.addf %882, %885 : vector<1x256xf32>
    %c43_184 = arith.constant 43 : index
    %887 = memref.load %arg4[%c43_184] : memref<48xf32, #tpu.memory_space<smem>>
    %888 = vector.broadcast %887 : f32 to vector<1x256xf32>
    %889 = arith.mulf %705, %888 : vector<1x256xf32>
    %890 = arith.addf %886, %889 : vector<1x256xf32>
    %c44_185 = arith.constant 44 : index
    %891 = memref.load %arg4[%c44_185] : memref<48xf32, #tpu.memory_space<smem>>
    %892 = vector.broadcast %891 : f32 to vector<1x256xf32>
    %893 = arith.mulf %706, %892 : vector<1x256xf32>
    %894 = arith.addf %890, %893 : vector<1x256xf32>
    %c45_186 = arith.constant 45 : index
    %895 = memref.load %arg4[%c45_186] : memref<48xf32, #tpu.memory_space<smem>>
    %896 = vector.broadcast %895 : f32 to vector<1x256xf32>
    %897 = arith.mulf %707, %896 : vector<1x256xf32>
    %898 = arith.addf %894, %897 : vector<1x256xf32>
    %c46_187 = arith.constant 46 : index
    %899 = memref.load %arg4[%c46_187] : memref<48xf32, #tpu.memory_space<smem>>
    %900 = vector.broadcast %899 : f32 to vector<1x256xf32>
    %901 = arith.mulf %708, %900 : vector<1x256xf32>
    %902 = arith.addf %898, %901 : vector<1x256xf32>
    %c47_188 = arith.constant 47 : index
    %903 = memref.load %arg4[%c47_188] : memref<48xf32, #tpu.memory_space<smem>>
    %904 = vector.broadcast %903 : f32 to vector<1x256xf32>
    %905 = arith.mulf %709, %904 : vector<1x256xf32>
    %906 = arith.addf %902, %905 : vector<1x256xf32>
    %c3_189 = arith.constant 3 : index
    %907 = memref.load %arg6[%c3_189] : memref<4xf32, #tpu.memory_space<smem>>
    %908 = vector.broadcast %907 : f32 to vector<1x256xf32>
    %909 = arith.addf %906, %908 : vector<1x256xf32>
    %910 = tpu.concatenate %759, %809, %859, %909 in 0 : vector<1x256xf32>, vector<1x256xf32>, vector<1x256xf32>, vector<1x256xf32> -> vector<4x256xf32>
    %911 = arith.addf %910, %470 : vector<4x256xf32>
    %cst_190 = arith.constant 0.000000e+00 : f32
    %912 = vector.broadcast %cst_190 : f32 to vector<4x256xf32>
    %913 = arith.maximumf %911, %912 : vector<4x256xf32>
    %c1_191 = arith.constant 1 : index
    %c0_192 = arith.constant 0 : index
    %c0_193 = arith.constant 0 : index
    %914 = vector.load %arg7[%c1_191, %c0_192, %c0_193] : memref<2x4x256xf32, #tpu.memory_space<vmem>>, vector<1x4x256xf32>
    %915 = vector.shape_cast %914 : vector<1x4x256xf32> to vector<4x256xf32>
    %916 = vector.shape_cast %913 : vector<4x256xf32> to vector<1x4x256xf32>
    tpu.vector_store %arg7[%c1_191, %c0_192, %c0_193], %916 {strides = array<i32>} : memref<2x4x256xf32, #tpu.memory_space<vmem>>, vector<1x4x256xf32>,
    return
  }
  func.func @transform_0(%arg0: i32, %arg1: i32) -> (i32, i32, i32) {
    %c0_i32 = arith.constant 0 : i32
    %c0_i32_0 = arith.constant 0 : i32
    return %arg0, %c0_i32, %arg1 : i32, i32, i32
  }
  func.func @transform_1(%arg0: i32, %arg1: i32) -> i32 {
    %c0_i32 = arith.constant 0 : i32
    %c0_i32_0 = arith.constant 0 : i32
    return %c0_i32 : i32
  }
  func.func @transform_2(%arg0: i32, %arg1: i32) -> i32 {
    %c0_i32 = arith.constant 0 : i32
    %c0_i32_0 = arith.constant 0 : i32
    return %c0_i32 : i32
  }
  func.func @transform_3(%arg0: i32, %arg1: i32) -> i32 {
    %c0_i32 = arith.constant 0 : i32
    %c0_i32_0 = arith.constant 0 : i32
    return %c0_i32 : i32
  }
  func.func @transform_4(%arg0: i32, %arg1: i32) -> i32 {
    %c0_i32 = arith.constant 0 : i32
    %c0_i32_0 = arith.constant 0 : i32
    return %c0_i32 : i32
  }
  func.func @transform_5(%arg0: i32, %arg1: i32) -> (i32, i32, i32) {
    %c0_i32 = arith.constant 0 : i32
    %c0_i32_0 = arith.constant 0 : i32
    return %arg0, %c0_i32, %arg1 : i32, i32, i32
  }
}

</mosaic_0001>

<bundles_post_ra>
// kernel: tpu_custom_call.1
= control target key start
LH: loop header
LB: loop body
LE: loop exit
PB: predicated region body
PF: predicated region fallthrough
CT: control target
= control target key end

     0   :  { %s5505_s0 = inlined_call_operand.hbm [shape: f32[2,4,256], index: 0, kind: input, shape index: {}]   ;;  %s5506_s1 = inlined_call_operand.vmem [shape: f32[48], index: 1, kind: input, shape index: {}]   ;;  %s5507_s2 = inlined_call_operand.vmem [shape: f32[48], index: 2, kind: input, shape index: {}]   ;;  %s5508_s3 = inlined_call_operand.vmem [shape: f32[4], index: 3, kind: input, shape index: {}]   ;;  %s5509_s4 = inlined_call_operand.vmem [shape: f32[4], index: 4, kind: input, shape index: {}]   ;;  %s5510_s5 = inlined_call_operand.hbm [shape: f32[2,4,256], index: 5, kind: output, shape index: {}]  }
   0x1   :  { %5723 = sst [smem:[#allocation104_spill]] %s5510_s5 }
   0x2   :  { %10 = vsyncpa [#allocation3], 0 }
   0x3   :  { %11 = vsyncpa [#allocation5], 0 }
   0x4   :  { %12 = vsyncpa [#allocation8], 0 }
   0x5   :  { %13 = vsyncpa [#allocation11], 0  ;;  %s43_s20 = sshll.u32 %s5507_s2, 4  ;;  %s44_s20 = int_to_ptr.vmem [resolvable:$true] %s43_s20 }
   0x6   :  { %14 = vsyncpa [#allocation4], 0  ;;  %s2769_s21 = scalar_lea.vmem %s44_s20, 16  ;;  %p2774_p1 = scmp.lt.s32.totalorder %s44_s20, %s44_s20 }
   0x7   :  { %p2770_p0 = scmp.ne.s32.totalorder %s44_s20, %s2769_s21  ;;  %p2775_p2 = scmp.lt.s32.totalorder %s2769_s21, %s2769_s21 }
   0x9   :  { %p2776_p3 = por %p2775_p2, %p2774_p1 }
   0xb   :  { %p2777_p4 = pnand %p2776_p3, %p2770_p0 }
   0xd   :  { %2780 = shalt.err (!%p2777_p4)
}
   0xe   :  { %s2867_s22 = smov [#allocation7]   ;;  %s2868_s23 = smov [#allocation2]  }
   0xf   :  { %46 = dma.vmem_to_smem %s44_s20, 16, %s2867_s22, [#allocation8]  }
  0x10   :  { %s20_s24 = sshll.u32 %s2868_s23, 4  ;;  %s21_s24 = int_to_ptr.vmem [resolvable:$true] %s20_s24 }
  0x11   :  { %s2789_s25 = scalar_lea.vmem %s21_s24, 256  ;;  %p2794_p6 = scmp.lt.s32.totalorder %s21_s24, %s21_s24 }
  0x12   :  { %p2790_p5 = scmp.ne.s32.totalorder %s21_s24, %s2789_s25  ;;  %p2795_p7 = scmp.lt.s32.totalorder %s2789_s25, %s2789_s25 }
  0x14   :  { %p2796_p8 = por %p2795_p7, %p2794_p6 }
  0x16   :  { %p2797_p9 = pnand %p2796_p8, %p2790_p5 }
  0x18   :  { %2800 = shalt.err (!%p2797_p9)
}
  0x19   :  { %s5511_s2 = smov 128   ;;  %s5512_s26 = smov 8  }
  0x1a   :  { %26 = dma.hbm_to_vmem [thread:$0]  %s5505_s0, 256, %s21_s24, [#allocation3], %s5511_s2, %s5511_s2, %s5512_s26  }
  0x1b   :  { %s33_s6 = sshll.u32 %s5506_s1, 4  ;;  %s53_s9 = sshll.u32 %s5508_s3, 4  ;;  %s34_s6 = int_to_ptr.vmem [resolvable:$true] %s33_s6  ;;  %s54_s9 = int_to_ptr.vmem [resolvable:$true] %s53_s9 }
  0x1c   :  { %s2801_s10 = scalar_lea.vmem %s34_s6, 16  ;;  %p2806_p11 = scmp.lt.s32.totalorder %s34_s6, %s34_s6 }
  0x1d   :  { %p2802_p10 = scmp.ne.s32.totalorder %s34_s6, %s2801_s10  ;;  %p2807_p12 = scmp.lt.s32.totalorder %s2801_s10, %s2801_s10 }
  0x1f   :  { %p2808_p13 = por %p2807_p12, %p2806_p11 }
  0x21   :  { %p2809_p0 = pnand %p2808_p13, %p2802_p10 }
  0x23   :  { %2812 = shalt.err (!%p2809_p0)
}
  0x24   :  { %s2871_s11 = smov [#allocation6]   ;;  %s2813_s0 = scalar_lea.vmem %s54_s9, 16 }
  0x25   :  { %36 = dma.vmem_to_smem %s34_s6, 16, %s2871_s11, [#allocation5]  }
  0x26   :  { %p2814_p1 = scmp.ne.s32.totalorder %s54_s9, %s2813_s0  ;;  %p2818_p2 = scmp.lt.s32.totalorder %s54_s9, %s54_s9 }
  0x27   :  { %p2819_p3 = scmp.lt.s32.totalorder %s2813_s0, %s2813_s0 }
  0x29   :  { %p2820_p4 = por %p2819_p3, %p2818_p2 }
  0x2b   :  { %p2821_p5 = pnand %p2820_p4, %p2814_p1 }
  0x2d   :  { %2824 = shalt.err (!%p2821_p5)
}
  0x2e   :  { %s2872_s1 = smov [#allocation9]   ;;  %s63_s13 = sshll.u32 %s5509_s4, 4  ;;  %s64_s13 = int_to_ptr.vmem [resolvable:$true] %s63_s13 }
  0x2f   :  { %56 = dma.vmem_to_smem %s54_s9, 16, %s2872_s1, [#allocation8]  }
  0x30   :  { %s2825_s14 = scalar_lea.vmem %s64_s13, 16  ;;  %p2830_p7 = scmp.lt.s32.totalorder %s64_s13, %s64_s13 }
  0x31   :  { %p2826_p6 = scmp.ne.s32.totalorder %s64_s13, %s2825_s14  ;;  %p2831_p8 = scmp.lt.s32.totalorder %s2825_s14, %s2825_s14 }
  0x33   :  { %p2832_p9 = por %p2831_p8, %p2830_p7 }
  0x35   :  { %p2833_p10 = pnand %p2832_p9, %p2826_p6 }
  0x37   :  { %2836 = shalt.err (!%p2833_p10)
}
  0x38   :  { %s2873_s15 = smov [#allocation10]  }
  0x39   :  { %66 = dma.vmem_to_smem %s64_s13, 16, %s2873_s15, [#allocation11]  }
  0x3a   :  { %2857 = dma.done.wait [#allocation3], 256  }
  0x3b   :  { %2858 = vsyncadd [#allocation3], 4294967040 }
  0x3c   :  { %2859 = dma.done.wait [#allocation5], 16  }
  0x3d   :  { %2860 = vsyncadd [#allocation5], 4294967280 }
  0x3e   :  { %2861 = dma.done.wait [#allocation8], 32  }
  0x3f   :  { %2862 = vsyncadd [#allocation8], 4294967264 }
  0x40   :  { %2863 = dma.done.wait [#allocation11], 16  }
  0x41   :  { %2864 = vsyncadd [#allocation11], 4294967280 }
  0x42   :  { %82 = sfence }
  0x43   :  { %v2925_v0 = vld [vmem:[#allocation2 + $0x8] sm:$0xff]  ;;  %v2927_v1 = vld [vmem:[#allocation2] sm:$0xff]  ;;  %s5515_s4 = smov 1   ;;  %s5513_s16 = smov 127   ;;  %v83_v4 = vlaneseq  ;;  %vm754_vm6 = vcmask 1040384   ;;  %vm757_vm7 = vcmask 1041408  }
  0x44   :  { %1331 = vrot.lane.b32.xlu1 %v2925_v0, %s5515_s4  ;;  %118 = vrot.lane.b32.xlu0 %v2927_v1, %s5515_s4  ;;  %v2935_v2 = vcombine.high %v2925_v0, %v2925_v0  ;;  %v2939_v3 = vcombine.high %v2927_v1, %v2927_v1  ;;  %s2953_s17 = sld [smem:[#allocation6]]  ;;  %vm760_vm8 = vcmask 1042432  }
  0x45   :  { %s2955_s18 = sld [smem:[#allocation6 + $0x1]]  ;;  %v3001_v5 = vand.u32 127, %v83_v4  ;;  %v145_v6 = vshrl.u32 %v83_v4, 7 }
  0x46   :  { %5724 = vst [vmem:[#allocation18_spill] sm:$0xff] %v2935_v2  ;;  %5725 = vst [vmem:[#allocation19_spill] sm:$0xff] %v2939_v3  ;;  %s2957_s19 = sld [smem:[#allocation6 + $0x3]] }
  0x47   :  { %s2959_s20 = sld [smem:[#allocation6 + $0x6]]  ;;  %5726 = vst [vmem:[#allocation20_spill] sm:$0xff] %v3001_v5  ;;  %v3013_v8 = vadd.s32 128, %v3001_v5  ;;  %v3024_v12 = vsub.s32 0, %v145_v6  ;;  %v3026_v13 = vsub.s32 4, %v145_v6  ;;  %v3030_v14 = vsub.s32 1, %v145_v6 }
  0x48   :  { %1333 = vrot.lane.b32.xlu1 %v2935_v2, %s5515_s4  ;;  %120 = vrot.lane.b32.xlu0 %v2939_v3, %s5515_s4  ;;  %s2961_s21 = sld [smem:[#allocation6 + $0x9]]  ;;  %v3032_v15 = vsub.s32 5, %v145_v6  ;;  %v3034_v16 = vsub.s32 2, %v145_v6  ;;  %v3045_v20 = vsub.s32 6, %v145_v6  ;;  %v3047_v21 = vsub.s32 3, %v145_v6 }
  0x49   :  { %s2963_s22 = sld [smem:[#allocation6 + $0xc]]  ;;  %v3058_v25 = vsub.s32 7, %v145_v6  ;;  %vm122_vm0 = vcmp.lt.s32.totalorder %v3001_v5, 1  ;;  %vm131_vm3 = vcmp.lt.s32.totalorder %v3001_v5, 127 }
  0x4a   :  { %s2965_s23 = sld [smem:[#allocation6 + $0xd]]  ;;  %5727 = vst [vmem:[#allocation21_spill] sm:$0xff] %v3034_v16  ;;  %v3042_v18 = vstv %s2953_s17  ;;  %5728 = vst [vmem:[#allocation22_spill] sm:$0xff] %v3045_v20 }
  0x4b   :  { %s2967_s24 = sld [smem:[#allocation6 + $0xf]]  ;;  %v1352_v7 = vstv %s2955_s18  ;;  %5729 = vst [vmem:[#allocation23_spill] sm:$0xff] %v3047_v21  ;;  %5730 = vst [vmem:[#allocation24_spill] sm:$0xff] %v3058_v25 }
  0x4c   :  { %129 = vrot.lane.b32.xlu1 %v2939_v3, %s5513_s16  ;;  %127 = vrot.lane.b32.xlu0 %v2927_v1, %s5513_s16  ;;  %s2969_s25 = sld [smem:[#allocation6 + $0x12]]  ;;  %v3021_v10 = vmul.f32 %v1352_v7, %v2925_v0  ;;  %v3037_v17 = vmul.f32 %v1352_v7, %v2927_v1  ;;  %v3052_v22 = vstv %s2957_s19 }
  0x4d   :  { %s2971_s27 = sld [smem:[#allocation6 + $0x15]]  ;;  %v3063_v26 = vstv %s2959_s20 }
  0x4e   :  { %s2973_s28 = sld [smem:[#allocation6 + $0x18]]  ;;  %v3066_v27 = vstv %s2961_s21 }
  0x4f   :  { %s2975_s29 = sld [smem:[#allocation6 + $0x19]]  ;;  %v3076_v30 = vstv %s2963_s22 }
  0x50   :  { %1341 = vrot.lane.b32.xlu1 %v2935_v2, %s5513_s16  ;;  %1339 = vrot.lane.b32.xlu0 %v2925_v0, %s5513_s16  ;;  %s2977_s30 = sld [smem:[#allocation6 + $0x1b]]  ;;  %v1502_v11 = vstv %s2965_s23 }
  0x51   :  { %s2979_s6 = sld [smem:[#allocation6 + $0x1e]]  ;;  %v3055_v23 = vmul.f32 %v1502_v11, %v2925_v0  ;;  %v3071_v29 = vmul.f32 %v1502_v11, %v2927_v1  ;;  %v3087_v34 = vstv %s2967_s24 }
  0x52   :  { %s2981_s7 = sld [smem:[#allocation6 + $0x21]]  ;;  %v3099_v38 = vstv %s2969_s25 }
  0x53   :  { %s2983_s8 = sld [smem:[#allocation6 + $0x24]]  ;;  %v3102_v39 = vstv %s2971_s27 }
  0x54   :  { %s2985_s9 = sld [smem:[#allocation6 + $0x25]]  ;;  %v3111_v42 = vstv %s2973_s28 }
  0x55   :  { %s2987_s10 = sld [smem:[#allocation6 + $0x27]]  ;;  %v1652_v24 = vstv %s2975_s29 }
  0x56   :  { %s2989_s11 = sld [smem:[#allocation6 + $0x2a]]  ;;  %v3090_v35 = vmul.f32 %v1652_v24, %v2925_v0  ;;  %v3094_v37 = vmul.f32 %v1652_v24, %v2927_v1  ;;  %v3121_v46 = vstv %s2977_s30 }
  0x57   :  { %s2991_s0 = sld [smem:[#allocation6 + $0x2d]]  ;;  %v3124_v47 = vstv %s2979_s6 }
  0x58   :  { %s2993_s1 = sld [smem:[#allocation6 + $0x2]]  ;;  %v3135_v50 = vstv %s2981_s7 }
  0x59   :  { %s2995_s3 = sld [smem:[#allocation6 + $0x4]]  ;;  %v3146_v54 = vstv %s2983_s8 }
  0x5a   :  { %s2997_s12 = sld [smem:[#allocation6 + $0x5]]  ;;  %v1802_v36 = vstv %s2985_s9 }
  0x5b   :  { %s2999_s13 = sld [smem:[#allocation6 + $0x8]]  ;;  %v3127_v48 = vmul.f32 %v1802_v36, %v2925_v0  ;;  %v3130_v49 = vmul.f32 %v1802_v36, %v2927_v1  ;;  %v3159_v58 = vstv %s2987_s10 }
  0x5c   :  { %s3003_s14 = sld [smem:[#allocation6 + $0x7]]  ;;  %v3162_v59 = vstv %s2989_s11 }
  0x5d   :  { %s3005_s15 = sld [smem:[#allocation6 + $0xa]]  ;;  %v3165_v60 = vstv %s2991_s0 }
  0x5e   :  { %s3007_s2 = sld [smem:[#allocation6 + $0xb]]  ;;  %v3182_v11 = vstv %s2993_s1 }
  0x5f   :  { %s3010_s26 = sld [smem:[#allocation9]]  ;;  %v5523_v45 = vstv %s2995_s3 }
  0x60   :  { %s3015_s16 = sld [smem:[#allocation6 + $0xe]]  ;;  %v3153_v56 = vmul.f32 %v5523_v45, %v2927_v1  ;;  %v3193_v4 = vstv %s2997_s12 }
  0x61   :  { %s3018_s4 = sld [smem:[#allocation6 + $0x10]]  ;;  %v3196_v55 = vstv %s2999_s13 }
  0x62   :  { %s3028_s18 = sld [smem:[#allocation6 + $0x11]]  ;;  %5731 = vst [vmem:[#allocation25_spill] sm:$0xff] %v3153_v56  ;;  %v5520_v57 = vstv %s3003_s14  ;;  %5733 = vst [vmem:[#allocation27_spill] sm:$0xff] %v3196_v55 }
  0x63   :  { %s3039_s5 = sld [smem:[#allocation6 + $0x13]]  ;;  %v5518_v6 = vstv %s3005_s15  ;;  %v3187_v24 = vmul.f32 %v5520_v57, %v2927_v1 }
  0x64   :  { %s3049_s23 = sld [smem:[#allocation6 + $0x14]]  ;;  %v3210_v44 = vmul.f32 %v5518_v6, %v2927_v1  ;;  %v3213_v43 = vstv %s3007_s2 }
  0x65   :  { %s3060_s17 = sld [smem:[#allocation6 + $0x16]]  ;;  %5732 = vst [vmem:[#allocation26_spill] sm:$0xff] %v3187_v24  ;;  %5736 = vst [vmem:[#allocation30_spill] sm:$0xff] %v3213_v43  ;;  %v3221_v63 = vstv %s3010_s26 }
  0x66   :  { %s3073_s19 = sld [smem:[#allocation6 + $0x17]]  ;;  %5735 = vst [vmem:[#allocation29_spill] sm:$0xff] %v3210_v44  ;;  %5737 = vst [vmem:[#allocation31_spill] sm:$0xff] %v3221_v63  ;;  %v3224_v62 = vstv %s3015_s16  ;;  %v5752_v44 = vand.u32 15, %v3001_v5 }
  0x67   :  { %s3084_s20 = sld [smem:[#allocation9 + $0x1]]  ;;  %v5521_v61 = vstv %s3018_s4 }
  0x68   :  { %s3096_s21 = sld [smem:[#allocation6 + $0x1a]]  ;;  %v3201_v7 = vmul.f32 %v5521_v61, %v2927_v1  ;;  %v3235_v51 = vstv %s3028_s18  ;;  %vm3313_vm1 = vcmp.eq.s32.totalorder %v5752_v44, 0 }
  0x69   :  { %s3108_s22 = sld [smem:[#allocation6 + $0x1c]]  ;;  %v5517_v36 = vstv %s3039_s5  ;;  %5739 = vst [vmem:[#allocation33_spill] sm:$0xff] %v3235_v51 }
  0x6a   :  { %s3118_s24 = sld [smem:[#allocation6 + $0x1d]]  ;;  %5734 = vst [vmem:[#allocation28_spill] sm:$0xff] %v3201_v7  ;;  %v3229_v53 = vmul.f32 %v5517_v36, %v2927_v1  ;;  %v3238_v32 = vstv %s3049_s23 }
  0x6b   :  { %s3132_s25 = sld [smem:[#allocation6 + $0x1f]]  ;;  %v5522_v52 = vstv %s3060_s17  ;;  %5740 = vst [vmem:[#allocation34_spill] sm:$0xff] %v3238_v32 }
  0x6c   :  { %s3143_s27 = sld [smem:[#allocation6 + $0x20]]  ;;  %5738 = vst [vmem:[#allocation32_spill] sm:$0xff] %v3229_v53  ;;  %v3261_v41 = vmul.f32 %v5522_v52, %v2927_v1  ;;  %v3264_v40 = vstv %s3073_s19  ;;  %v5756_v52 = vand.u32 15, %v3013_v8  ;;  %v5757_v53 = vmov 0 }
  0x6d   :  { %s3156_s28 = sld [smem:[#allocation6 + $0x22]]  ;;  %5743 = vst [vmem:[#allocation37_spill] sm:$0xff] %v3264_v40 }
  0x6e   :  { %s3168_s29 = sld [smem:[#allocation6 + $0x23]]  ;;  %5742 = vst [vmem:[#allocation36_spill] sm:$0xff] %v3261_v41  ;;  %v3273_v61 = vstv %s3096_s21  ;;  %vm3319_vm2 = vcmp.eq.s32.totalorder %v5756_v52, 0  ;;  %v5768_v41 = vstv %s3018_s4  ;;  %s6009_s4 = smov 127  }
  0x6f   :  { %s3177_s30 = sld [smem:[#allocation6 + $0x28]]  ;;  %v5519_v33 = vstv %s3108_s22  ;;  %5745 = vst [vmem:[#allocation39_spill] sm:$0xff] %v3273_v61  ;;  %v5758_v53 = vsel %vm3319_vm2, 4294967295, %v5757_v53  ;;  %v5779_v61 = vstv %s3039_s5  ;;  %s5954_s5 = smov 1  }
  0x70   :  { %s3190_s6 = sld [smem:[#allocation6 + $0x2b]]  ;;  %v3249_v31 = vmul.f32 %v5519_v33, %v2927_v1  ;;  %v3267_v33 = vstv %s3084_s20  ;;  %v3291_v3 = vstv %s3118_s24  ;;  %5759 = vst [vmem:[#allocation47_spill] sm:$0xff] %v5758_v53  ;;  %v3400_v43 = vmul.f32 %v2925_v0, %v5779_v61 }
  0x71   :  { %s3203_s7 = sld [smem:[#allocation9 + $0x2]]  ;;  %v515_v28 = vstv %s3132_s25  ;;  %5744 = vst [vmem:[#allocation38_spill] sm:$0xff] %v3267_v33  ;;  %5747 = vst [vmem:[#allocation41_spill] sm:$0xff] %v3291_v3  ;;  %v5783_v61 = vstv %s3060_s17 }
  0x72   :  { %s3216_s8 = sld [smem:[#allocation6 + $0x2e]]  ;;  %5741 = vst [vmem:[#allocation35_spill] sm:$0xff] %v3249_v31  ;;  %v3283_v45 = vmul.f32 %v515_v28, %v2927_v1  ;;  %v3294_v33 = vstv %s3143_s27  ;;  %5780 = vst [vmem:[#allocation62_spill] sm:$0xff] %v3400_v43  ;;  %v3419_v56 = vmul.f32 %v2925_v0, %v5783_v61 }
  0x73   :  { %s3232_s2 = sld [smem:[#allocation6 + $0x26]]  ;;  %v555_v57 = vstv %s3156_s28  ;;  %5748 = vst [vmem:[#allocation42_spill] sm:$0xff] %v3294_v33  ;;  %v5753_v33 = vmov 0 }
  0x74   :  { %s3240_s26 = sld [smem:[#allocation6 + $0x29]]  ;;  %5746 = vst [vmem:[#allocation40_spill] sm:$0xff] %v3283_v45  ;;  %v3297_v6 = vmul.f32 %v555_v57, %v2927_v1  ;;  %v3303_v63 = vstv %s3168_s29  ;;  %v5754_v33 = vsel %vm3313_vm1, 4294967295, %v5753_v33  ;;  %v3365_v45 = vmul.f32 %v2925_v0, %v5768_v41  ;;  %5784 = vst [vmem:[#allocation65_spill] sm:$0xff] %v3419_v56 }
  0x75   :  { %s3252_s16 = sld [smem:[#allocation6 + $0x2c]]  ;;  %v625_v36 = vstv %s3177_s30  ;;  %5750 = vst [vmem:[#allocation44_spill] sm:$0xff] %v3303_v63  ;;  %5755 = vst [vmem:[#allocation46_spill] sm:$0xff] %v5754_v33  ;;  %v5793_v56 = vrot.slane %v3021_v10, %v3024_v12 }
  0x76   :  { %s3270_s9 = sld [smem:[#allocation6 + $0x2f]]  ;;  %v665_v19 = vstv %s3190_s6  ;;  %5749 = vst [vmem:[#allocation43_spill] sm:$0xff] %v3297_v6  ;;  %v3306_v9 = vmul.f32 %v625_v36, %v2927_v1  ;;  %5769 = vst [vmem:[#allocation55_spill] sm:$0xff] %v3365_v45  ;;  %v5772_v6 = vstv %s3003_s14 }
  0x77   :  { %s3276_s10 = sld [smem:[#allocation9 + $0x3]]  ;;  %v3324_v63 = vstv %s3203_s7  ;;  %v3327_v3 = vmul.f32 %v665_v19, %v2927_v1 }
  0x78   :  { %5751 = vst [vmem:[#allocation45_spill] sm:$0xff] %v3306_v9  ;;  %v705_v2 = vstv %s3216_s8  ;;  %5760 = vst [vmem:[#allocation48_spill] sm:$0xff] %v3324_v63  ;;  %v5774_v9 = vstv %s3005_s15  ;;  %s2605_s11 = sld [smem:[#allocation7 + $0x1]] }
  0x79   :  { %5761 = vst [vmem:[#allocation49_spill] sm:$0xff] %v3327_v3  ;;  %v3334_v31 = vstv %s3232_s2  ;;  %v3344_v32 = vmul.f32 %v705_v2, %v2927_v1  ;;  %v3385_v41 = vmul.f32 %v2925_v0, %v5774_v9  ;;  %v3409_v3 = vmul.f32 %v2925_v0, %v515_v28  ;;  %s2608_s0 = sld [smem:[#allocation7 + $0x4]] }
  0x7a   :  { %5762 = vst [vmem:[#allocation50_spill] sm:$0xff] %v3334_v31  ;;  %v3337_v52 = vstv %s3240_s26  ;;  %v5765_v31 = vstv %s2995_s3  ;;  %s2611_s1 = sld [smem:[#allocation7 + $0x7]] }
  0x7b   :  { %5763 = vst [vmem:[#allocation51_spill] sm:$0xff] %v3337_v52  ;;  %5764 = vst [vmem:[#allocation52_spill] sm:$0xff] %v3344_v32  ;;  %v3353_v52 = vmul.f32 %v2925_v0, %v5765_v31  ;;  %v3356_v24 = vstv %s3252_s16  ;;  %v3393_v31 = vmul.f32 %v2925_v0, %v625_v36  ;;  %v3412_v36 = vmul.f32 %v2925_v0, %v665_v19  ;;  %s2614_s3 = sld [smem:[#allocation7 + $0xa]] }
  0x7c   :  { %5767 = vst [vmem:[#allocation54_spill] sm:$0xff] %v3356_v24  ;;  %v3368_v44 = vstv %s3270_s9  ;;  %v3378_v24 = vmul.f32 %v2925_v0, %v5772_v6  ;;  %5775 = vst [vmem:[#allocation59_spill] sm:$0xff] %v3385_v41  ;;  %v3428_v19 = vmul.f32 %v2925_v0, %v555_v57  ;;  %v3431_v32 = vmul.f32 %v2925_v0, %v705_v2  ;;  %s4336_s12 = sld [smem:[#allocation7 + $0xd]] }
  0x7d   :  { %5766 = vst [vmem:[#allocation53_spill] sm:$0xff] %v3353_v52  ;;  %5770 = vst [vmem:[#allocation56_spill] sm:$0xff] %v3368_v44  ;;  %v3371_v40 = vstv %s3276_s10  ;;  %v5776_v44 = vstv %s3108_s22  ;;  %s2620_s13 = sld [smem:[#allocation7 + $0x10]] }
  0x7e   :  { %5771 = vst [vmem:[#allocation57_spill] sm:$0xff] %v3371_v40  ;;  %5773 = vst [vmem:[#allocation58_spill] sm:$0xff] %v3378_v24  ;;  %v3390_v40 = vmul.f32 %v2925_v0, %v5776_v44  ;;  %s2623_s14 = sld [smem:[#allocation7 + $0x13]] }
  0x7f   :  { %5778 = vst [vmem:[#allocation61_spill] sm:$0xff] %v3393_v31  ;;  %5781 = vst [vmem:[#allocation63_spill] sm:$0xff] %v3409_v3  ;;  %s4338_s15 = sld [smem:[#allocation7 + $0x16]] }
  0x80   :  { %5777 = vst [vmem:[#allocation60_spill] sm:$0xff] %v3390_v40  ;;  %5782 = vst [vmem:[#allocation64_spill] sm:$0xff] %v3412_v36  ;;  %v5795_v40 = vrot.slane %v3021_v10, %v3026_v13  ;;  %s4340_s18 = sld [smem:[#allocation7 + $0x19]] }
  0x81   :  { %5785 = vst [vmem:[#allocation66_spill] sm:$0xff] %v3428_v19  ;;  %5786 = vst [vmem:[#allocation67_spill] sm:$0xff] %v3431_v32  ;;  %s4342_s23 = sld [smem:[#allocation7 + $0x1c]] }
  0x82   :  { %s4344_s17 = sld [smem:[#allocation7 + $0x1f]] }
  0x83   :  { %s4346_s19 = sld [smem:[#allocation7 + $0x22]] }
  0x84   :  { %s4348_s20 = sld [smem:[#allocation7 + $0x25]] }
  0x85   :  { %s4350_s21 = sld [smem:[#allocation7 + $0x28]] }
  0x86   :  { %s4352_s22 = sld [smem:[#allocation7 + $0x2b]] }
  0x87   :  { %s4354_s24 = sld [smem:[#allocation7 + $0x2e]] }
  0x88   :  { %s4356_s25 = sld [smem:[#allocation7]] }
  0x89   :  { %s4358_s27 = sld [smem:[#allocation7 + $0x3]] }
  0x8a   :  { %s4362_s28 = sld [smem:[#allocation7 + $0x6]] }
  0x8b   :  { %s4366_s29 = sld [smem:[#allocation7 + $0x9]] }
  0x8c   :  { %s4376_s30 = sld [smem:[#allocation7 + $0xc]] }
  0x8d   :  { %s4390_s6 = sld [smem:[#allocation7 + $0xf]] }
  0x8e   :  { %s4402_s7 = sld [smem:[#allocation7 + $0x12]] }
  0x8f   :  { %s4410_s8 = sld [smem:[#allocation7 + $0x15]] }
  0x90   :  { %s4416_s2 = sld [smem:[#allocation7 + $0x2]] }
  0x91   :  { %s4431_s26 = sld [smem:[#allocation7 + $0x5]] }
  0x92   :  { %s4435_s16 = sld [smem:[#allocation7 + $0x8]] }
  0x93   :  { %s4449_s9 = sld [smem:[#allocation7 + $0xb]] }
  0x94   :  { %s4466_s10 = sld [smem:[#allocation7 + $0xe]] }
  0xb6   :  { %v1332_v63 = vpop.permute.xlu1 %1331  ;;  %v119_v7 = vpop.permute.xlu0 %118 }
  0xba   :  { %v1334_v44 = vpop.permute.xlu1 %1333  ;;  %v121_v28 = vpop.permute.xlu0 %120 }
  0xbb   :  { %v1335_v1 = vsel %vm122_vm0, %v1332_v63, %v1334_v44  ;;  %v1336_v9 = vsel %vm122_vm0, %v1334_v44, %v1332_v63  ;;  %v124_v61 = vsel %vm122_vm0, %v121_v28, %v119_v7 }
  0xbc   :  { %v3447_v2 = vsel %vm3313_vm1, 0.0, %v1336_v9  ;;  %v3451_v6 = vsel %vm3319_vm2, 0.0, %v1335_v1  ;;  %v123_v1 = vsel %vm122_vm0, %v119_v7, %v121_v28  ;;  %v3511_v43 = vsel %vm3313_vm1, 0.0, %v124_v61 }
  0xbd   :  { %v1349_v0 = vmul.f32 %v3042_v18, %v3447_v2  ;;  %v1350_v9 = vmul.f32 %v3042_v18, %v3451_v6  ;;  %v3479_v57 = vmul.f32 %v3052_v22, %v3447_v2  ;;  %v3483_v41 = vmul.f32 %v3052_v22, %v3451_v6 }
  0xbe   :  { %v3487_v7 = vmul.f32 %v3063_v26, %v3447_v2  ;;  %v3491_v28 = vmul.f32 %v3063_v26, %v3451_v6  ;;  %v3495_v44 = vmul.f32 %v3066_v27, %v3447_v2  ;;  %v3499_v63 = vmul.f32 %v3066_v27, %v3451_v6 }
  0xbf   :  { %5787 = vst [vmem:[#allocation68_spill] sm:$0xff] %v3479_v57  ;;  %5788 = vst [vmem:[#allocation69_spill] sm:$0xff] %v3483_v41  ;;  %v3515_v24 = vsel %vm3319_vm2, 0.0, %v123_v1  ;;  %v3524_v19 = vadd.f32 %v5793_v56, %v1349_v0  ;;  %v3529_v61 = vadd.f32 %v5795_v40, %v1350_v9  ;;  %v1499_v56 = vmul.f32 %v3076_v30, %v3447_v2 }
  0xc0   :  { %5789 = vst [vmem:[#allocation70_spill] sm:$0xff] %v3487_v7  ;;  %5790 = vst [vmem:[#allocation71_spill] sm:$0xff] %v3491_v28  ;;  %v1500_v10 = vmul.f32 %v3076_v30, %v3451_v6  ;;  %v3543_v40 = vmul.f32 %v3087_v34, %v3447_v2  ;;  %v3547_v0 = vmul.f32 %v3087_v34, %v3451_v6 }
  0xc1   :  { %5791 = vst [vmem:[#allocation72_spill] sm:$0xff] %v3495_v44  ;;  %5792 = vst [vmem:[#allocation73_spill] sm:$0xff] %v3499_v63  ;;  %v3551_v9 = vmul.f32 %v3099_v38, %v3447_v2  ;;  %v3555_v32 = vmul.f32 %v3099_v38, %v3451_v6  ;;  %v3559_v3 = vmul.f32 %v3102_v39, %v3447_v2 }
  0xc2   :  { %5794 = vst [vmem:[#allocation74_spill] sm:$0xff] %v3524_v19  ;;  %5796 = vst [vmem:[#allocation75_spill] sm:$0xff] %v3529_v61  ;;  %v3563_v31 = vmul.f32 %v3102_v39, %v3451_v6  ;;  %v1649_v33 = vmul.f32 %v3111_v42, %v3447_v2  ;;  %v1650_v1 = vmul.f32 %v3111_v42, %v3451_v6 }
  0xc3   :  { %5797 = vst [vmem:[#allocation76_spill] sm:$0xff] %v3543_v40  ;;  %5798 = vst [vmem:[#allocation77_spill] sm:$0xff] %v3547_v0  ;;  %v3571_v53 = vmul.f32 %v3121_v46, %v3447_v2  ;;  %v3575_v36 = vmul.f32 %v3121_v46, %v3451_v6  ;;  %v3579_v63 = vmul.f32 %v3124_v47, %v3447_v2 }
  0xc4   :  { %5799 = vst [vmem:[#allocation78_spill] sm:$0xff] %v3551_v9  ;;  %5800 = vst [vmem:[#allocation79_spill] sm:$0xff] %v3555_v32  ;;  %v3583_v44 = vmul.f32 %v3124_v47, %v3451_v6  ;;  %v3587_v45 = vmul.f32 %v3135_v50, %v3447_v2  ;;  %v3591_v28 = vmul.f32 %v3135_v50, %v3451_v6 }
  0xc5   :  { %5801 = vst [vmem:[#allocation80_spill] sm:$0xff] %v3559_v3  ;;  %5802 = vst [vmem:[#allocation81_spill] sm:$0xff] %v3563_v31  ;;  %v5809_v7 = vrot.slane %v3055_v23, %v3024_v12  ;;  %v5811_v41 = vrot.slane %v3055_v23, %v3026_v13  ;;  %v5815_v23 = vrot.slane %v3090_v35, %v3026_v13 }
  0xc6   :  { %5803 = vst [vmem:[#allocation82_spill] sm:$0xff] %v3571_v53  ;;  %5804 = vst [vmem:[#allocation83_spill] sm:$0xff] %v3575_v36  ;;  %v3639_v16 = vmul.f32 %v3159_v58, %v3451_v6  ;;  %v3643_v19 = vmul.f32 %v3052_v22, %v3511_v43  ;;  %v3647_v20 = vmul.f32 %v3052_v22, %v3515_v24  ;;  %v130_v53 = vpop.permute.xlu1 %129 }
  0xc7   :  { %5805 = vst [vmem:[#allocation84_spill] sm:$0xff] %v3579_v63  ;;  %5806 = vst [vmem:[#allocation85_spill] sm:$0xff] %v3583_v44  ;;  %v3596_v52 = vadd.f32 %v5809_v7, %v1499_v56  ;;  %v3601_v57 = vadd.f32 %v5811_v41, %v1500_v10  ;;  %v5813_v7 = vrot.slane %v3090_v35, %v3024_v12 }
  0xc8   :  { %5807 = vst [vmem:[#allocation86_spill] sm:$0xff] %v3587_v45  ;;  %5808 = vst [vmem:[#allocation87_spill] sm:$0xff] %v3591_v28  ;;  %v3617_v41 = vadd.f32 %v5815_v23, %v1650_v1  ;;  %v1800_v35 = vmul.f32 %v3146_v54, %v3451_v6  ;;  %v138_v1 = vmul.f32 %v3042_v18, %v3511_v43 }
  0xc9   :  { %5810 = vst [vmem:[#allocation88_spill] sm:$0xff] %v3596_v52  ;;  %5812 = vst [vmem:[#allocation89_spill] sm:$0xff] %v3601_v57  ;;  %v3612_v56 = vadd.f32 %v5813_v7, %v1649_v33  ;;  %v1799_v33 = vmul.f32 %v3146_v54, %v3447_v2  ;;  %v139_v7 = vmul.f32 %v3042_v18, %v3515_v24 }
  0xca   :  { %5816 = vst [vmem:[#allocation91_spill] sm:$0xff] %v3617_v41  ;;  %v3635_v23 = vmul.f32 %v3159_v58, %v3447_v2  ;;  %v3651_v21 = vmul.f32 %v3162_v59, %v3447_v2  ;;  %v3655_v18 = vmul.f32 %v3162_v59, %v3451_v6  ;;  %v3659_v25 = vmul.f32 %v3063_v26, %v3511_v43  ;;  %v128_v41 = vpop.permute.xlu0 %127 }
  0xcb   :  { %5814 = vst [vmem:[#allocation90_spill] sm:$0xff] %v3612_v56  ;;  %v3663_v10 = vmul.f32 %v3063_v26, %v3515_v24  ;;  %v3667_v22 = vmul.f32 %v3165_v60, %v3447_v2  ;;  %v3671_v61 = vmul.f32 %v3165_v60, %v3451_v6  ;;  %v3675_v28 = vmul.f32 %v3066_v27, %v3511_v43 }
  0xcc   :  { %5817 = vst [vmem:[#allocation92_spill] sm:$0xff] %v3651_v21  ;;  %5818 = vst [vmem:[#allocation93_spill] sm:$0xff] %v3655_v18  ;;  %v3679_v45 = vmul.f32 %v3066_v27, %v3515_v24  ;;  %v5821_v26 = vrot.slane %v3127_v48, %v3024_v12  ;;  %v5823_v2 = vrot.slane %v3127_v48, %v3026_v13 }
  0xcd   :  { %5819 = vst [vmem:[#allocation94_spill] sm:$0xff] %v3667_v22  ;;  %5820 = vst [vmem:[#allocation95_spill] sm:$0xff] %v3671_v61  ;;  %v5825_v6 = vrot.slane %v3037_v17, %v3024_v12  ;;  %v5826_v63 = vrot.slane %v3037_v17, %v3026_v13  ;;  %v289_v48 = vmul.f32 %v3076_v30, %v3515_v24 }
  0xce   :  { %v3684_v44 = vadd.f32 %v5821_v26, %v1799_v33  ;;  %v3689_v22 = vadd.f32 %v5823_v2, %v1800_v35  ;;  %v288_v26 = vmul.f32 %v3076_v30, %v3511_v43  ;;  %v3712_v17 = vmul.f32 %v3087_v34, %v3511_v43 }
  0xcf   :  { %v3694_v61 = vadd.f32 %v5825_v6, %v138_v1  ;;  %v3699_v27 = vadd.f32 %v5826_v63, %v139_v7  ;;  %v3716_v63 = vmul.f32 %v3087_v34, %v3515_v24  ;;  %v5827_v7 = vand.u32 15, %v3001_v5  ;;  %v5844_v5 = vld [vmem:[#allocation30_spill] sm:$0xff] }
  0xd0   :  { %5822 = vst [vmem:[#allocation96_spill] sm:$0xff] %v3684_v44  ;;  %5824 = vst [vmem:[#allocation97_spill] sm:$0xff] %v3689_v22  ;;  %v5830_v30 = vand.u32 15, %v3013_v8  ;;  %v3734_v34 = vmul.f32 %v3099_v38, %v3511_v43  ;;  %v3742_v33 = vmul.f32 %v3102_v39, %v3511_v43  ;;  %v3746_v8 = vmul.f32 %v3102_v39, %v3515_v24 }
  0xd1   :  { %vm3720_vm4 = vcmp.eq.s32.totalorder %v5827_v7, 15  ;;  %v3738_v7 = vmul.f32 %v3099_v38, %v3515_v24  ;;  %v439_v35 = vmul.f32 %v3111_v42, %v3515_v24  ;;  %v5833_v1 = vrot.slane %v3071_v29, %v3024_v12 }
  0xd2   :  { %vm3726_vm5 = vcmp.eq.s32.totalorder %v5830_v30, 15  ;;  %v438_v30 = vmul.f32 %v3111_v42, %v3511_v43  ;;  %v5834_v38 = vrot.slane %v3071_v29, %v3026_v13  ;;  %v3764_v39 = vmul.f32 %v3121_v46, %v3511_v43 }
  0xd3   :  { %v3755_v31 = vadd.f32 %v5833_v1, %v288_v26  ;;  %v3768_v44 = vmul.f32 %v3121_v46, %v3515_v24  ;;  %v3774_v26 = vmul.f32 %v3124_v47, %v3511_v43  ;;  %v3778_v29 = vmul.f32 %v3124_v47, %v3515_v24 }
  0xd4   :  { %v3760_v22 = vadd.f32 %v5834_v38, %v289_v48  ;;  %v3784_v46 = vmul.f32 %v3135_v50, %v3511_v43  ;;  %v3788_v38 = vmul.f32 %v3135_v50, %v3515_v24  ;;  %v5835_v47 = vrot.slane %v3094_v37, %v3024_v12 }
  0xd5   :  { %v5836_v1 = vrot.slane %v3094_v37, %v3026_v13  ;;  %v588_v3 = vmul.f32 %v3146_v54, %v3511_v43  ;;  %v589_v42 = vmul.f32 %v3146_v54, %v3515_v24  ;;  %v3812_v37 = vmul.f32 %v3159_v58, %v3511_v43 }
  0xd6   :  { %v3795_v36 = vadd.f32 %v5835_v47, %v438_v30  ;;  %v3822_v56 = vmul.f32 %v3162_v59, %v3511_v43  ;;  %v3826_v54 = vmul.f32 %v3162_v59, %v3515_v24  ;;  %v3830_v47 = vmul.f32 %v3165_v60, %v3511_v43 }
  0xd7   :  { %v3800_v48 = vadd.f32 %v5836_v1, %v439_v35  ;;  %v3816_v35 = vmul.f32 %v3159_v58, %v3515_v24  ;;  %v3834_v58 = vmul.f32 %v3165_v60, %v3515_v24  ;;  %v132_v1 = vsel %vm131_vm3, %v128_v41, %v130_v53 }
  0xd8   :  { %v133_v50 = vsel %vm131_vm3, %v130_v53, %v128_v41  ;;  %v5837_v30 = vrot.slane %v3130_v49, %v3024_v12  ;;  %v5838_v59 = vrot.slane %v3130_v49, %v3026_v13  ;;  %v3852_v60 = vsel %vm3720_vm4, 0.0, %v132_v1  ;;  %v1342_v13 = vpop.permute.xlu1 %1341  ;;  %v1340_v49 = vpop.permute.xlu0 %1339 }
  0xd9   :  { %v3856_v24 = vsel %vm3726_vm5, 0.0, %v133_v50  ;;  %v192_v50 = vmul.f32 %v3193_v4, %v3852_v60  ;;  %v232_v18 = vmul.f32 %v3196_v55, %v3852_v60  ;;  %v3884_v21 = vsel %vm131_vm3, %v1342_v13, %v1340_v49 }
  0xda   :  { %v3843_v32 = vadd.f32 %v5837_v30, %v588_v3  ;;  %v3848_v43 = vadd.f32 %v5838_v59, %v589_v42  ;;  %v158_v3 = vmul.f32 %v3182_v11, %v3852_v60  ;;  %v159_v12 = vmul.f32 %v3182_v11, %v3856_v24 }
  0xdb   :  { %v193_v1 = vmul.f32 %v3193_v4, %v3856_v24  ;;  %v233_v30 = vmul.f32 %v3196_v55, %v3856_v24  ;;  %v3880_v42 = vsel %vm131_vm3, %v1340_v49, %v1342_v13  ;;  %v5839_v41 = vrot.slane %v3643_v19, 1  ;;  %v5841_v49 = vld [vmem:[#allocation25_spill] sm:$0xff] }
  0xdc   :  { %v160_v53 = vadd.f32 %v158_v3, %v3694_v61  ;;  %v161_v9 = vadd.f32 %v159_v12, %v3699_v27  ;;  %v5840_v61 = vrot.slane %v3647_v20, 1  ;;  %v308_v3 = vmul.f32 %v3224_v62, %v3852_v60 }
  0xdd   :  { %v309_v12 = vmul.f32 %v3224_v62, %v3856_v24  ;;  %v196_v55 = vrot.slane %v192_v50, 1  ;;  %v197_v0 = vrot.slane %v193_v1, 1  ;;  %v342_v40 = vmul.f32 %v3235_v51, %v3852_v60 }
  0xde   :  { %v172_v59 = vadd.f32 %v5839_v41, %v160_v53  ;;  %v173_v27 = vadd.f32 %v5840_v61, %v161_v9  ;;  %v343_v13 = vmul.f32 %v3235_v51, %v3856_v24  ;;  %v5842_v19 = vrot.slane %v5841_v49, %v3030_v14 }
  0xdf   :  { %v5843_v20 = vrot.slane %v5841_v49, %v3032_v15  ;;  %v310_v41 = vadd.f32 %v308_v3, %v3755_v31  ;;  %v311_v61 = vadd.f32 %v309_v12, %v3760_v22  ;;  %v236_v50 = vrot.slane %v232_v18, 2  ;;  %v5847_v18 = vld [vmem:[#allocation39_spill] sm:$0xff] }
  0xe0   :  { %v188_v53 = vadd.f32 %v5842_v19, %v172_v59  ;;  %v237_v1 = vrot.slane %v233_v30, 2  ;;  %v3908_v57 = vmul.f32 %v5844_v5, %v3852_v60  ;;  %v3912_v51 = vmul.f32 %v5844_v5, %v3856_v24 }
  0xe1   :  { %v189_v9 = vadd.f32 %v5843_v20, %v173_v27  ;;  %v5845_v19 = vrot.slane %v3712_v17, 1  ;;  %v5846_v27 = vrot.slane %v3716_v63, 1  ;;  %v346_v3 = vrot.slane %v342_v40, 1 }
  0xe2   :  { %v200_v52 = vadd.f32 %v196_v55, %v188_v53  ;;  %v347_v22 = vrot.slane %v343_v13, 1  ;;  %v458_v30 = vmul.f32 %v5847_v18, %v3852_v60  ;;  %v459_v12 = vmul.f32 %v5847_v18, %v3856_v24  ;;  %v5850_v53 = vld [vmem:[#allocation28_spill] sm:$0xff]  ;;  %v5853_v13 = vld [vmem:[#allocation34_spill] sm:$0xff] }
  0xe3   :  { %v201_v59 = vadd.f32 %v197_v0, %v189_v9  ;;  %v322_v49 = vadd.f32 %v5845_v19, %v310_v41  ;;  %v323_v31 = vadd.f32 %v5846_v27, %v311_v61  ;;  %v5848_v20 = vrot.slane %v3659_v25, 2 }
  0xe4   :  { %v5849_v55 = vrot.slane %v3663_v10, 2  ;;  %v5851_v17 = vrot.slane %v5850_v53, %v3030_v14  ;;  %v5852_v40 = vrot.slane %v5850_v53, %v3032_v15  ;;  %v382_v41 = vmul.f32 %v5853_v13, %v3852_v60  ;;  %v5854_v10 = vld [vmem:[#allocation26_spill] sm:$0xff] }
  0xe5   :  { %v212_v5 = vadd.f32 %v5848_v20, %v200_v52  ;;  %v383_v61 = vmul.f32 %v5853_v13, %v3856_v24  ;;  %v460_v25 = vadd.f32 %v458_v30, %v3795_v36  ;;  %v461_v52 = vadd.f32 %v459_v12, %v3800_v48  ;;  %v5861_v36 = vld [vmem:[#allocation41_spill] sm:$0xff] }
  0xe6   :  { %v213_v0 = vadd.f32 %v5849_v55, %v201_v59  ;;  %v338_v9 = vadd.f32 %v5851_v17, %v322_v49  ;;  %v339_v63 = vadd.f32 %v5852_v40, %v323_v31  ;;  %v5855_v59 = vld [vmem:[#allocation21_spill] sm:$0xff]  ;;  %v5857_v49 = vld [vmem:[#allocation22_spill] sm:$0xff]  ;;  %v5859_v17 = vrot.slane %v3764_v39, 1 }
  0xe7   :  { %v5856_v19 = vrot.slane %v5854_v10, %v5855_v59  ;;  %v5858_v20 = vrot.slane %v5854_v10, %v5857_v49  ;;  %v5860_v18 = vrot.slane %v3768_v44, 1  ;;  %v492_v30 = vmul.f32 %v5861_v36, %v3852_v60 }
  0xe8   :  { %v350_v53 = vadd.f32 %v346_v3, %v338_v9  ;;  %v351_v31 = vadd.f32 %v347_v22, %v339_v63  ;;  %v472_v40 = vadd.f32 %v5859_v17, %v460_v25  ;;  %v493_v48 = vmul.f32 %v5861_v36, %v3856_v24 }
  0xe9   :  { %v228_v27 = vadd.f32 %v5856_v19, %v212_v5  ;;  %v229_v55 = vadd.f32 %v5858_v20, %v213_v0  ;;  %v473_v13 = vadd.f32 %v5860_v18, %v461_v52  ;;  %v5862_v19 = vrot.slane %v3734_v34, 2  ;;  %v5864_v0 = vld [vmem:[#allocation35_spill] sm:$0xff]  ;;  %v5867_v52 = vld [vmem:[#allocation32_spill] sm:$0xff] }
  0xea   :  { %v5863_v3 = vrot.slane %v3738_v7, 2  ;;  %v5865_v39 = vrot.slane %v5864_v0, %v3030_v14  ;;  %v5866_v44 = vrot.slane %v5864_v0, %v3032_v15  ;;  %v496_v63 = vrot.slane %v492_v30, 1 }
  0xeb   :  { %v240_v12 = vadd.f32 %v236_v50, %v228_v27  ;;  %v241_v5 = vadd.f32 %v237_v1, %v229_v55  ;;  %v362_v10 = vadd.f32 %v5862_v19, %v350_v53  ;;  %v497_v25 = vrot.slane %v493_v48, 1 }
  0xec   :  { %v363_v22 = vadd.f32 %v5863_v3, %v351_v31  ;;  %v488_v9 = vadd.f32 %v5865_v39, %v472_v40  ;;  %v489_v18 = vadd.f32 %v5866_v44, %v473_v13  ;;  %v5868_v50 = vrot.slane %v5867_v52, %v5855_v59  ;;  %v5870_v31 = vld [vmem:[#allocation42_spill] sm:$0xff]  ;;  %v5877_v44 = vld [vmem:[#allocation40_spill] sm:$0xff] }
  0xed   :  { %v5869_v34 = vrot.slane %v5867_v52, %v5857_v49  ;;  %v386_v7 = vrot.slane %v382_v41, 2  ;;  %v387_v20 = vrot.slane %v383_v61, 2  ;;  %v532_v17 = vmul.f32 %v5870_v31, %v3852_v60 }
  0xee   :  { %v378_v1 = vadd.f32 %v5868_v50, %v362_v10  ;;  %v500_v55 = vadd.f32 %v496_v63, %v488_v9  ;;  %v501_v53 = vadd.f32 %v497_v25, %v489_v18  ;;  %v533_v13 = vmul.f32 %v5870_v31, %v3856_v24  ;;  %v5880_v50 = vld [vmem:[#allocation29_spill] sm:$0xff] }
  0xef   :  { %v379_v27 = vadd.f32 %v5869_v34, %v363_v22  ;;  %v5871_v40 = vrot.slane %v3675_v28, 3  ;;  %v5872_v48 = vrot.slane %v3679_v45, 3  ;;  %v5873_v22 = vrot.slane %v3774_v26, 2 }
  0xf0   :  { %v390_v10 = vadd.f32 %v386_v7, %v378_v1  ;;  %v5874_v61 = vrot.slane %v3778_v29, 2  ;;  %v3983_v39 = vsel %vm3720_vm4, 0.0, %v3880_v42  ;;  %v3988_v28 = vsel %vm3726_vm5, 0.0, %v3884_v21 }
  0xf1   :  { %v252_v30 = vadd.f32 %v5871_v40, %v240_v12  ;;  %v253_v19 = vadd.f32 %v5872_v48, %v241_v5  ;;  %v391_v3 = vadd.f32 %v387_v20, %v379_v27  ;;  %v512_v41 = vadd.f32 %v5873_v22, %v500_v55  ;;  %v5886_v40 = vld [vmem:[#allocation44_spill] sm:$0xff]  ;;  %v5890_v22 = vld [vmem:[#allocation50_spill] sm:$0xff] }
  0xf2   :  { %v513_v0 = vadd.f32 %v5874_v61, %v501_v53  ;;  %v276_v45 = vrot.slane %v3908_v57, 3  ;;  %v277_v12 = vrot.slane %v3912_v51, 3  ;;  %v5875_v26 = vrot.slane %v3742_v33, 3  ;;  %v5881_v57 = vld [vmem:[#allocation23_spill] sm:$0xff]  ;;  %v5883_v33 = vld [vmem:[#allocation24_spill] sm:$0xff] }
  0xf3   :  { %v5876_v29 = vrot.slane %v3746_v8, 3  ;;  %v5878_v18 = vrot.slane %v5877_v44, %v5855_v59  ;;  %v5879_v63 = vrot.slane %v5877_v44, %v5857_v49  ;;  %v536_v21 = vrot.slane %v532_v17, 2  ;;  %v5885_v8 = vld [vmem:[#allocation37_spill] sm:$0xff]  ;;  %v5887_v48 = vld [vmem:[#allocation36_spill] sm:$0xff] }
  0xf4   :  { %v402_v5 = vadd.f32 %v5875_v26, %v390_v10  ;;  %v537_v52 = vrot.slane %v533_v13, 2  ;;  %v5882_v1 = vrot.slane %v5880_v50, %v5881_v57  ;;  %v5884_v34 = vrot.slane %v5880_v50, %v5883_v33 }
  0xf5   :  { %v403_v9 = vadd.f32 %v5876_v29, %v391_v3  ;;  %v528_v42 = vadd.f32 %v5878_v18, %v512_v41  ;;  %v529_v25 = vadd.f32 %v5879_v63, %v513_v0  ;;  %v422_v7 = vmul.f32 %v5885_v8, %v3852_v60  ;;  %v5893_v18 = vld [vmem:[#allocation51_spill] sm:$0xff] }
  0xf6   :  { %v268_v51 = vadd.f32 %v5882_v1, %v252_v30  ;;  %v269_v27 = vadd.f32 %v5884_v34, %v253_v19  ;;  %v423_v20 = vmul.f32 %v5885_v8, %v3856_v24  ;;  %v572_v17 = vmul.f32 %v5886_v40, %v3852_v60  ;;  %v5894_v1 = vld [vmem:[#allocation43_spill] sm:$0xff] }
  0xf7   :  { %v540_v55 = vadd.f32 %v536_v21, %v528_v42  ;;  %v541_v53 = vadd.f32 %v537_v52, %v529_v25  ;;  %v573_v13 = vmul.f32 %v5886_v40, %v3856_v24  ;;  %v5888_v30 = vrot.slane %v5887_v48, %v5881_v57 }
  0xf8   :  { %v5889_v19 = vrot.slane %v5887_v48, %v5883_v33  ;;  %v608_v41 = vmul.f32 %v5890_v22, %v3852_v60  ;;  %v609_v61 = vmul.f32 %v5890_v22, %v3856_v24  ;;  %v5891_v0 = vrot.slane %v3784_v46, 3 }
  0xf9   :  { %v418_v10 = vadd.f32 %v5888_v30, %v402_v5  ;;  %v5892_v29 = vrot.slane %v3788_v38, 3  ;;  %v642_v42 = vmul.f32 %v5893_v18, %v3852_v60  ;;  %v643_v5 = vmul.f32 %v5893_v18, %v3856_v24 }
  0xfa   :  { %v419_v3 = vadd.f32 %v5889_v19, %v403_v9  ;;  %v552_v26 = vadd.f32 %v5891_v0, %v540_v55  ;;  %v426_v63 = vrot.slane %v422_v7, 3  ;;  %v427_v9 = vrot.slane %v423_v20, 3  ;;  %v5903_v0 = vld [vmem:[#allocation31_spill] sm:$0xff] }
  0xfb   :  { %v553_v44 = vadd.f32 %v5892_v29, %v541_v53  ;;  %v610_v25 = vadd.f32 %v608_v41, %v3843_v32  ;;  %v611_v21 = vadd.f32 %v609_v61, %v3848_v43  ;;  %v280_v52 = vadd.f32 %v276_v45, %v268_v51  ;;  %v5899_v51 = vld [vmem:[#allocation45_spill] sm:$0xff] }
  0xfc   :  { %v281_v50 = vadd.f32 %v277_v12, %v269_v27  ;;  %v5895_v46 = vrot.slane %v5894_v1, %v5881_v57  ;;  %v5896_v38 = vrot.slane %v5894_v1, %v5883_v33  ;;  %v430_v53 = vadd.f32 %v426_v63, %v418_v10 }
  0xfd   :  { %v431_v48 = vadd.f32 %v427_v9, %v419_v3  ;;  %v5897_v30 = vrot.slane %v3812_v37, 1  ;;  %v5898_v20 = vrot.slane %v3816_v35, 1  ;;  %v576_v19 = vrot.slane %v572_v17, 3  ;;  %v5902_v3 = vld [vmem:[#allocation54_spill] sm:$0xff] }
  0xfe   :  { %v568_v34 = vadd.f32 %v5895_v46, %v552_v26  ;;  %v569_v55 = vadd.f32 %v5896_v38, %v553_v44  ;;  %v577_v43 = vrot.slane %v573_v13, 3  ;;  %v646_v45 = vrot.slane %v642_v42, 1  ;;  %v5904_v44 = vld [vmem:[#allocation38_spill] sm:$0xff] }
  0xff   :  { %v622_v7 = vadd.f32 %v5897_v30, %v610_v25  ;;  %v623_v32 = vadd.f32 %v5898_v20, %v611_v21  ;;  %v647_v12 = vrot.slane %v643_v5, 1  ;;  %v5900_v27 = vrot.slane %v5899_v51, %v3030_v14  ;;  %v5905_v25 = vld [vmem:[#allocation56_spill] sm:$0xff] }
 0x100   :  { %v5901_v61 = vrot.slane %v5899_v51, %v3032_v15  ;;  %v682_v37 = vmul.f32 %v5902_v3, %v3852_v60  ;;  %v683_v35 = vmul.f32 %v5902_v3, %v3856_v24  ;;  %v284_v17 = vadd.f32 %v5903_v0, %v280_v52  ;;  %v5908_v30 = vld [vmem:[#allocation48_spill] sm:$0xff] }
 0x101   :  { %v638_v41 = vadd.f32 %v5900_v27, %v622_v7  ;;  %v285_v13 = vadd.f32 %v5903_v0, %v281_v50  ;;  %v580_v26 = vadd.f32 %v576_v19, %v568_v34  ;;  %v581_v29 = vadd.f32 %v577_v43, %v569_v55  ;;  %v5911_v43 = vld [vmem:[#allocation49_spill] sm:$0xff] }
 0x102   :  { %v639_v10 = vadd.f32 %v5901_v61, %v623_v32  ;;  %v434_v42 = vadd.f32 %v5904_v44, %v430_v53  ;;  %v435_v5 = vadd.f32 %v5904_v44, %v431_v48  ;;  %v722_v21 = vmul.f32 %v5905_v25, %v3852_v60  ;;  %v5910_v32 = vld [vmem:[#allocation75_spill] sm:$0xff]  ;;  %v5914_v61 = vld [vmem:[#allocation68_spill] sm:$0xff] }
 0x103   :  { %v650_v63 = vadd.f32 %v646_v45, %v638_v41  ;;  %v723_v1 = vmul.f32 %v5905_v25, %v3856_v24  ;;  %v1369_v46 = vmul.f32 %v3983_v39, %v3182_v11  ;;  %v1370_v52 = vmul.f32 %v3988_v28, %v3182_v11  ;;  %v5909_v24 = vld [vmem:[#allocation74_spill] sm:$0xff] }
 0x104   :  { %v651_v9 = vadd.f32 %v647_v12, %v639_v10  ;;  %v5906_v50 = vrot.slane %v3822_v56, 2  ;;  %v5907_v38 = vrot.slane %v3826_v54, 2  ;;  %v686_v53 = vrot.slane %v682_v37, 2 }
 0x105   :  { %v687_v48 = vrot.slane %v683_v35, 2  ;;  %v584_v60 = vadd.f32 %v5908_v30, %v580_v26  ;;  %v585_v7 = vadd.f32 %v5908_v30, %v581_v29  ;;  %v1371_v20 = vadd.f32 %v1369_v46, %v5909_v24  ;;  %v5916_v35 = vld [vmem:[#allocation69_spill] sm:$0xff] }
 0x106   :  { %v662_v34 = vadd.f32 %v5906_v50, %v650_v63  ;;  %v663_v55 = vadd.f32 %v5907_v38, %v651_v9  ;;  %v1372_v19 = vadd.f32 %v1370_v52, %v5910_v32  ;;  %v5912_v11 = vrot.slane %v5911_v43, %v5855_v59  ;;  %v5918_v38 = vld [vmem:[#allocation53_spill] sm:$0xff] }
 0x107   :  { %v5913_v56 = vrot.slane %v5911_v43, %v5857_v49  ;;  %v1403_v54 = vmul.f32 %v3983_v39, %v3193_v4  ;;  %v1404_v51 = vmul.f32 %v3988_v28, %v3193_v4  ;;  %v738_v27 = vrot.slane %v434_v42, 7  ;;  %v5923_v43 = vld [vmem:[#allocation52_spill] sm:$0xff] }
 0x108   :  { %v678_v45 = vadd.f32 %v5912_v11, %v662_v34  ;;  %v739_v41 = vrot.slane %v435_v5, 7  ;;  %v5915_v10 = vrot.slane %v5914_v61, 1  ;;  %v5917_v26 = vrot.slane %v5916_v35, 1 }
 0x109   :  { %v679_v12 = vadd.f32 %v5913_v56, %v663_v55  ;;  %v726_v46 = vrot.slane %v722_v21, 3  ;;  %v727_v52 = vrot.slane %v723_v1, 3  ;;  %v744_v50 = vrot.slane %v584_v60, 6 }
 0x10a   :  { %v1383_v37 = vadd.f32 %v5915_v10, %v1371_v20  ;;  %v1384_v29 = vadd.f32 %v5917_v26, %v1372_v19  ;;  %v690_v63 = vadd.f32 %v686_v53, %v678_v45  ;;  %v745_v34 = vrot.slane %v585_v7, 6  ;;  %v5928_v10 = vld [vmem:[#allocation33_spill] sm:$0xff] }
 0x10b   :  { %v691_v9 = vadd.f32 %v687_v48, %v679_v12  ;;  %v5919_v55 = vrot.slane %v5918_v38, %v3030_v14  ;;  %v5920_v4 = vrot.slane %v5918_v38, %v3032_v15  ;;  %v5921_v5 = vrot.slane %v3830_v47, 3 }
 0x10c   :  { %v5922_v32 = vrot.slane %v3834_v58, 3  ;;  %v1407_v48 = vrot.slane %v1403_v54, 1  ;;  %v1408_v21 = vrot.slane %v1404_v51, 1  ;;  %v755_v1 = vsel %vm754_vm6, %v284_v17, %v738_v27  ;;  %v5926_v54 = vld [vmem:[#allocation88_spill] sm:$0xff]  ;;  %v5927_v27 = vld [vmem:[#allocation89_spill] sm:$0xff] }
 0x10d   :  { %v1399_v24 = vadd.f32 %v5919_v55, %v1383_v37  ;;  %v1400_v42 = vadd.f32 %v5920_v4, %v1384_v29  ;;  %v702_v20 = vadd.f32 %v5921_v5, %v690_v63  ;;  %v756_v60 = vsel %vm754_vm6, %v285_v13, %v739_v41  ;;  %v5929_v63 = vld [vmem:[#allocation76_spill] sm:$0xff]  ;;  %v5931_v55 = vld [vmem:[#allocation77_spill] sm:$0xff] }
 0x10e   :  { %v703_v53 = vadd.f32 %v5922_v32, %v691_v9  ;;  %v1519_v7 = vmul.f32 %v3983_v39, %v3224_v62  ;;  %v1520_v19 = vmul.f32 %v3988_v28, %v3224_v62  ;;  %v5924_v11 = vrot.slane %v5923_v43, %v5881_v57 }
 0x10f   :  { %v5925_v58 = vrot.slane %v5923_v43, %v5883_v33  ;;  %v1411_v56 = vadd.f32 %v1407_v48, %v1399_v24  ;;  %v1412_v12 = vadd.f32 %v1408_v21, %v1400_v42  ;;  %v1829_v17 = vrot.slane %v3635_v23, 1  ;;  %v5933_v42 = vld [vmem:[#allocation57_spill] sm:$0xff] }
 0x110   :  { %v718_v47 = vadd.f32 %v5924_v11, %v702_v20  ;;  %v1830_v13 = vrot.slane %v3639_v16, 1  ;;  %v1521_v51 = vadd.f32 %v1519_v7, %v5926_v54  ;;  %v1522_v41 = vadd.f32 %v1520_v19, %v5927_v27  ;;  %v5938_v7 = vld [vmem:[#allocation55_spill] sm:$0xff]  ;;  %v5942_v54 = vld [vmem:[#allocation92_spill] sm:$0xff] }
 0x111   :  { %v719_v45 = vadd.f32 %v5925_v58, %v703_v53  ;;  %v1553_v37 = vmul.f32 %v3983_v39, %v5928_v10  ;;  %v1554_v35 = vmul.f32 %v3988_v28, %v5928_v10  ;;  %v758_v26 = vsel %vm757_vm7, %v755_v1, %v744_v50  ;;  %v5936_v53 = vld [vmem:[#allocation71_spill] sm:$0xff] }
 0x112   :  { %v730_v61 = vadd.f32 %v726_v46, %v718_v47  ;;  %v759_v29 = vsel %vm757_vm7, %v756_v60, %v745_v34  ;;  %v5930_v9 = vrot.slane %v5929_v63, 1  ;;  %v5932_v24 = vrot.slane %v5931_v55, 1  ;;  %v5941_v58 = vld [vmem:[#allocation27_spill] sm:$0xff]  ;;  %v5945_v55 = vld [vmem:[#allocation58_spill] sm:$0xff] }
 0x113   :  { %v731_v62 = vadd.f32 %v727_v52, %v719_v45  ;;  %v5934_v52 = vld [vmem:[#allocation70_spill] sm:$0xff]  ;;  %v5937_v48 = vrot.slane %v5936_v53, 2  ;;  %v5939_v50 = vrot.slane %v5938_v7, %v3030_v14  ;;  %v5940_v1 = vrot.slane %v5938_v7, %v3032_v15 }
 0x114   :  { %v1533_v38 = vadd.f32 %v5930_v9, %v1521_v51  ;;  %v1534_v4 = vadd.f32 %v5932_v24, %v1522_v41  ;;  %v734_v5 = vadd.f32 %v5933_v42, %v730_v61  ;;  %v5935_v20 = vrot.slane %v5934_v52, 2  ;;  %v5943_v51 = vld [vmem:[#allocation93_spill] sm:$0xff]  ;;  %v5948_v52 = vld [vmem:[#allocation78_spill] sm:$0xff] }
 0x115   :  { %v735_v46 = vadd.f32 %v5933_v42, %v731_v62  ;;  %v1424_v21 = vadd.f32 %v5937_v48, %v1412_v12  ;;  %v1557_v19 = vrot.slane %v1553_v37, 1  ;;  %v1558_v43 = vrot.slane %v1554_v35, 1  ;;  %v5944_v37 = vld [vmem:[#allocation34_spill] sm:$0xff]  ;;  %v5950_v48 = vld [vmem:[#allocation79_spill] sm:$0xff] }
 0x116   :  { %v1423_v32 = vadd.f32 %v5935_v20, %v1411_v56  ;;  %v1549_v34 = vadd.f32 %v5939_v50, %v1533_v38  ;;  %v1550_v60 = vadd.f32 %v5940_v1, %v1534_v4  ;;  %v750_v11 = vrot.slane %v734_v5, 5 }
 0x117   :  { %v751_v47 = vrot.slane %v735_v46, 5  ;;  %v1443_v45 = vmul.f32 %v3983_v39, %v5941_v58  ;;  %v1444_v56 = vmul.f32 %v3988_v28, %v5941_v58  ;;  %v1869_v12 = vrot.slane %v5942_v54, 2 }
 0x118   :  { %v1870_v27 = vrot.slane %v5943_v51, 2  ;;  %v1561_v41 = vadd.f32 %v1557_v19, %v1549_v34  ;;  %v1562_v61 = vadd.f32 %v1558_v43, %v1550_v60  ;;  %v761_v62 = vsel %vm760_vm8, %v758_v26, %v750_v11  ;;  %v5952_v34 = vld [vmem:[#allocation30_spill] sm:$0xff]  ;;  %v6004_v51 = vld [vmem:[#allocation95_spill] sm:$0xff] }
 0x119   :  { %v762_v10 = vsel %vm760_vm8, %v759_v29, %v751_v47  ;;  %v1593_v35 = vmul.f32 %v3983_v39, %v5944_v37  ;;  %v1594_v63 = vmul.f32 %v3988_v28, %v5944_v37  ;;  %v4150_v9 = vmax.f32 %v761_v62, 0.0  ;;  %v5955_v43 = vld [vmem:[#allocation62_spill] sm:$0xff] }
 0x11a   :  { %v4152_v38 = vmax.f32 %v762_v10, 0.0  ;;  %v5946_v24 = vrot.slane %v5945_v55, %v5855_v59  ;;  %v5947_v5 = vrot.slane %v5945_v55, %v5857_v49  ;;  %v1447_v46 = vrot.slane %v1443_v45, 2  ;;  %v5958_v10 = vld [vmem:[#allocation90_spill] sm:$0xff]  ;;  %v5959_v55 = vld [vmem:[#allocation91_spill] sm:$0xff] }
 0x11b   :  { %v1448_v29 = vrot.slane %v1444_v56, 2  ;;  %v5949_v20 = vrot.slane %v5948_v52, 2  ;;  %v5951_v7 = vrot.slane %v5950_v48, 2  ;;  %v4166_v1 = vmul.f32 %v3983_v39, %v5952_v34  ;;  %765 = vrot.lane.b32.xlu0 %v4150_v9, %s5954_s5  ;;  %v5960_v48 = vld [vmem:[#allocation82_spill] sm:$0xff] }
 0x11c   :  { %v1439_v4 = vadd.f32 %v5946_v24, %v1423_v32  ;;  %v1440_v26 = vadd.f32 %v5947_v5, %v1424_v21  ;;  %v4170_v60 = vmul.f32 %v3988_v28, %v5952_v34  ;;  %v5953_v32 = vld [vmem:[#allocation39_spill] sm:$0xff]  ;;  %v5956_v11 = vrot.slane %v5955_v43, %v5855_v59  ;;  %767 = vrot.lane.b32.xlu1 %v4152_v38, %s5954_s5 }
 0x11d   :  { %v1573_v53 = vadd.f32 %v5949_v20, %v1561_v41  ;;  %v1574_v50 = vadd.f32 %v5951_v7, %v1562_v61  ;;  %v1669_v19 = vmul.f32 %v3983_v39, %v5953_v32  ;;  %v1670_v21 = vmul.f32 %v3988_v28, %v5953_v32 }
 0x11e   :  { %v5957_v58 = vrot.slane %v5955_v43, %v5857_v49  ;;  %v1597_v56 = vrot.slane %v1593_v35, 2  ;;  %v1598_v41 = vrot.slane %v1594_v63, 2  ;;  %v1451_v61 = vadd.f32 %v1447_v46, %v1439_v4 }
 0x11f   :  { %v1589_v47 = vadd.f32 %v5956_v11, %v1573_v53  ;;  %v1452_v62 = vadd.f32 %v1448_v29, %v1440_v26  ;;  %v1671_v37 = vadd.f32 %v1669_v19, %v5958_v10  ;;  %v1672_v24 = vadd.f32 %v1670_v21, %v5959_v55  ;;  %v5962_v26 = vld [vmem:[#allocation83_spill] sm:$0xff]  ;;  %v5964_v19 = vld [vmem:[#allocation60_spill] sm:$0xff] }
 0x120   :  { %v1590_v45 = vadd.f32 %v5957_v58, %v1574_v50  ;;  %v1703_v20 = vmul.f32 %v3983_v39, %v5861_v36  ;;  %v1704_v53 = vmul.f32 %v3988_v28, %v5861_v36  ;;  %v1487_v35 = vrot.slane %v4166_v1, 3 }
 0x121   :  { %v1601_v5 = vadd.f32 %v1597_v56, %v1589_v47  ;;  %v5961_v7 = vrot.slane %v5960_v48, 1  ;;  %v5963_v46 = vrot.slane %v5962_v26, 1  ;;  %v1633_v50 = vmul.f32 %v3983_v39, %v5885_v8  ;;  %v5967_v56 = vld [vmem:[#allocation72_spill] sm:$0xff] }
 0x122   :  { %v1602_v52 = vadd.f32 %v1598_v41, %v1590_v45  ;;  %v1634_v34 = vmul.f32 %v3988_v28, %v5885_v8  ;;  %v1743_v32 = vmul.f32 %v3983_v39, %v5870_v31  ;;  %v1744_v36 = vmul.f32 %v3988_v28, %v5870_v31  ;;  %v5969_v8 = vld [vmem:[#allocation73_spill] sm:$0xff] }
 0x123   :  { %v1683_v4 = vadd.f32 %v5961_v7, %v1671_v37  ;;  %v1684_v29 = vadd.f32 %v5963_v46, %v1672_v24  ;;  %v5965_v21 = vrot.slane %v5964_v19, %v3030_v14  ;;  %v5966_v11 = vrot.slane %v5964_v19, %v3032_v15  ;;  %v5971_v24 = vld [vmem:[#allocation80_spill] sm:$0xff]  ;;  %v5973_v31 = vld [vmem:[#allocation81_spill] sm:$0xff] }
 0x124   :  { %v1707_v58 = vrot.slane %v1703_v20, 1  ;;  %v1708_v45 = vrot.slane %v1704_v53, 1  ;;  %v5968_v41 = vrot.slane %v5967_v56, 3  ;;  %v5970_v37 = vrot.slane %v5969_v8, 3 }
 0x125   :  { %v1699_v43 = vadd.f32 %v5965_v21, %v1683_v4  ;;  %v1700_v47 = vadd.f32 %v5966_v11, %v1684_v29  ;;  %v5972_v48 = vrot.slane %v5971_v24, 3  ;;  %v5974_v26 = vrot.slane %v5973_v31, 3  ;;  %v5975_v11 = vld [vmem:[#allocation84_spill] sm:$0xff] }
 0x126   :  { %v1463_v10 = vadd.f32 %v5968_v41, %v1451_v61  ;;  %v1464_v55 = vadd.f32 %v5970_v37, %v1452_v62  ;;  %v1819_v19 = vmul.f32 %v3983_v39, %v5890_v22  ;;  %v1820_v20 = vmul.f32 %v3988_v28, %v5890_v22  ;;  %v5977_v41 = vld [vmem:[#allocation85_spill] sm:$0xff]  ;;  %v5979_v37 = vld [vmem:[#allocation96_spill] sm:$0xff] }
 0x127   :  { %v1613_v7 = vadd.f32 %v5972_v48, %v1601_v5  ;;  %v1614_v46 = vadd.f32 %v5974_v26, %v1602_v52  ;;  %v1711_v63 = vadd.f32 %v1707_v58, %v1699_v43  ;;  %v1712_v4 = vadd.f32 %v1708_v45, %v1700_v47  ;;  %v5980_v43 = vld [vmem:[#allocation97_spill] sm:$0xff] }
 0x128   :  { %v1637_v53 = vrot.slane %v1633_v50, 3  ;;  %v1638_v29 = vrot.slane %v1634_v34, 3  ;;  %v1747_v61 = vrot.slane %v1743_v32, 2  ;;  %v1748_v21 = vrot.slane %v1744_v36, 2  ;;  %v5981_v58 = vld [vmem:[#allocation65_spill] sm:$0xff]  ;;  %v5984_v32 = vld [vmem:[#allocation63_spill] sm:$0xff] }
 0x129   :  { %v5976_v62 = vrot.slane %v5975_v11, 2  ;;  %v5978_v5 = vrot.slane %v5977_v41, 2  ;;  %v1821_v52 = vadd.f32 %v1819_v19, %v5979_v37  ;;  %v1822_v47 = vadd.f32 %v1820_v20, %v5980_v43  ;;  %v5990_v37 = vld [vmem:[#allocation86_spill] sm:$0xff] }
 0x12a   :  { %v5982_v45 = vrot.slane %v5981_v58, %v5881_v57  ;;  %v5983_v22 = vrot.slane %v5981_v58, %v5883_v33  ;;  %v1853_v34 = vmul.f32 %v3983_v39, %v5893_v18  ;;  %v5985_v36 = vrot.slane %v5984_v32, %v5855_v59 }
 0x12b   :  { %v1723_v56 = vadd.f32 %v5976_v62, %v1711_v63  ;;  %v1724_v8 = vadd.f32 %v5978_v5, %v1712_v4  ;;  %v1854_v63 = vmul.f32 %v3988_v28, %v5893_v18  ;;  %v5986_v31 = vrot.slane %v5984_v32, %v5857_v49 }
 0x12c   :  { %v1629_v24 = vadd.f32 %v5982_v45, %v1613_v7  ;;  %v1630_v50 = vadd.f32 %v5983_v22, %v1614_v46  ;;  %v1833_v7 = vadd.f32 %v1829_v17, %v1821_v52  ;;  %v1834_v46 = vadd.f32 %v1830_v13, %v1822_v47  ;;  %v5994_v45 = vld [vmem:[#allocation59_spill] sm:$0xff] }
 0x12d   :  { %v1739_v48 = vadd.f32 %v5985_v36, %v1723_v56  ;;  %v1740_v26 = vadd.f32 %v5986_v31, %v1724_v8  ;;  %v1783_v4 = vmul.f32 %v3983_v39, %v5886_v40  ;;  %v1784_v18 = vmul.f32 %v3988_v28, %v5886_v40  ;;  %v5987_v56 = vld [vmem:[#allocation61_spill] sm:$0xff] }
 0x12e   :  { %v1857_v19 = vrot.slane %v1853_v34, 1  ;;  %v1858_v20 = vrot.slane %v1854_v63, 1  ;;  %v5988_v41 = vrot.slane %v5987_v56, %v3030_v14  ;;  %v5989_v23 = vrot.slane %v5987_v56, %v3032_v15  ;;  %v5997_v34 = vld [vmem:[#allocation66_spill] sm:$0xff] }
 0x12f   :  { %v1751_v11 = vadd.f32 %v1747_v61, %v1739_v48  ;;  %v1752_v62 = vadd.f32 %v1748_v21, %v1740_v26  ;;  %v1641_v16 = vadd.f32 %v1637_v53, %v1629_v24  ;;  %v1642_v13 = vadd.f32 %v1638_v29, %v1630_v50  ;;  %v5992_v21 = vld [vmem:[#allocation87_spill] sm:$0xff] }
 0x130   :  { %v1849_v5 = vadd.f32 %v5988_v41, %v1833_v7  ;;  %v1850_v17 = vadd.f32 %v5989_v23, %v1834_v46  ;;  %v1893_v8 = vmul.f32 %v3983_v39, %v5902_v3  ;;  %v1894_v40 = vmul.f32 %v3988_v28, %v5902_v3 }
 0x131   :  { %v5991_v52 = vrot.slane %v5990_v37, 3  ;;  %v5993_v43 = vrot.slane %v5992_v21, 3  ;;  %v5995_v15 = vrot.slane %v5994_v45, %v5881_v57  ;;  %v5996_v53 = vrot.slane %v5994_v45, %v5883_v33  ;;  %v6006_v37 = vld [vmem:[#allocation67_spill] sm:$0xff] }
 0x132   :  { %v1861_v14 = vadd.f32 %v1857_v19, %v1849_v5  ;;  %v1862_v58 = vadd.f32 %v1858_v20, %v1850_v17  ;;  %v1787_v24 = vrot.slane %v1783_v4, 3  ;;  %v1788_v50 = vrot.slane %v1784_v18, 3  ;;  %v6000_v18 = vld [vmem:[#allocation64_spill] sm:$0xff] }
 0x133   :  { %v1763_v61 = vadd.f32 %v5991_v52, %v1751_v11  ;;  %v1764_v47 = vadd.f32 %v5993_v43, %v1752_v62  ;;  %v1479_v22 = vadd.f32 %v5995_v15, %v1463_v10  ;;  %v1480_v29 = vadd.f32 %v5996_v53, %v1464_v55 }
 0x134   :  { %v5998_v3 = vrot.slane %v5997_v34, %v5881_v57  ;;  %v5999_v32 = vrot.slane %v5997_v34, %v5883_v33  ;;  %v1873_v48 = vadd.f32 %v1869_v12, %v1861_v14  ;;  %v1874_v10 = vadd.f32 %v1870_v27, %v1862_v58  ;;  %v6003_v12 = vld [vmem:[#allocation94_spill] sm:$0xff] }
 0x135   :  { %v1645_v31 = vadd.f32 %v1641_v16, %v5904_v44  ;;  %v1646_v55 = vadd.f32 %v1642_v13, %v5904_v44  ;;  %v1897_v26 = vrot.slane %v1893_v8, 2  ;;  %v1898_v7 = vrot.slane %v1894_v40, 2 }
 0x136   :  { %v1779_v63 = vadd.f32 %v5998_v3, %v1763_v61  ;;  %v1780_v36 = vadd.f32 %v5999_v32, %v1764_v47  ;;  %v6001_v19 = vrot.slane %v6000_v18, %v5855_v59  ;;  %v6002_v11 = vrot.slane %v6000_v18, %v5857_v49 }
 0x137   :  { %v1909_v62 = vrot.slane %v6003_v12, 3  ;;  %v1910_v27 = vrot.slane %v6004_v51, 3  ;;  %v1491_v56 = vadd.f32 %v1487_v35, %v1479_v22  ;;  %v6005_v44 = vrot.slane %v4170_v60, 3 }
 0x138   :  { %v1791_v46 = vadd.f32 %v1787_v24, %v1779_v63  ;;  %v1792_v4 = vadd.f32 %v1788_v50, %v1780_v36  ;;  %v1889_v20 = vadd.f32 %v6001_v19, %v1873_v48  ;;  %v1890_v54 = vadd.f32 %v6002_v11, %v1874_v10 }
 0x139   :  { %v1492_v41 = vadd.f32 %v6005_v44, %v1480_v29  ;;  %v1933_v59 = vmul.f32 %v3983_v39, %v5905_v25  ;;  %v1934_v17 = vmul.f32 %v3988_v28, %v5905_v25  ;;  %v1949_v40 = vrot.slane %v1645_v31, 7 }
 0x13a   :  { %v1901_v5 = vadd.f32 %v1897_v26, %v1889_v20  ;;  %v1902_v23 = vadd.f32 %v1898_v7, %v1890_v54  ;;  %v1795_v49 = vadd.f32 %v1791_v46, %v5908_v30  ;;  %v1796_v16 = vadd.f32 %v1792_v4, %v5908_v30 }
 0x13b   :  { %v1950_v1 = vrot.slane %v1646_v55, 7  ;;  %v1495_v35 = vadd.f32 %v1491_v56, %v5903_v0  ;;  %v1496_v60 = vadd.f32 %v1492_v41, %v5903_v0  ;;  %v6007_v52 = vrot.slane %v6006_v37, %v5881_v57 }
 0x13c   :  { %v1913_v13 = vadd.f32 %v1909_v62, %v1901_v5  ;;  %v1914_v8 = vadd.f32 %v1910_v27, %v1902_v23  ;;  %v6008_v39 = vrot.slane %v6006_v37, %v5883_v33  ;;  %v1937_v25 = vrot.slane %v1933_v59, 3 }
 0x13d   :  { %v1938_v21 = vrot.slane %v1934_v17, 3  ;;  %v1955_v43 = vrot.slane %v1795_v49, 6  ;;  %v1956_v30 = vrot.slane %v1796_v16, 6  ;;  %v1965_v58 = vsel %vm754_vm6, %v1495_v35, %v1949_v40 }
 0x13e   :  { %v1929_v61 = vadd.f32 %v6007_v52, %v1913_v13  ;;  %v1930_v28 = vadd.f32 %v6008_v39, %v1914_v8  ;;  %v1966_v45 = vsel %vm754_vm6, %v1496_v60, %v1950_v1  ;;  %v4364_v3 = vstv %s2611_s1  ;;  %s4532_s1 = sld [smem:[#allocation7 + $0x1a]] }
 0x13f   :  { %v1967_v57 = vsel %vm757_vm7, %v1965_v58, %v1955_v43  ;;  %v1968_v22 = vsel %vm757_vm7, %v1966_v45, %v1956_v30  ;;  %v4368_v63 = vstv %s2614_s3  ;;  %v4370_v32 = vstv %s2605_s11  ;;  %s4508_s11 = sld [smem:[#allocation7 + $0x17]] }
 0x140   :  { %v1941_v47 = vadd.f32 %v1937_v25, %v1929_v61  ;;  %v1942_v14 = vadd.f32 %v1938_v21, %v1930_v28  ;;  %v4384_v10 = vmul.f32 %v4364_v3, %v4150_v9  ;;  %v4388_v31 = vmul.f32 %v4364_v3, %v4152_v38  ;;  %s4552_s3 = sld [smem:[#allocation7 + $0x1b]] }
 0x141   :  { %v4392_v55 = vstv %s2620_s13  ;;  %v4396_v26 = vmul.f32 %v4368_v63, %v4150_v9  ;;  %v4400_v7 = vmul.f32 %v4368_v63, %v4152_v38  ;;  %v4406_v46 = vmul.f32 %v4370_v32, %v4150_v9  ;;  %s4571_s13 = sld [smem:[#allocation7 + $0x1e]] }
 0x142   :  { %v1945_v0 = vadd.f32 %v1941_v47, %v5933_v42  ;;  %v1946_v15 = vadd.f32 %v1942_v14, %v5933_v42  ;;  %v4360_v42 = vstv %s2608_s0  ;;  %6010 = vst [vmem:[#allocation25_spill] sm:$0xff] %v4384_v10  ;;  %6011 = vst [vmem:[#allocation28_spill] sm:$0xff] %v4388_v31  ;;  %v4408_v4 = vstv %s2623_s14  ;;  %s4517_s0 = sld [smem:[#allocation7 + $0x18]] }
 0x143   :  { %v4374_v36 = vmul.f32 %v4360_v42, %v4150_v9  ;;  %v4380_v48 = vmul.f32 %v4360_v42, %v4152_v38  ;;  %6012 = vst [vmem:[#allocation26_spill] sm:$0xff] %v4396_v26  ;;  %6013 = vst [vmem:[#allocation21_spill] sm:$0xff] %v4400_v7  ;;  %v4414_v18 = vmul.f32 %v4370_v32, %v4152_v38  ;;  %v4419_v19 = vstv %s4336_s12  ;;  %s4561_s12 = sld [smem:[#allocation7 + $0x1d]] }
 0x144   :  { %v1961_v33 = vrot.slane %v1945_v0, 5  ;;  %v1962_v53 = vrot.slane %v1946_v15, 5  ;;  %v4423_v20 = vmul.f32 %v4392_v55, %v4150_v9  ;;  %v4427_v11 = vmul.f32 %v4392_v55, %v4152_v38  ;;  %s4591_s14 = sld [smem:[#allocation7 + $0x20]] }
 0x145   :  { %v4441_v44 = vmul.f32 %v4408_v4, %v4150_v9  ;;  %v4444_v41 = vstv %s4338_s15  ;;  %v4447_v5 = vstv %s4356_s25  ;;  %v4453_v23 = vmul.f32 %v4419_v19, %v4150_v9  ;;  %s4596_s15 = sld [smem:[#allocation7 + $0x21]] }
 0x146   :  { %v1969_v29 = vsel %vm760_vm8, %v1967_v57, %v1961_v33  ;;  %v1970_v24 = vsel %vm760_vm8, %v1968_v22, %v1962_v53  ;;  %v4457_v59 = vmul.f32 %v4419_v19, %v4152_v38  ;;  %v4461_v17 = vmul.f32 %v4408_v4, %v4152_v38  ;;  %s4728_s25 = sld [smem:[#allocation10 + $0x1]] }
 0x147   :  { %v4320_v50 = vmax.f32 %v1969_v29, 0.0  ;;  %v4322_v34 = vmax.f32 %v1970_v24, 0.0  ;;  %6014 = vst [vmem:[#allocation22_spill] sm:$0xff] %v4441_v44  ;;  %v4464_v49 = vstv %s4358_s27  ;;  %v4471_v8 = vstv %s4342_s23  ;;  %s4630_s23 = sld [smem:[#allocation7 + $0x24]] }
 0x148   :  { %6015 = vst [vmem:[#allocation41_spill] sm:$0xff] %v4461_v17  ;;  %v4474_v40 = vstv %s4362_s28  ;;  %v4477_v1 = vstv %s4366_s29  ;;  %v4483_v35 = vmul.f32 %v4444_v41, %v4150_v9  ;;  %v4486_v60 = vstv %s4340_s18  ;;  %s4618_s18 = sld [smem:[#allocation7 + $0x23]] }
 0x149   :  { %1973 = vrot.lane.b32.xlu0 %v4320_v50, %s5954_s5  ;;  %1975 = vrot.lane.b32.xlu1 %v4322_v34, %s5954_s5  ;;  %6016 = vst [vmem:[#allocation35_spill] sm:$0xff] %v4474_v40  ;;  %6017 = vst [vmem:[#allocation32_spill] sm:$0xff] %v4477_v1  ;;  %s4479_s5 = sld [smem:[#allocation7 + $0x11]]  ;;  %v4489_v37 = vstv %s4376_s30  ;;  %v4496_v61 = vmul.f32 %v4444_v41, %v4152_v38  ;;  %v4499_v39 = vstv %s4344_s17 }
 0x14a   :  { %6018 = vst [vmem:[#allocation42_spill] sm:$0xff] %v4483_v35  ;;  %6019 = vst [vmem:[#allocation40_spill] sm:$0xff] %v4489_v37  ;;  %v4502_v28 = vstv %s4390_s6  ;;  %v4505_v25 = vstv %s4402_s7  ;;  %v4512_v43 = vmul.f32 %v4471_v8, %v4150_v9  ;;  %v4515_v30 = vstv %s4410_s8  ;;  %s4652_s17 = sld [smem:[#allocation7 + $0x26]]  ;;  %s2876_s6 = smov [#allocation12]  }
 0x14b   :  { %6020 = vst [vmem:[#allocation29_spill] sm:$0xff] %v4496_v61  ;;  %6021 = vst [vmem:[#allocation23_spill] sm:$0xff] %v4502_v28  ;;  %v4521_v47 = vmul.f32 %v4486_v60, %v4150_v9  ;;  %v4525_v14 = vmul.f32 %v4486_v60, %v4152_v38  ;;  %v4529_v58 = vmul.f32 %v4471_v8, %v4152_v38  ;;  %v4539_v15 = vstv %s4346_s19  ;;  %s4654_s19 = sld [smem:[#allocation10]]  ;;  %s2540_s7 = sshll.u32 %s2876_s6, 4  ;;  %s2541_s7 = int_to_ptr.vmem [resolvable:$true] %s2540_s7 }
 0x14c   :  { %6022 = vst [vmem:[#allocation24_spill] sm:$0xff] %v4505_v25  ;;  %6023 = vst [vmem:[#allocation37_spill] sm:$0xff] %v4512_v43  ;;  %v4536_v0 = vmul.f32 %v4499_v39, %v4150_v9  ;;  %v4543_v57 = vmul.f32 %v4320_v50, %v4370_v32  ;;  %v4546_v22 = vstv %s4416_s2  ;;  %v4549_v33 = vstv %s4431_s26  ;;  %s4761_s27 = sld [smem:[#allocation7 + $0x2d]]  ;;  %s2837_s8 = scalar_lea.vmem %s2541_s7, 256 }
 0x14d   :  { %773 = vrot.lane.b32.xlu0 %v4150_v9, %s6009_s4  ;;  %775 = vrot.lane.b32.xlu1 %v4152_v38, %s6009_s4  ;;  %6024 = vst [vmem:[#allocation44_spill] sm:$0xff] %v4515_v30  ;;  %6025 = vst [vmem:[#allocation36_spill] sm:$0xff] %v4529_v58  ;;  %v4555_v29 = vstv %s4348_s20  ;;  %v4558_v24 = vstv %s4435_s16  ;;  %v4565_v27 = vmul.f32 %v4499_v39, %v4152_v38  ;;  %s4669_s20 = sld [smem:[#allocation7 + $0x27]]  ;;  %p2838_p11 = scmp.ne.s32.totalorder %s2541_s7, %s2837_s8 }
 0x14e   :  { %6026 = vst [vmem:[#allocation50_spill] sm:$0xff] %v4536_v0  ;;  %6027 = vst [vmem:[#allocation51_spill] sm:$0xff] %v4546_v22  ;;  %v4568_v45 = vstv %s4350_s21  ;;  %v4575_v21 = vmul.f32 %v4539_v15, %v4150_v9  ;;  %v4579_v56 = vmul.f32 %v4539_v15, %v4152_v38  ;;  %v4582_v52 = vstv %s4352_s22  ;;  %s4693_s21 = sld [smem:[#allocation7 + $0x29]]  ;;  %p2842_p12 = scmp.lt.s32.totalorder %s2541_s7, %s2541_s7 }
 0x14f   :  { %6028 = vst [vmem:[#allocation43_spill] sm:$0xff] %v4558_v24  ;;  %6029 = vst [vmem:[#allocation45_spill] sm:$0xff] %v4565_v27  ;;  %v4585_v51 = vstv %s4449_s9  ;;  %v4588_v62 = vstv %s4466_s10  ;;  %v4594_v53 = vstv %s4354_s24  ;;  %v4600_v16 = vmul.f32 %v4555_v29, %v4150_v9  ;;  %s4709_s22 = sld [smem:[#allocation7 + $0x2a]]  ;;  %p2843_p13 = scmp.lt.s32.totalorder %s2837_s8, %s2837_s8 }
 0x150   :  { %6030 = vst [vmem:[#allocation54_spill] sm:$0xff] %v4575_v21  ;;  %6031 = vst [vmem:[#allocation31_spill] sm:$0xff] %v4579_v56  ;;  %v4604_v12 = vmul.f32 %v4555_v29, %v4152_v38  ;;  %v4608_v13 = vmul.f32 %v4568_v45, %v4150_v9  ;;  %v4612_v54 = vmul.f32 %v4568_v45, %v4152_v38  ;;  %v4615_v7 = vstv %s4479_s5  ;;  %s4713_s24 = sld [smem:[#allocation7 + $0x2c]] }
 0x151   :  { %1981 = vrot.lane.b32.xlu0 %v4320_v50, %s6009_s4  ;;  %1983 = vrot.lane.b32.xlu1 %v4322_v34, %s6009_s4  ;;  %s4492_s4 = sld [smem:[#allocation7 + $0x14]]  ;;  %6034 = vst [vmem:[#allocation48_spill] sm:$0xff] %v4615_v7  ;;  %v4622_v61 = vmul.f32 %v4582_v52, %v4150_v9  ;;  %v4626_v35 = vmul.f32 %v4582_v52, %v4152_v38  ;;  %v4644_v17 = vstv %s4508_s11  ;;  %v4647_v44 = vstv %s4517_s0  ;;  %p2844_p0 = por %p2843_p13, %p2842_p12 }
 0x152   :  { %6032 = vst [vmem:[#allocation38_spill] sm:$0xff] %v4608_v13  ;;  %6033 = vst [vmem:[#allocation56_spill] sm:$0xff] %v4612_v54  ;;  %v4634_v26 = vmul.f32 %v4594_v53, %v4150_v9  ;;  %v4638_v27 = vmul.f32 %v4594_v53, %v4152_v38  ;;  %v4650_v31 = vstv %s4532_s1  ;;  %v4660_v38 = vmul.f32 %v4320_v50, %v4360_v42  ;;  %s4770_s28 = sld [smem:[#allocation7 + $0x2f]] }
 0x153   :  { %6035 = vst [vmem:[#allocation74_spill] sm:$0xff] %v4622_v61  ;;  %6036 = vst [vmem:[#allocation75_spill] sm:$0xff] %v4626_v35  ;;  %v4664_v0 = vmul.f32 %v4322_v34, %v4360_v42  ;;  %v4667_v56 = vstv %s4552_s3  ;;  %v4675_v58 = vmul.f32 %v4320_v50, %v4364_v3  ;;  %v4681_v42 = vmul.f32 %v4322_v34, %v4364_v3  ;;  %s4809_s29 = sld [smem:[#allocation10 + $0x2]]  ;;  %p2845_p1 = pnand %p2844_p0, %p2838_p11 }
 0x154   :  { %6037 = vst [vmem:[#allocation49_spill] sm:$0xff] %v4634_v26  ;;  %6038 = vst [vmem:[#allocation68_spill] sm:$0xff] %v4638_v27  ;;  %v4688_v10 = vstv %s4561_s12  ;;  %v4691_v9 = vstv %s4571_s13  ;;  %v4697_v54 = vmul.f32 %v4322_v34, %v4370_v32  ;;  %v4701_v13 = vmul.f32 %v4322_v34, %v4368_v63  ;;  %s4828_s30 = sld [smem:[#allocation10 + $0x3]] }
 0x155   :  { %6039 = vst [vmem:[#allocation69_spill] sm:$0xff] %v4644_v17  ;;  %6040 = vst [vmem:[#allocation53_spill] sm:$0xff] %v4647_v44  ;;  %v4685_v17 = vmul.f32 %v4320_v50, %v4368_v63  ;;  %v4704_v3 = vstv %s4591_s14  ;;  %v4707_v21 = vstv %s4596_s15  ;;  %v4718_v63 = vmul.f32 %v4320_v50, %v4392_v55 }
 0x156   :  { %6041 = vst [vmem:[#allocation52_spill] sm:$0xff] %v4660_v38  ;;  %6042 = vst [vmem:[#allocation88_spill] sm:$0xff] %v4664_v0  ;;  %v4722_v35 = vmul.f32 %v4322_v34, %v4392_v55  ;;  %v4726_v27 = vmul.f32 %v4320_v50, %v4408_v4  ;;  %v4731_v26 = vstv %s4618_s18  ;;  %v4742_v38 = vmul.f32 %v4320_v50, %v4419_v19 }
 0x157   :  { %v4641_v43 = vstv %s4492_s4  ;;  %6043 = vst [vmem:[#allocation89_spill] sm:$0xff] %v4667_v56  ;;  %6044 = vst [vmem:[#allocation33_spill] sm:$0xff] %v4675_v58  ;;  %v4737_v58 = vmul.f32 %v4322_v34, %v4408_v4  ;;  %v4746_v61 = vmul.f32 %v4320_v50, %v4444_v41  ;;  %v4753_v0 = vstv %s4654_s19 }
 0x158   :  { %6045 = vst [vmem:[#allocation76_spill] sm:$0xff] %v4681_v42  ;;  %6046 = vst [vmem:[#allocation77_spill] sm:$0xff] %v4685_v17  ;;  %v4756_v32 = vstv %s4630_s23  ;;  %v4759_v4 = vstv %s4652_s17  ;;  %v4765_v55 = vmul.f32 %v4322_v34, %v4419_v19  ;;  %v4768_v42 = vstv %s4669_s20 }
 0x159   :  { %6047 = vst [vmem:[#allocation57_spill] sm:$0xff] %v4688_v10  ;;  %6048 = vst [vmem:[#allocation70_spill] sm:$0xff] %v4691_v9  ;;  %v4778_v19 = vmul.f32 %v4320_v50, %v4471_v8 }
 0x15a   :  { %6049 = vst [vmem:[#allocation71_spill] sm:$0xff] %v4701_v13  ;;  %6050 = vst [vmem:[#allocation55_spill] sm:$0xff] %v4704_v3 }
 0x15b   :  { %6051 = vst [vmem:[#allocation27_spill] sm:$0xff] %v4707_v21  ;;  %6052 = vst [vmem:[#allocation92_spill] sm:$0xff] %v4718_v63  ;;  %v4789_v63 = vstv %s4693_s21 }
 0x15c   :  { %6053 = vst [vmem:[#allocation93_spill] sm:$0xff] %v4722_v35  ;;  %6054 = vst [vmem:[#allocation34_spill] sm:$0xff] %v4726_v27  ;;  %v4803_v35 = vmul.f32 %v4320_v50, %v4539_v15 }
 0x15d   :  { %6055 = vst [vmem:[#allocation58_spill] sm:$0xff] %v4731_v26  ;;  %6056 = vst [vmem:[#allocation78_spill] sm:$0xff] %v4737_v58  ;;  %v4750_v26 = vmul.f32 %v4322_v34, %v4444_v41  ;;  %v4786_v41 = vmul.f32 %v4320_v50, %v4499_v39  ;;  %v6105_v58 = vrot.slane %v4427_v11, 1  ;;  %v6107_v11 = vld [vmem:[#allocation25_spill] sm:$0xff] }
 0x15e   :  { %6057 = vst [vmem:[#allocation79_spill] sm:$0xff] %v4742_v38  ;;  %6058 = vst [vmem:[#allocation30_spill] sm:$0xff] %v4746_v61  ;;  %v4807_v38 = vmul.f32 %v4322_v34, %v4539_v15  ;;  %v4856_v15 = vstv %s4770_s28  ;;  %v4868_v61 = vmul.f32 %v4322_v34, %v4582_v52 }
 0x15f   :  { %6059 = vst [vmem:[#allocation39_spill] sm:$0xff] %v4750_v26  ;;  %6060 = vst [vmem:[#allocation62_spill] sm:$0xff] %v4753_v0  ;;  %v4812_v0 = vstv %s4709_s22  ;;  %v4819_v26 = vmul.f32 %v4320_v50, %v4486_v60 }
 0x160   :  { %6061 = vst [vmem:[#allocation90_spill] sm:$0xff] %v4756_v32  ;;  %6062 = vst [vmem:[#allocation91_spill] sm:$0xff] %v4759_v4  ;;  %v4795_v4 = vmul.f32 %v4322_v34, %v4499_v39  ;;  %v4815_v39 = vstv %s4713_s24 }
 0x161   :  { %6063 = vst [vmem:[#allocation82_spill] sm:$0xff] %v4765_v55  ;;  %6064 = vst [vmem:[#allocation83_spill] sm:$0xff] %v4768_v42  ;;  %v4782_v55 = vmul.f32 %v4322_v34, %v4471_v8 }
 0x162   :  { %6065 = vst [vmem:[#allocation60_spill] sm:$0xff] %v4778_v19  ;;  %6067 = vst [vmem:[#allocation73_spill] sm:$0xff] %v4786_v41  ;;  %v4893_v41 = vmul.f32 %v4322_v34, %v4594_v53 }
 0x163   :  { %6066 = vst [vmem:[#allocation72_spill] sm:$0xff] %v4782_v55  ;;  %6068 = vst [vmem:[#allocation80_spill] sm:$0xff] %v4789_v63 }
 0x164   :  { %6069 = vst [vmem:[#allocation81_spill] sm:$0xff] %v4795_v4  ;;  %6071 = vst [vmem:[#allocation84_spill] sm:$0xff] %v4803_v35  ;;  %v4880_v35 = vmul.f32 %v4322_v34, %v4555_v29  ;;  %v4889_v4 = vmul.f32 %v4320_v50, %v4594_v53 }
 0x165   :  { %6072 = vst [vmem:[#allocation85_spill] sm:$0xff] %v4807_v38  ;;  %6073 = vst [vmem:[#allocation96_spill] sm:$0xff] %v4812_v0 }
 0x166   :  { %6074 = vst [vmem:[#allocation97_spill] sm:$0xff] %v4815_v39  ;;  %6075 = vst [vmem:[#allocation65_spill] sm:$0xff] %v4819_v26 }
 0x167   :  { %6083 = vst [vmem:[#allocation66_spill] sm:$0xff] %v4856_v15  ;;  %6086 = vst [vmem:[#allocation95_spill] sm:$0xff] %v4868_v61 }
 0x168   :  { %6087 = vst [vmem:[#allocation67_spill] sm:$0xff] %v4880_v35  ;;  %6088 = vst [vmem:[#allocation20_spill] sm:$0xff] %v4889_v4 }
 0x169   :  { %6089 = vst [vmem:[#allocation46_spill] sm:$0xff] %v4893_v41 }
 0x18d   :  { %v766_v13 = vpop.permute.xlu0 %765 }
 0x18e   :  { %v768_v17 = vpop.permute.xlu1 %767 }
 0x18f   :  { %v769_v27 = vsel %vm122_vm0, %v766_v13, %v768_v17  ;;  %v770_v8 = vsel %vm122_vm0, %v768_v17, %v766_v13  ;;  %v4823_v17 = vmul.f32 %v4322_v34, %v4486_v60  ;;  %v4826_v13 = vstv %s4728_s25 }
 0x190   :  { %6077 = vst [vmem:[#allocation61_spill] sm:$0xff] %v4826_v13  ;;  %v4835_v3 = vsel %vm3313_vm1, 0.0, %v770_v8  ;;  %v4839_v26 = vsel %vm3319_vm2, 0.0, %v769_v27  ;;  %v4847_v13 = vstv %s4761_s27  ;;  %v4853_v8 = vmul.f32 %v4322_v34, %v4568_v45 }
 0x191   :  { %6076 = vst [vmem:[#allocation63_spill] sm:$0xff] %v4823_v17  ;;  %v4844_v17 = vmul.f32 %v4320_v50, %v4568_v45  ;;  %6081 = vst [vmem:[#allocation87_spill] sm:$0xff] %v4847_v13  ;;  %v4860_v27 = vmul.f32 %v4320_v50, %v4555_v29  ;;  %v4864_v60 = vmul.f32 %v4320_v50, %v4582_v52  ;;  %v4913_v34 = vstv %s4809_s29 }
 0x192   :  { %6082 = vst [vmem:[#allocation59_spill] sm:$0xff] %v4853_v8  ;;  %v783_v63 = vmul.f32 %v4447_v5, %v4835_v3  ;;  %v784_v45 = vmul.f32 %v4447_v5, %v4839_v26  ;;  %v4876_v38 = vmul.f32 %v4464_v49, %v4835_v3  ;;  %v4897_v55 = vmul.f32 %v4474_v40, %v4835_v3 }
 0x193   :  { %6080 = vst [vmem:[#allocation86_spill] sm:$0xff] %v4844_v17  ;;  %6084 = vst [vmem:[#allocation64_spill] sm:$0xff] %v4860_v27  ;;  %v4884_v27 = vmul.f32 %v4464_v49, %v4839_v26  ;;  %v4901_v29 = vmul.f32 %v4474_v40, %v4839_v26  ;;  %v4905_v35 = vmul.f32 %v4477_v1, %v4835_v3  ;;  %v4925_v40 = vstv %s4828_s30 }
 0x194   :  { %6085 = vst [vmem:[#allocation94_spill] sm:$0xff] %v4864_v60  ;;  %v4910_v50 = vmul.f32 %v4477_v1, %v4839_v26  ;;  %6091 = vst [vmem:[#allocation98_spill] sm:$0xff] %v4913_v34  ;;  %v4918_v4 = vadd.f32 %v4406_v46, %v783_v63  ;;  %v4921_v17 = vadd.f32 %v4414_v18, %v784_v45 }
 0x195   :  { %6092 = vst [vmem:[#allocation99_spill] sm:$0xff] %v4925_v40  ;;  %v911_v8 = vmul.f32 %v4489_v37, %v4835_v3  ;;  %v912_v53 = vmul.f32 %v4489_v37, %v4839_v26  ;;  %v4934_v41 = vmul.f32 %v4502_v28, %v4835_v3  ;;  %v4941_v45 = vmul.f32 %v4502_v28, %v4839_v26 }
 0x196   :  { %6090 = vst [vmem:[#allocation47_spill] sm:$0xff] %v4910_v50  ;;  %v4946_v19 = vmul.f32 %v4505_v25, %v4835_v3  ;;  %v4950_v61 = vmul.f32 %v4505_v25, %v4839_v26  ;;  %v4954_v46 = vmul.f32 %v4515_v30, %v4835_v3  ;;  %v4958_v63 = vmul.f32 %v4515_v30, %v4839_v26 }
 0x197   :  { %v1039_v18 = vmul.f32 %v4647_v44, %v4835_v3  ;;  %v1040_v52 = vmul.f32 %v4647_v44, %v4839_v26  ;;  %v4966_v60 = vmul.f32 %v4667_v56, %v4835_v3  ;;  %v4969_v25 = vadd.f32 %v4453_v23, %v911_v8 }
 0x198   :  { %v4972_v28 = vadd.f32 %v4457_v59, %v912_v53  ;;  %v4977_v30 = vmul.f32 %v4667_v56, %v4839_v26  ;;  %v4982_v44 = vmul.f32 %v4691_v9, %v4835_v3  ;;  %v4986_v1 = vmul.f32 %v4691_v9, %v4839_v26 }
 0x199   :  { %v4990_v23 = vmul.f32 %v4707_v21, %v4835_v3  ;;  %v4997_v37 = vmul.f32 %v4707_v21, %v4839_v26  ;;  %v5001_v9 = vadd.f32 %v4521_v47, %v1039_v18  ;;  %v5004_v15 = vadd.f32 %v4525_v14, %v1040_v52 }
 0x19a   :  { %v1167_v50 = vmul.f32 %v4756_v32, %v4835_v3  ;;  %v1168_v52 = vmul.f32 %v4756_v32, %v4839_v26  ;;  %v5030_v34 = vmul.f32 %v4768_v42, %v4839_v26  ;;  %v5038_v39 = vmul.f32 %v4812_v0, %v4835_v3 }
 0x19b   :  { %6093 = vst [vmem:[#allocation100_spill] sm:$0xff] %v4990_v23  ;;  %6094 = vst [vmem:[#allocation101_spill] sm:$0xff] %v4997_v37  ;;  %v6129_v2 = vrot.slane %v4986_v1, 2  ;;  %v6130_v6 = vrot.slane %v4905_v35, 3  ;;  %v6137_v1 = vld [vmem:[#allocation58_spill] sm:$0xff]  ;;  %v6138_v35 = vld [vmem:[#allocation91_spill] sm:$0xff] }
 0x19c   :  { %v5068_v32 = vadd.f32 %v4604_v12, %v1168_v52 }
 0x19e   :  { %6096 = vst [vmem:[#allocation103_spill] sm:$0xff] %v5068_v32 }
 0x1bb   :  { %v1974_v40 = vpop.permute.xlu0 %1973  ;;  %v1976_v56 = vpop.permute.xlu1 %1975 }
 0x1bc   :  { %v1977_v8 = vsel %vm122_vm0, %v1974_v40, %v1976_v56  ;;  %v1978_v53 = vsel %vm122_vm0, %v1976_v56, %v1974_v40  ;;  %v5026_v40 = vmul.f32 %v4768_v42, %v4835_v3  ;;  %v5046_v56 = vmul.f32 %v4847_v13, %v4835_v3 }
 0x1bd   :  { %v5021_v18 = vsel %vm3313_vm1, 0.0, %v1978_v53  ;;  %v5034_v14 = vsel %vm3319_vm2, 0.0, %v1977_v8  ;;  %v5042_v53 = vmul.f32 %v4812_v0, %v4839_v26  ;;  %v5053_v8 = vadd.f32 %v4600_v16, %v1167_v50 }
 0x1be   :  { %6095 = vst [vmem:[#allocation102_spill] sm:$0xff] %v5021_v18  ;;  %v5057_v42 = vmul.f32 %v4847_v13, %v4839_v26  ;;  %v1992_v50 = vmul.f32 %v5034_v14, %v4447_v5  ;;  %v5099_v52 = vmul.f32 %v5034_v14, %v4464_v49 }
 0x1bf   :  { %v774_v47 = vpop.permute.xlu0 %773  ;;  %v776_v21 = vpop.permute.xlu1 %775 }
 0x1c0   :  { %v777_v59 = vsel %vm131_vm3, %v774_v47, %v776_v21  ;;  %v778_v10 = vsel %vm131_vm3, %v776_v21, %v774_v47  ;;  %v1991_v21 = vmul.f32 %v5021_v18, %v4447_v5 }
 0x1c1   :  { %v5061_v0 = vsel %vm3720_vm4, 0.0, %v777_v59  ;;  %v5065_v3 = vsel %vm3726_vm5, 0.0, %v778_v10  ;;  %v5080_v59 = vmul.f32 %v5021_v18, %v4464_v49  ;;  %v6097_v10 = vrot.slane %v4876_v38, 1 }
 0x1c2   :  { %v793_v16 = vmul.f32 %v4546_v22, %v5061_v0  ;;  %v794_v26 = vmul.f32 %v4546_v22, %v5065_v3  ;;  %v823_v12 = vmul.f32 %v4549_v33, %v5061_v0  ;;  %v824_v47 = vmul.f32 %v4549_v33, %v5065_v3 }
 0x1c3   :  { %v5095_v32 = vadd.f32 %v4543_v57, %v1991_v21  ;;  %v921_v57 = vmul.f32 %v4588_v62, %v5061_v0  ;;  %v922_v49 = vmul.f32 %v4588_v62, %v5065_v3  ;;  %v1982_v21 = vpop.permute.xlu0 %1981  ;;  %v1984_v5 = vpop.permute.xlu1 %1983  ;;  %v6099_v38 = vrot.slane %v4374_v36, 1 }
 0x1c4   :  { %v795_v13 = vadd.f32 %v793_v16, %v4918_v4  ;;  %v796_v22 = vadd.f32 %v794_v26, %v4921_v17  ;;  %v6098_v17 = vrot.slane %v4884_v27, 1  ;;  %v5106_v26 = vadd.f32 %v4697_v54, %v1992_v50 }
 0x1c5   :  { %v827_v37 = vrot.slane %v823_v12, 1  ;;  %v828_v23 = vrot.slane %v824_v47, 1  ;;  %v951_v54 = vmul.f32 %v4615_v7, %v5061_v0  ;;  %v952_v50 = vmul.f32 %v4615_v7, %v5065_v3 }
 0x1c6   :  { %v807_v4 = vadd.f32 %v6097_v10, %v795_v13  ;;  %v808_v16 = vadd.f32 %v6098_v17, %v796_v22  ;;  %v6100_v22 = vrot.slane %v4380_v48, 1  ;;  %v859_v12 = vmul.f32 %v4558_v24, %v5061_v0 }
 0x1c7   :  { %v860_v47 = vmul.f32 %v4558_v24, %v5065_v3  ;;  %v923_v10 = vadd.f32 %v921_v57, %v4969_v25  ;;  %v924_v36 = vadd.f32 %v922_v49, %v4972_v28  ;;  %v5129_v48 = vmul.f32 %v4585_v51, %v5061_v0 }
 0x1c8   :  { %v819_v13 = vadd.f32 %v6099_v38, %v807_v4  ;;  %v820_v27 = vadd.f32 %v6100_v22, %v808_v16  ;;  %v987_v16 = vmul.f32 %v4641_v43, %v5061_v0  ;;  %v1985_v38 = vsel %vm131_vm3, %v1982_v21, %v1984_v5 }
 0x1c9   :  { %v1986_v22 = vsel %vm131_vm3, %v1984_v5, %v1982_v21  ;;  %v6101_v18 = vrot.slane %v4934_v41, 1  ;;  %v6102_v28 = vrot.slane %v4941_v45, 1  ;;  %v955_v49 = vrot.slane %v951_v54, 1 }
 0x1ca   :  { %v831_v4 = vadd.f32 %v827_v37, %v819_v13  ;;  %v832_v17 = vadd.f32 %v828_v23, %v820_v27  ;;  %v6103_v23 = vrot.slane %v4897_v55, 2  ;;  %v956_v13 = vrot.slane %v952_v50, 1 }
 0x1cb   :  { %v935_v25 = vadd.f32 %v6101_v18, %v923_v10  ;;  %v936_v37 = vadd.f32 %v6102_v28, %v924_v36  ;;  %v988_v27 = vmul.f32 %v4641_v43, %v5065_v3  ;;  %v6104_v7 = vrot.slane %v4423_v20, 1 }
 0x1cc   :  { %v843_v57 = vadd.f32 %v6103_v23, %v831_v4  ;;  %v1049_v41 = vmul.f32 %v4650_v31, %v5061_v0  ;;  %v1050_v45 = vmul.f32 %v4650_v31, %v5065_v3  ;;  %v6106_v55 = vrot.slane %v4901_v29, 2 }
 0x1cd   :  { %v947_v24 = vadd.f32 %v6104_v7, %v935_v25  ;;  %v948_v5 = vadd.f32 %v6105_v58, %v936_v37  ;;  %v863_v21 = vrot.slane %v859_v12, 2  ;;  %v864_v54 = vrot.slane %v860_v47, 2  ;;  %v6109_v37 = vld [vmem:[#allocation57_spill] sm:$0xff] }
 0x1ce   :  { %v844_v18 = vadd.f32 %v6106_v55, %v832_v17  ;;  %v991_v50 = vrot.slane %v987_v16, 2  ;;  %v1051_v20 = vadd.f32 %v1049_v41, %v5001_v9  ;;  %v1052_v7 = vadd.f32 %v1050_v45, %v5004_v15  ;;  %v6116_v58 = vld [vmem:[#allocation69_spill] sm:$0xff]  ;;  %v6117_v55 = vld [vmem:[#allocation22_spill] sm:$0xff] }
 0x1cf   :  { %v959_v10 = vadd.f32 %v955_v49, %v947_v24  ;;  %v960_v36 = vadd.f32 %v956_v13, %v948_v5  ;;  %v6108_v4 = vrot.slane %v6107_v11, 2  ;;  %v992_v28 = vrot.slane %v988_v27, 2  ;;  %v6119_v11 = vld [vmem:[#allocation41_spill] sm:$0xff] }
 0x1d0   :  { %v1079_v23 = vmul.f32 %v6109_v37, %v5061_v0  ;;  %v1080_v29 = vmul.f32 %v6109_v37, %v5065_v3  ;;  %v6110_v12 = vrot.slane %v4946_v19, 2  ;;  %v6111_v24 = vrot.slane %v4950_v61, 2 }
 0x1d1   :  { %v855_v25 = vadd.f32 %v6108_v4, %v843_v57  ;;  %v6112_v9 = vrot.slane %v4966_v60, 1  ;;  %v6113_v15 = vrot.slane %v4977_v30, 1  ;;  %v6114_v57 = vld [vmem:[#allocation28_spill] sm:$0xff]  ;;  %v1023_v5 = vmul.f32 %v6116_v58, %v5061_v0  ;;  %v6121_v4 = vld [vmem:[#allocation37_spill] sm:$0xff] }
 0x1d2   :  { %v971_v47 = vadd.f32 %v6110_v12, %v959_v10  ;;  %v972_v17 = vadd.f32 %v6111_v24, %v960_v36  ;;  %v6115_v13 = vrot.slane %v6114_v57, 2  ;;  %v1083_v41 = vrot.slane %v1079_v23, 1  ;;  %v6123_v12 = vld [vmem:[#allocation36_spill] sm:$0xff] }
 0x1d3   :  { %v1063_v16 = vadd.f32 %v6112_v9, %v1051_v20  ;;  %v1064_v49 = vadd.f32 %v6113_v15, %v1052_v7  ;;  %v1084_v45 = vrot.slane %v1080_v29, 1  ;;  %v6118_v19 = vrot.slane %v6117_v55, 2  ;;  %v6125_v9 = vld [vmem:[#allocation55_spill] sm:$0xff] }
 0x1d4   :  { %v856_v27 = vadd.f32 %v6115_v13, %v844_v18  ;;  %v6120_v61 = vrot.slane %v6119_v11, 2  ;;  %v6122_v60 = vrot.slane %v6121_v4, 1  ;;  %v6124_v30 = vrot.slane %v6123_v12, 1 }
 0x1d5   :  { %v983_v10 = vadd.f32 %v6118_v19, %v971_v47  ;;  %v867_v24 = vadd.f32 %v863_v21, %v855_v25  ;;  %v1024_v18 = vmul.f32 %v6116_v58, %v5065_v3  ;;  %v1115_v23 = vmul.f32 %v6125_v9, %v5061_v0 }
 0x1d6   :  { %v984_v36 = vadd.f32 %v6120_v61, %v972_v17  ;;  %v1075_v20 = vadd.f32 %v6122_v60, %v1063_v16  ;;  %v1076_v7 = vadd.f32 %v6124_v30, %v1064_v49  ;;  %v1116_v29 = vmul.f32 %v6125_v9, %v5065_v3  ;;  %v6133_v61 = vld [vmem:[#allocation45_spill] sm:$0xff] }
 0x1d7   :  { %v995_v47 = vadd.f32 %v991_v50, %v983_v10  ;;  %v5191_v16 = vsel %vm3720_vm4, 0.0, %v1985_v38  ;;  %v5195_v21 = vsel %vm3726_vm5, 0.0, %v1986_v22  ;;  %v868_v25 = vadd.f32 %v864_v54, %v856_v27  ;;  %v6131_v10 = vld [vmem:[#allocation50_spill] sm:$0xff] }
 0x1d8   :  { %v996_v15 = vadd.f32 %v992_v28, %v984_v36  ;;  %v1087_v57 = vadd.f32 %v1083_v41, %v1075_v20  ;;  %v1088_v17 = vadd.f32 %v1084_v45, %v1076_v7  ;;  %v896_v49 = vmul.f32 %v4585_v51, %v5065_v3 }
 0x1d9   :  { %v6126_v13 = vrot.slane %v4954_v46, 3  ;;  %v6127_v50 = vrot.slane %v4958_v63, 3  ;;  %v6128_v41 = vrot.slane %v4982_v44, 2  ;;  %v879_v22 = vadd.f32 %v6130_v6, %v867_v24  ;;  %v6135_v44 = vld [vmem:[#allocation47_spill] sm:$0xff] }
 0x1da   :  { %v1100_v38 = vadd.f32 %v6129_v2, %v1088_v17  ;;  %v899_v54 = vrot.slane %v5129_v48, 3  ;;  %v1027_v27 = vrot.slane %v1023_v5, 3  ;;  %v1028_v19 = vrot.slane %v1024_v18, 3  ;;  %v6139_v5 = vld [vmem:[#allocation42_spill] sm:$0xff] }
 0x1db   :  { %v1007_v55 = vadd.f32 %v6126_v13, %v995_v47  ;;  %v1008_v28 = vadd.f32 %v6127_v50, %v996_v15  ;;  %v1099_v45 = vadd.f32 %v6128_v41, %v1087_v57  ;;  %v6132_v11 = vrot.slane %v6131_v10, 2  ;;  %v6141_v47 = vld [vmem:[#allocation29_spill] sm:$0xff]  ;;  %v6144_v50 = vld [vmem:[#allocation80_spill] sm:$0xff]  ;;  %v6145_v2 = vld [vmem:[#allocation26_spill] sm:$0xff] }
 0x1dc   :  { %v6134_v36 = vrot.slane %v6133_v61, 2  ;;  %v1119_v4 = vrot.slane %v1115_v23, 2  ;;  %v1120_v60 = vrot.slane %v1116_v29, 2  ;;  %v6136_v20 = vrot.slane %v6135_v44, 3  ;;  %v6147_v10 = vld [vmem:[#allocation100_spill] sm:$0xff]  ;;  %v6149_v61 = vld [vmem:[#allocation101_spill] sm:$0xff] }
 0x1dd   :  { %v1111_v46 = vadd.f32 %v6132_v11, %v1099_v45  ;;  %v1151_v30 = vmul.f32 %v6137_v1, %v5061_v0  ;;  %v1177_v7 = vmul.f32 %v6138_v35, %v5061_v0  ;;  %v1178_v48 = vmul.f32 %v6138_v35, %v5065_v3 }
 0x1de   :  { %v1112_v63 = vadd.f32 %v6134_v36, %v1100_v38  ;;  %v880_v12 = vadd.f32 %v6136_v20, %v868_v25  ;;  %v6140_v24 = vrot.slane %v6139_v5, 3  ;;  %v6142_v15 = vrot.slane %v6141_v47, 3  ;;  %v6143_v25 = vld [vmem:[#allocation103_spill] sm:$0xff]  ;;  %v6151_v36 = vld [vmem:[#allocation21_spill] sm:$0xff] }
 0x1df   :  { %v1123_v23 = vadd.f32 %v1119_v4, %v1111_v46  ;;  %v1179_v17 = vadd.f32 %v1177_v7, %v5053_v8  ;;  %v1180_v13 = vadd.f32 %v1178_v48, %v6143_v25  ;;  %v1207_v41 = vmul.f32 %v6144_v50, %v5061_v0 }
 0x1e0   :  { %v1019_v18 = vadd.f32 %v6140_v24, %v1007_v55  ;;  %v1020_v57 = vadd.f32 %v6142_v15, %v1008_v28  ;;  %v1124_v29 = vadd.f32 %v1120_v60, %v1112_v63  ;;  %v1208_v45 = vmul.f32 %v6144_v50, %v5065_v3  ;;  %v6155_v24 = vld [vmem:[#allocation54_spill] sm:$0xff] }
 0x1e1   :  { %v6146_v38 = vrot.slane %v6145_v2, 3  ;;  %v6148_v55 = vrot.slane %v6147_v10, 3  ;;  %v6150_v28 = vrot.slane %v6149_v61, 3  ;;  %v1152_v8 = vmul.f32 %v6137_v1, %v5065_v3  ;;  %v6159_v2 = vld [vmem:[#allocation38_spill] sm:$0xff] }
 0x1e2   :  { %v6152_v63 = vrot.slane %v6151_v36, 3  ;;  %v1155_v60 = vrot.slane %v1151_v30, 3  ;;  %v6153_v44 = vrot.slane %v5026_v40, 1  ;;  %v6154_v7 = vrot.slane %v5030_v34, 1  ;;  %v6163_v34 = vld [vmem:[#allocation97_spill] sm:$0xff] }
 0x1e3   :  { %v891_v6 = vadd.f32 %v6146_v38, %v879_v22  ;;  %v1135_v11 = vadd.f32 %v6148_v55, %v1123_v23  ;;  %v1136_v46 = vadd.f32 %v6150_v28, %v1124_v29  ;;  %v1031_v22 = vadd.f32 %v1027_v27, %v1019_v18  ;;  %v6157_v23 = vld [vmem:[#allocation31_spill] sm:$0xff]  ;;  %v6161_v55 = vld [vmem:[#allocation56_spill] sm:$0xff]  ;;  %v6164_v36 = vld [vmem:[#allocation61_spill] sm:$0xff] }
 0x1e4   :  { %v892_v4 = vadd.f32 %v6152_v63, %v880_v12  ;;  %v1191_v20 = vadd.f32 %v6153_v44, %v1179_v17  ;;  %v1192_v48 = vadd.f32 %v6154_v7, %v1180_v13  ;;  %v1032_v5 = vadd.f32 %v1028_v19, %v1020_v57  ;;  %v6167_v7 = vld [vmem:[#allocation51_spill] sm:$0xff] }
 0x1e5   :  { %v6156_v47 = vrot.slane %v6155_v24, 3  ;;  %v6158_v29 = vrot.slane %v6157_v23, 3  ;;  %v6160_v38 = vrot.slane %v6159_v2, 1  ;;  %v6162_v12 = vrot.slane %v6161_v55, 1  ;;  %v6169_v24 = vld [vmem:[#allocation98_spill] sm:$0xff]  ;;  %v6172_v23 = vld [vmem:[#allocation75_spill] sm:$0xff] }
 0x1e6   :  { %v1211_v61 = vrot.slane %v1207_v41, 1  ;;  %v1212_v40 = vrot.slane %v1208_v45, 1  ;;  %v900_v17 = vrot.slane %v896_v49, 3  ;;  %v1156_v28 = vrot.slane %v1152_v8, 3 }
 0x1e7   :  { %v1147_v15 = vadd.f32 %v6156_v47, %v1135_v11  ;;  %v1148_v25 = vadd.f32 %v6158_v29, %v1136_v46  ;;  %v1203_v10 = vadd.f32 %v6160_v38, %v1191_v20  ;;  %v1204_v30 = vadd.f32 %v6162_v12, %v1192_v48  ;;  %v6170_v47 = vld [vmem:[#allocation74_spill] sm:$0xff] }
 0x1e8   :  { %v1243_v27 = vmul.f32 %v6163_v34, %v5061_v0  ;;  %v1244_v19 = vmul.f32 %v6163_v34, %v5065_v3  ;;  %v903_v18 = vadd.f32 %v899_v54, %v891_v6  ;;  %v904_v46 = vadd.f32 %v900_v17, %v892_v4  ;;  %v6168_v4 = vld [vmem:[#allocation66_spill] sm:$0xff] }
 0x1e9   :  { %v1159_v57 = vadd.f32 %v1155_v60, %v1147_v15  ;;  %v1215_v13 = vadd.f32 %v1211_v61, %v1203_v10  ;;  %v1216_v11 = vadd.f32 %v1212_v40, %v1204_v30  ;;  %v1035_v63 = vadd.f32 %v6164_v36, %v1031_v22  ;;  %v6175_v17 = vld [vmem:[#allocation62_spill] sm:$0xff] }
 0x1ea   :  { %v1036_v44 = vadd.f32 %v6164_v36, %v1032_v5  ;;  %v1160_v20 = vadd.f32 %v1156_v28, %v1148_v25  ;;  %v6165_v41 = vrot.slane %v5038_v39, 2  ;;  %v6166_v45 = vrot.slane %v5042_v53, 2 }
 0x1eb   :  { %v2001_v48 = vmul.f32 %v5191_v16, %v6167_v7  ;;  %v2002_v54 = vmul.f32 %v5195_v21, %v6167_v7  ;;  %v1247_v6 = vrot.slane %v1243_v27, 2  ;;  %v1248_v60 = vrot.slane %v1244_v19, 2  ;;  %v6182_v7 = vld [vmem:[#allocation52_spill] sm:$0xff] }
 0x1ec   :  { %v1227_v49 = vadd.f32 %v6165_v41, %v1215_v13  ;;  %v1228_v8 = vadd.f32 %v6166_v45, %v1216_v11  ;;  %v1279_v22 = vmul.f32 %v6168_v4, %v5061_v0  ;;  %v1280_v5 = vmul.f32 %v6168_v4, %v5065_v3 }
 0x1ed   :  { %v1163_v39 = vadd.f32 %v6169_v24, %v1159_v57  ;;  %v6171_v15 = vrot.slane %v6170_v47, 2  ;;  %v6173_v29 = vrot.slane %v6172_v23, 2  ;;  %v2003_v2 = vadd.f32 %v2001_v48, %v5095_v32 }
 0x1ee   :  { %v1164_v38 = vadd.f32 %v6169_v24, %v1160_v20  ;;  %v1295_v10 = vrot.slane %v1035_v63, 7  ;;  %v1296_v55 = vrot.slane %v1036_v44, 7  ;;  %v2012_v12 = vrot.slane %v5099_v52, 1 }
 0x1ef   :  { %v1239_v53 = vadd.f32 %v6171_v15, %v1227_v49  ;;  %v1240_v25 = vadd.f32 %v6173_v29, %v1228_v8  ;;  %v2004_v3 = vadd.f32 %v2002_v54, %v5106_v26  ;;  %v6174_v61 = vrot.slane %v5080_v59, 1 }
 0x1f0   :  { %v907_v28 = vadd.f32 %v6175_v17, %v903_v18  ;;  %v908_v27 = vadd.f32 %v6175_v17, %v904_v46  ;;  %v1283_v19 = vrot.slane %v1279_v22, 3  ;;  %v1284_v57 = vrot.slane %v1280_v5, 3  ;;  %v6178_v46 = vld [vmem:[#allocation49_spill] sm:$0xff] }
 0x1f1   :  { %v1251_v0 = vadd.f32 %v1247_v6, %v1239_v53  ;;  %v1252_v30 = vadd.f32 %v1248_v60, %v1240_v25  ;;  %v2015_v40 = vadd.f32 %v6174_v61, %v2003_v2  ;;  %v6176_v32 = vrot.slane %v5046_v56, 3  ;;  %v6180_v56 = vld [vmem:[#allocation68_spill] sm:$0xff]  ;;  %v6184_v6 = vld [vmem:[#allocation35_spill] sm:$0xff]  ;;  %v6185_v60 = vld [vmem:[#allocation102_spill] sm:$0xff] }
 0x1f2   :  { %v6177_v11 = vrot.slane %v5057_v42, 3  ;;  %v1301_v52 = vrot.slane %v1163_v39, 6  ;;  %v2031_v44 = vmul.f32 %v5191_v16, %v4549_v33  ;;  %v1302_v26 = vrot.slane %v1164_v38, 6  ;;  %v6186_v39 = vld [vmem:[#allocation32_spill] sm:$0xff] }
 0x1f3   :  { %v1263_v13 = vadd.f32 %v6176_v32, %v1251_v0  ;;  %v1311_v59 = vsel %vm754_vm6, %v907_v28, %v1295_v10  ;;  %v1312_v20 = vsel %vm754_vm6, %v908_v27, %v1296_v55  ;;  %v2032_v18 = vmul.f32 %v5195_v21, %v4549_v33  ;;  %v6187_v38 = vld [vmem:[#allocation40_spill] sm:$0xff]  ;;  %v6191_v27 = vld [vmem:[#allocation79_spill] sm:$0xff] }
 0x1f4   :  { %v1264_v63 = vadd.f32 %v6177_v11, %v1252_v30  ;;  %v6179_v41 = vrot.slane %v6178_v46, 3  ;;  %v6181_v45 = vrot.slane %v6180_v56, 3  ;;  %v2016_v42 = vadd.f32 %v2012_v12, %v2004_v3  ;;  %v6188_v12 = vld [vmem:[#allocation99_spill] sm:$0xff]  ;;  %v6189_v3 = vld [vmem:[#allocation88_spill] sm:$0xff] }
 0x1f5   :  { %v6183_v48 = vrot.slane %v6182_v7, 1  ;;  %v2043_v22 = vmul.f32 %v6185_v60, %v6184_v6  ;;  %v2044_v5 = vmul.f32 %v5034_v14, %v6184_v6  ;;  %v5307_v47 = vmul.f32 %v6185_v60, %v6186_v39  ;;  %v6194_v7 = vld [vmem:[#allocation19_spill] sm:$0xff] }
 0x1f6   :  { %v1275_v49 = vadd.f32 %v6179_v41, %v1263_v13  ;;  %v1276_v8 = vadd.f32 %v6181_v45, %v1264_v63  ;;  %v5311_v33 = vmul.f32 %v5034_v14, %v6186_v39  ;;  %v1313_v23 = vsel %vm757_vm7, %v1311_v59, %v1301_v52 }
 0x1f7   :  { %v2027_v54 = vadd.f32 %v6183_v48, %v2015_v40  ;;  %v2035_v29 = vrot.slane %v2031_v44, 1  ;;  %v1314_v25 = vsel %vm757_vm7, %v1312_v20, %v1302_v26  ;;  %v2036_v2 = vrot.slane %v2032_v18, 1  ;;  %v6193_v18 = vld [vmem:[#allocation23_spill] sm:$0xff] }
 0x1f8   :  { %v1287_v15 = vadd.f32 %v1283_v19, %v1275_v49  ;;  %v1288_v53 = vadd.f32 %v1284_v57, %v1276_v8  ;;  %v2119_v10 = vmul.f32 %v6185_v60, %v6187_v38  ;;  %v2120_v55 = vmul.f32 %v5034_v14, %v6187_v38  ;;  %v6192_v57 = vld [vmem:[#allocation82_spill] sm:$0xff] }
 0x1f9   :  { %v6190_v61 = vrot.slane %v6189_v3, 1  ;;  %v2039_v28 = vadd.f32 %v2035_v29, %v2027_v54  ;;  %v2129_v13 = vmul.f32 %v5191_v16, %v4588_v62  ;;  %v2130_v11 = vmul.f32 %v5195_v21, %v4588_v62 }
 0x1fa   :  { %v1291_v0 = vadd.f32 %v6188_v12, %v1287_v15  ;;  %v1292_v30 = vadd.f32 %v6188_v12, %v1288_v53  ;;  %v2125_v19 = vadd.f32 %v6191_v27, %v2119_v10  ;;  %v2126_v32 = vadd.f32 %v6192_v57, %v2120_v55  ;;  %v6196_v15 = vld [vmem:[#allocation48_spill] sm:$0xff]  ;;  %v6197_v55 = vld [vmem:[#allocation33_spill] sm:$0xff] }
 0x1fb   :  { %v2028_v40 = vadd.f32 %v6190_v61, %v2016_v42  ;;  %v2047_v44 = vrot.slane %v2043_v22, 2  ;;  %v2048_v26 = vrot.slane %v2044_v5, 2  ;;  %v2135_v46 = vmul.f32 %v6185_v60, %v6193_v18  ;;  %v2767_v42 = vld [vmem:[#allocation2] sm:$0xff]  ;;  %v6195_v22 = vld [vmem:[#allocation43_spill] sm:$0xff]  ;;  %v6201_v57 = vld [vmem:[#allocation93_spill] sm:$0xff] }
 0x1fc   :  { %v1307_v63 = vrot.slane %v1291_v0, 5  ;;  %v1308_v52 = vrot.slane %v1292_v30, 5  ;;  %v2131_v59 = vadd.f32 %v2129_v13, %v2125_v19  ;;  %v2132_v20 = vadd.f32 %v2130_v11, %v2126_v32  ;;  %v6203_v11 = vld [vmem:[#allocation24_spill] sm:$0xff] }
 0x1fd   :  { %v2136_v41 = vmul.f32 %v5034_v14, %v6193_v18  ;;  %v2040_v45 = vadd.f32 %v2036_v2, %v2028_v40  ;;  %v2051_v8 = vadd.f32 %v2047_v44, %v2039_v28  ;;  %v2139_v54 = vrot.slane %v2135_v46, 1  ;;  %v6199_v28 = vld [vmem:[#allocation92_spill] sm:$0xff] }
 0x1fe   :  { %v1315_v49 = vsel %vm760_vm8, %v1313_v23, %v1307_v63  ;;  %v1316_v56 = vsel %vm760_vm8, %v1314_v25, %v1308_v52  ;;  %v2067_v5 = vmul.f32 %v5191_v16, %v6195_v22  ;;  %v2068_v39 = vmul.f32 %v5195_v21, %v6195_v22 }
 0x1ff   :  { %v1317_v62 = vadd.f32 %v2767_v42, %v1315_v49  ;;  %v1318_v48 = vadd.f32 %v1316_v56, %v6194_v7  ;;  %v2140_v6 = vrot.slane %v2136_v41, 1  ;;  %v2159_v53 = vmul.f32 %v5191_v16, %v6196_v15 }
 0x200   :  { %v2160_v23 = vmul.f32 %v5195_v21, %v6196_v15  ;;  %v2143_v2 = vadd.f32 %v2139_v54, %v2131_v59  ;;  %v2052_v10 = vadd.f32 %v2048_v26, %v2040_v45  ;;  %v6198_v0 = vrot.slane %v6197_v55, 2  ;;  %v6208_v15 = vld [vmem:[#allocation34_spill] sm:$0xff]  ;;  %v6212_v55 = vld [vmem:[#allocation65_spill] sm:$0xff] }
 0x201   :  { %v1319_v29 = vmax.f32 %v1317_v62, 0.0  ;;  %v1320_v25 = vmax.f32 %v1318_v48, 0.0  ;;  %v2144_v38 = vadd.f32 %v2140_v6, %v2132_v20  ;;  %v2163_v3 = vrot.slane %v2159_v53, 1 }
 0x202   :  { %v2063_v30 = vadd.f32 %v6198_v0, %v2051_v8  ;;  %v2164_v61 = vrot.slane %v2160_v23, 1  ;;  %v6200_v27 = vrot.slane %v6199_v28, 1  ;;  %v6202_v32 = vrot.slane %v6201_v57, 1  ;;  %v6204_v8 = vld [vmem:[#allocation76_spill] sm:$0xff] }
 0x203   :  { %v1323_v40 = vcombine.low %v1319_v29, %v1320_v25  ;;  %v2171_v63 = vmul.f32 %v6185_v60, %v6203_v11  ;;  %v2071_v52 = vrot.slane %v2067_v5, 2  ;;  %v2083_v44 = vrot.slane %v5307_v47, 3 }
 0x204   :  { %v2155_v19 = vadd.f32 %v6200_v27, %v2143_v2  ;;  %v2156_v13 = vadd.f32 %v6202_v32, %v2144_v38  ;;  %v2172_v26 = vmul.f32 %v5034_v14, %v6203_v11  ;;  %v2195_v59 = vmul.f32 %v5191_v16, %v4641_v43  ;;  %v6210_v2 = vld [vmem:[#allocation78_spill] sm:$0xff]  ;;  %v6214_v27 = vld [vmem:[#allocation89_spill] sm:$0xff] }
 0x205   :  { %1325 = vst [vmem:[#allocation12] sm:$0xff] %v1323_v40  ;;  %v2175_v46 = vrot.slane %v2171_v63, 2  ;;  %v2196_v41 = vmul.f32 %v5195_v21, %v4641_v43  ;;  %v2072_v49 = vrot.slane %v2068_v39, 2  ;;  %v2084_v56 = vrot.slane %v5311_v33, 3  ;;  %v6206_v43 = vld [vmem:[#allocation44_spill] sm:$0xff]  ;;  %v6207_v33 = vld [vmem:[#allocation53_spill] sm:$0xff] }
 0x206   :  { %v2167_v20 = vadd.f32 %v2163_v3, %v2155_v19  ;;  %v2168_v18 = vadd.f32 %v2164_v61, %v2156_v13  ;;  %v5362_v45 = vmul.f32 %v5191_v16, %v4585_v51  ;;  %v2176_v47 = vrot.slane %v2172_v26, 2  ;;  %v6213_v40 = vld [vmem:[#allocation63_spill] sm:$0xff] }
 0x207   :  { %v6205_v42 = vrot.slane %v6204_v8, 2  ;;  %v2075_v7 = vadd.f32 %v2071_v52, %v2063_v30  ;;  %v5368_v48 = vmul.f32 %v5195_v21, %v4585_v51  ;;  %v2199_v22 = vrot.slane %v2195_v59, 2 }
 0x208   :  { %v2179_v54 = vadd.f32 %v2175_v46, %v2167_v20  ;;  %v2180_v6 = vadd.f32 %v2176_v47, %v2168_v18  ;;  %v2207_v5 = vmul.f32 %v6185_v60, %v6206_v43  ;;  %v2247_v39 = vmul.f32 %v6185_v60, %v6207_v33 }
 0x209   :  { %v2064_v62 = vadd.f32 %v6205_v42, %v2052_v10  ;;  %v6209_v53 = vrot.slane %v6208_v15, 2  ;;  %v2200_v29 = vrot.slane %v2196_v41, 2  ;;  %v2208_v25 = vmul.f32 %v5034_v14, %v6206_v43  ;;  %v6215_v42 = vld [vmem:[#allocation70_spill] sm:$0xff]  ;;  %v6216_v15 = vld [vmem:[#allocation60_spill] sm:$0xff] }
 0x20a   :  { %v2248_v51 = vmul.f32 %v5034_v14, %v6207_v33  ;;  %v6211_v38 = vrot.slane %v6210_v2, 2  ;;  %v2253_v0 = vadd.f32 %v6212_v55, %v2247_v39  ;;  %v2257_v30 = vmul.f32 %v5191_v16, %v4650_v31 }
 0x20b   :  { %v2191_v23 = vadd.f32 %v6209_v53, %v2179_v54  ;;  %v2258_v3 = vmul.f32 %v5195_v21, %v4650_v31  ;;  %v2107_v61 = vrot.slane %v5362_v45, 3  ;;  %v2263_v19 = vmul.f32 %v6185_v60, %v6214_v27 }
 0x20c   :  { %v2192_v10 = vadd.f32 %v6211_v38, %v2180_v6  ;;  %v2254_v28 = vadd.f32 %v6213_v40, %v2248_v51  ;;  %v2264_v57 = vmul.f32 %v5034_v14, %v6214_v27  ;;  %v2259_v11 = vadd.f32 %v2257_v30, %v2253_v0  ;;  %v6220_v51 = vld [vmem:[#allocation27_spill] sm:$0xff]  ;;  %v6221_v30 = vld [vmem:[#allocation30_spill] sm:$0xff] }
 0x20d   :  { %v2203_v32 = vadd.f32 %v2199_v22, %v2191_v23  ;;  %v2287_v63 = vmul.f32 %v5191_v16, %v6109_v37  ;;  %v2267_v26 = vrot.slane %v2263_v19, 1  ;;  %v2288_v31 = vmul.f32 %v5195_v21, %v6109_v37 }
 0x20e   :  { %v2204_v13 = vadd.f32 %v2200_v29, %v2192_v10  ;;  %v2260_v52 = vadd.f32 %v2258_v3, %v2254_v28  ;;  %v2268_v59 = vrot.slane %v2264_v57, 1  ;;  %v2076_v20 = vadd.f32 %v2072_v49, %v2064_v62  ;;  %v6223_v28 = vld [vmem:[#allocation39_spill] sm:$0xff] }
 0x20f   :  { %v2087_v18 = vadd.f32 %v2083_v44, %v2075_v7  ;;  %v2211_v46 = vrot.slane %v2207_v5, 3  ;;  %v2212_v41 = vrot.slane %v2208_v25, 3  ;;  %v2271_v47 = vadd.f32 %v2267_v26, %v2259_v11  ;;  %v6218_v44 = vld [vmem:[#allocation72_spill] sm:$0xff] }
 0x210   :  { %v2272_v8 = vadd.f32 %v2268_v59, %v2260_v52  ;;  %v2299_v54 = vmul.f32 %v6185_v60, %v6215_v42  ;;  %v2300_v6 = vmul.f32 %v5034_v14, %v6215_v42  ;;  %v2231_v33 = vmul.f32 %v5191_v16, %v6116_v58  ;;  %v6230_v42 = vld [vmem:[#allocation64_spill] sm:$0xff] }
 0x211   :  { %v2215_v22 = vadd.f32 %v2211_v46, %v2203_v32  ;;  %v2216_v43 = vadd.f32 %v2212_v41, %v2204_v13  ;;  %v2291_v39 = vrot.slane %v2287_v63, 1  ;;  %v6217_v37 = vrot.slane %v6216_v15, 1  ;;  %v6225_v13 = vld [vmem:[#allocation90_spill] sm:$0xff]  ;;  %v6228_v41 = vld [vmem:[#allocation81_spill] sm:$0xff] }
 0x212   :  { %v6219_v62 = vrot.slane %v6218_v44, 1  ;;  %v2292_v5 = vrot.slane %v2288_v31, 1  ;;  %v2323_v53 = vmul.f32 %v5191_v16, %v6125_v9  ;;  %v2088_v23 = vadd.f32 %v2084_v56, %v2076_v20  ;;  %v6226_v31 = vld [vmem:[#allocation73_spill] sm:$0xff] }
 0x213   :  { %v2283_v49 = vadd.f32 %v6217_v37, %v2271_v47  ;;  %v2232_v29 = vmul.f32 %v5195_v21, %v6116_v58  ;;  %v2324_v25 = vmul.f32 %v5195_v21, %v6125_v9  ;;  %v2335_v2 = vmul.f32 %v6185_v60, %v6220_v51 }
 0x214   :  { %v2284_v7 = vadd.f32 %v6219_v62, %v2272_v8  ;;  %v2303_v55 = vrot.slane %v2299_v54, 2  ;;  %v2304_v0 = vrot.slane %v2300_v6, 2  ;;  %v6222_v3 = vrot.slane %v6221_v30, 3 }
 0x215   :  { %v2295_v38 = vadd.f32 %v2291_v39, %v2283_v49  ;;  %v6224_v27 = vrot.slane %v6223_v28, 3  ;;  %v2235_v56 = vrot.slane %v2231_v33, 3  ;;  %v2336_v58 = vmul.f32 %v5034_v14, %v6220_v51  ;;  %v6232_v39 = vld [vmem:[#allocation83_spill] sm:$0xff] }
 0x216   :  { %v2296_v10 = vadd.f32 %v2292_v5, %v2284_v7  ;;  %v2227_v40 = vadd.f32 %v6222_v3, %v2215_v22  ;;  %v2327_v9 = vrot.slane %v2323_v53, 2  ;;  %v2375_v11 = vmul.f32 %v6185_v60, %v6225_v13 }
 0x217   :  { %v2228_v19 = vadd.f32 %v6224_v27, %v2216_v43  ;;  %v2307_v57 = vadd.f32 %v2303_v55, %v2295_v38  ;;  %v2328_v63 = vrot.slane %v2324_v25, 2  ;;  %v2339_v52 = vrot.slane %v2335_v2, 3  ;;  %v6231_v43 = vld [vmem:[#allocation67_spill] sm:$0xff] }
 0x218   :  { %v2308_v32 = vadd.f32 %v2304_v0, %v2296_v10  ;;  %v2376_v26 = vmul.f32 %v5034_v14, %v6225_v13  ;;  %v2385_v59 = vmul.f32 %v5191_v16, %v6138_v35  ;;  %v6227_v20 = vrot.slane %v6226_v31, 2  ;;  %v6233_v10 = vld [vmem:[#allocation96_spill] sm:$0xff]  ;;  %v6234_v0 = vld [vmem:[#allocation77_spill] sm:$0xff] }
 0x219   :  { %v6229_v47 = vrot.slane %v6228_v41, 2  ;;  %v2381_v54 = vadd.f32 %v6230_v42, %v2375_v11  ;;  %v2386_v6 = vmul.f32 %v5195_v21, %v6138_v35  ;;  %v2340_v22 = vrot.slane %v2336_v58, 3  ;;  %v6240_v31 = vld [vmem:[#allocation84_spill] sm:$0xff]  ;;  %v6242_v41 = vld [vmem:[#allocation85_spill] sm:$0xff] }
 0x21a   :  { %v2319_v46 = vadd.f32 %v6227_v20, %v2307_v57  ;;  %v2382_v33 = vadd.f32 %v6231_v43, %v2376_v26  ;;  %v2391_v15 = vmul.f32 %v6185_v60, %v6232_v39  ;;  %v2392_v37 = vmul.f32 %v5034_v14, %v6232_v39 }
 0x21b   :  { %v2320_v8 = vadd.f32 %v6229_v47, %v2308_v32  ;;  %v2387_v62 = vadd.f32 %v2385_v59, %v2381_v54  ;;  %v2415_v7 = vmul.f32 %v5191_v16, %v6144_v50  ;;  %v2416_v35 = vmul.f32 %v5195_v21, %v6144_v50 }
 0x21c   :  { %v2331_v49 = vadd.f32 %v2327_v9, %v2319_v46  ;;  %v2388_v5 = vadd.f32 %v2386_v6, %v2382_v33  ;;  %v2395_v53 = vrot.slane %v2391_v15, 1  ;;  %v2396_v25 = vrot.slane %v2392_v37, 1  ;;  %v6244_v6 = vld [vmem:[#allocation71_spill] sm:$0xff] }
 0x21d   :  { %v2332_v44 = vadd.f32 %v2328_v63, %v2320_v8  ;;  %v2236_v51 = vrot.slane %v2232_v29, 3  ;;  %v2427_v55 = vmul.f32 %v6185_v60, %v6233_v10  ;;  %v6235_v30 = vrot.slane %v6234_v0, 3  ;;  %v6236_v29 = vld [vmem:[#allocation86_spill] sm:$0xff]  ;;  %v6238_v63 = vld [vmem:[#allocation59_spill] sm:$0xff] }
 0x21e   :  { %v2343_v2 = vadd.f32 %v2339_v52, %v2331_v49  ;;  %v2399_v28 = vadd.f32 %v2395_v53, %v2387_v62  ;;  %v2400_v27 = vadd.f32 %v2396_v25, %v2388_v5  ;;  %v2428_v58 = vmul.f32 %v5034_v14, %v6233_v10  ;;  %v6246_v15 = vld [vmem:[#allocation87_spill] sm:$0xff] }
 0x21f   :  { %v2344_v38 = vadd.f32 %v2340_v22, %v2332_v44  ;;  %v2099_v3 = vadd.f32 %v6235_v30, %v2087_v18  ;;  %v2239_v57 = vadd.f32 %v2235_v56, %v2227_v40  ;;  %v2240_v32 = vadd.f32 %v2236_v51, %v2228_v19 }
 0x220   :  { %v2359_v9 = vmul.f32 %v5191_v16, %v6137_v1  ;;  %v2360_v50 = vmul.f32 %v5195_v21, %v6137_v1  ;;  %v6237_v13 = vrot.slane %v6236_v29, 1  ;;  %v6239_v52 = vrot.slane %v6238_v63, 1  ;;  %v6252_v29 = vld [vmem:[#allocation46_spill] sm:$0xff] }
 0x221   :  { %v2419_v18 = vrot.slane %v2415_v7, 1  ;;  %v2420_v59 = vrot.slane %v2416_v35, 1  ;;  %v6241_v20 = vrot.slane %v6240_v31, 3  ;;  %v6243_v40 = vrot.slane %v6242_v41, 3  ;;  %v6247_v35 = vld [vmem:[#allocation94_spill] sm:$0xff] }
 0x222   :  { %v2411_v11 = vadd.f32 %v6237_v13, %v2399_v28  ;;  %v2412_v26 = vadd.f32 %v6239_v52, %v2400_v27  ;;  %v2431_v56 = vrot.slane %v2427_v55, 2  ;;  %v2451_v47 = vmul.f32 %v5191_v16, %v6163_v34 }
 0x223   :  { %v2355_v46 = vadd.f32 %v6241_v20, %v2343_v2  ;;  %v2356_v19 = vadd.f32 %v6243_v40, %v2344_v38  ;;  %v2432_v42 = vrot.slane %v2428_v58, 2  ;;  %v2452_v54 = vmul.f32 %v5195_v21, %v6163_v34  ;;  %v6249_v2 = vld [vmem:[#allocation95_spill] sm:$0xff] }
 0x224   :  { %v2423_v8 = vadd.f32 %v2419_v18, %v2411_v11  ;;  %v2424_v1 = vadd.f32 %v2420_v59, %v2412_v26  ;;  %v6245_v22 = vrot.slane %v6244_v6, 3  ;;  %v2363_v33 = vrot.slane %v2359_v9, 3  ;;  %v6251_v9 = vld [vmem:[#allocation20_spill] sm:$0xff]  ;;  %v6253_v6 = vld [vmem:[#allocation18_spill] sm:$0xff] }
 0x225   :  { %v2364_v39 = vrot.slane %v2360_v50, 3  ;;  %v2463_v37 = vmul.f32 %v6185_v60, %v6246_v15  ;;  %v2108_v49 = vrot.slane %v5368_v48, 3  ;;  %v2464_v7 = vmul.f32 %v5034_v14, %v6246_v15 }
 0x226   :  { %v2100_v43 = vadd.f32 %v6245_v22, %v2088_v23  ;;  %v2435_v44 = vadd.f32 %v2431_v56, %v2423_v8  ;;  %v2436_v62 = vadd.f32 %v2432_v42, %v2424_v1  ;;  %v2243_v5 = vadd.f32 %v2239_v57, %v6164_v36  ;;  %v2768_v42 = vld [vmem:[#allocation2 + $0x8] sm:$0xff] }
 0x227   :  { %v2244_v53 = vadd.f32 %v2240_v32, %v6164_v36  ;;  %v2367_v34 = vadd.f32 %v2363_v33, %v2355_v46  ;;  %v2368_v25 = vadd.f32 %v2364_v39, %v2356_v19  ;;  %v6248_v23 = vrot.slane %v6247_v35, 2 }
 0x228   :  { %v6250_v38 = vrot.slane %v6249_v2, 2  ;;  %v2455_v60 = vrot.slane %v2451_v47, 2  ;;  %v2456_v55 = vrot.slane %v2452_v54, 2  ;;  %v2111_v48 = vadd.f32 %v2107_v61, %v2099_v3 }
 0x229   :  { %v2447_v51 = vadd.f32 %v6248_v23, %v2435_v44  ;;  %v2112_v0 = vadd.f32 %v2108_v49, %v2100_v43  ;;  %v2467_v30 = vrot.slane %v2463_v37, 3  ;;  %v2487_v14 = vmul.f32 %v5191_v16, %v6168_v4 }
 0x22a   :  { %v2448_v10 = vadd.f32 %v6250_v38, %v2436_v62  ;;  %v2468_v27 = vrot.slane %v2464_v7, 3  ;;  %v2488_v58 = vmul.f32 %v5195_v21, %v6168_v4  ;;  %v2371_v57 = vadd.f32 %v2367_v34, %v6169_v24 }
 0x22b   :  { %v2459_v28 = vadd.f32 %v2455_v60, %v2447_v51  ;;  %v2372_v32 = vadd.f32 %v2368_v25, %v6169_v24  ;;  %v2479_v50 = vrot.slane %v6251_v9, 3  ;;  %v2480_v45 = vrot.slane %v6252_v29, 3 }
 0x22c   :  { %v2460_v36 = vadd.f32 %v2456_v55, %v2448_v10  ;;  %v2503_v13 = vrot.slane %v2243_v5, 7  ;;  %v2504_v11 = vrot.slane %v2244_v53, 7  ;;  %v2115_v16 = vadd.f32 %v2111_v48, %v6175_v17 }
 0x22d   :  { %v2471_v61 = vadd.f32 %v2467_v30, %v2459_v28  ;;  %v2116_v63 = vadd.f32 %v2112_v0, %v6175_v17  ;;  %v2491_v18 = vrot.slane %v2487_v14, 3  ;;  %v2492_v21 = vrot.slane %v2488_v58, 3 }
 0x22e   :  { %v2472_v3 = vadd.f32 %v2468_v27, %v2460_v36  ;;  %v2509_v4 = vrot.slane %v2371_v57, 6  ;;  %v2510_v59 = vrot.slane %v2372_v32, 6  ;;  %v2519_v20 = vsel %vm754_vm6, %v2115_v16, %v2503_v13 }
 0x22f   :  { %v2483_v52 = vadd.f32 %v2479_v50, %v2471_v61  ;;  %v2520_v46 = vsel %vm754_vm6, %v2116_v63, %v2504_v11 }
 0x230   :  { %v2484_v26 = vadd.f32 %v2480_v45, %v2472_v3  ;;  %v2521_v19 = vsel %vm757_vm7, %v2519_v20, %v2509_v4  ;;  %v2522_v17 = vsel %vm757_vm7, %v2520_v46, %v2510_v59 }
 0x231   :  { %v2495_v31 = vadd.f32 %v2491_v18, %v2483_v52 }
 0x232   :  { %v2496_v24 = vadd.f32 %v2492_v21, %v2484_v26 }
 0x233   :  { %v2499_v41 = vadd.f32 %v2495_v31, %v6188_v12 }
 0x234   :  { %v2500_v40 = vadd.f32 %v2496_v24, %v6188_v12 }
 0x235   :  { %v2515_v56 = vrot.slane %v2499_v41, 5 }
 0x236   :  { %v2516_v47 = vrot.slane %v2500_v40, 5 }
 0x237   :  { %v2523_v8 = vsel %vm760_vm8, %v2521_v19, %v2515_v56 }
 0x238   :  { %v2524_v1 = vsel %vm760_vm8, %v2522_v17, %v2516_v47  ;;  %v2525_v54 = vadd.f32 %v2768_v42, %v2523_v8 }
 0x239   :  { %v2526_v22 = vadd.f32 %v2524_v1, %v6253_v6 }
 0x23a   :  { %v2527_v43 = vmax.f32 %v2525_v54, 0.0 }
 0x23b   :  { %v2528_v33 = vmax.f32 %v2526_v22, 0.0 }
 0x23d   :  { %v2531_v39 = vcombine.low %v2527_v43, %v2528_v33 }
 0x23f   :  { %2534 = vst [vmem:[#allocation12 + $0x8] sm:$0xff] %v2531_v39 }
 0x240   :  { %2848 = shalt.err (!%p2845_p1)
}
 0x241   :  { %s6254_s2 = smov 8   ;;  %s6255_s26 = smov 128  }
 0x242   :  { %s6256_s10 = sld [smem:[#allocation104_spill]] }
 0x248   :  { %2546 = dma.vmem_to_hbm [thread:$0]  %s2541_s7, 256, %s6256_s10, [#allocation4], %s6255_s26, %s6255_s26, %s6254_s2  }
 0x249   :  { %2865 = dma.done.wait [#allocation4], 256  }
 0x24a   :  { %2866 = vsyncadd [#allocation4], 4294967040 }
 0x24b   :  { %2550 = vsyncpa [#allocation3], 1 }
 0x24c   :  { %2551 = vsyncpa [#allocation4], 1 }
 0x24d   :  { %2552 = vsyncpa [#allocation5], 1 }
 0x24e   :  { %2553 = vsyncpa [#allocation8], 1 }
 0x24f   :  { %2554 = vsyncpa [#allocation11], 1 }

</bundles_post_ra>
